<compile_context>
chip_gen: v5e
topology: v5e:2x2
jax: 0.10.0
libtpu: 0.0.40
codegen_flags: <defaults>
</compile_context>

<pallas_src>
import functools

import jax
import jax.numpy as jnp
from jax import lax
from jax.experimental import pallas as pl
from jax.experimental.pallas import tpu as pltpu

EPS = 1e-5


def _silu(x):
    return x * jax.nn.sigmoid(x)          # sigmoid stays on the EUP slot


def _layernorm(x, gamma, beta):
    mu = jnp.mean(x, axis=-1, keepdims=True)
    var = jnp.mean((x - mu) ** 2, axis=-1, keepdims=True)
    return (x - mu) * lax.rsqrt(var + EPS) * gamma + beta


# ---------------------------------------------------------------------------
# Kernel 1: edge MLP + scatter-sum into the per-destination aggregate.
# grid = (time, edge_splits, edge_tiles); the innermost axis is the reduction.
def _edge_agg_kernel(dst_ref, xedge_ref,
                     ew1_ref, eb1_ref, ew2_ref, eb2_ref, eg_ref, ebt_ref,
                     agg_ref):
    i = pl.program_id(2)

    # Relies on row-major grid order (innermost axis fastest), so the resident
    # output block is re-zeroed for every (t, split) before any edge tile lands.
    @pl.when(i == 0)
    def _():
        agg_ref[...] = jnp.zeros_like(agg_ref)

    # Edge MLP: one fused K = de+ds+dd bf16 matmul (inputs pre-gathered and
    # concatenated host-side), f32 accumulation; SiLU / LayerNorm in f32.
    h = jnp.dot(xedge_ref[...], ew1_ref[...],
                preferred_element_type=jnp.float32) + eb1_ref[...]
    h = _silu(h)
    y = jnp.dot(h.astype(jnp.bfloat16), ew2_ref[...],
                preferred_element_type=jnp.float32) + eb2_ref[...]
    eout = _layernorm(y, eg_ref[...], ebt_ref[...])            # (te, doe) f32

    # Vectorized scatter-sum on the MXU: build the transposed one-hot (N, te)
    # directly (sublane iota == lane-resident dst row -> no XLU transpose, no
    # per-edge scalar loop). Padded edges carry the sentinel index N, so they
    # hit no row and no per-edge masking is needed. The one-hot / eout stay in
    # f32 so the sum matches a float32 segment_sum (drop to bf16 if tolerances
    # allow a faster pass).
    n_rows, te = agg_ref.shape[0], eout.shape[0]
    onehot = (lax.broadcasted_iota(jnp.int32, (n_rows, te), 0)
              == dst_ref[...]).astype(jnp.float32)
    agg_ref[...] += jnp.dot(onehot, eout, preferred_element_type=jnp.float32)


# ---------------------------------------------------------------------------
# Kernel 2: node MLP + residual, tiled over destination-node tiles (parallel).
def _node_mlp_kernel(agg_ref, grid_ref,
                     nw1_ref, nb1_ref, nw2_ref, nb2_ref, g_ref, b_ref,
                     out_ref, cat_ref):
    doe = agg_ref.shape[-1]
    dd = grid_ref.shape[-1]
    agg = jnp.sum(agg_ref[...], axis=0)                # merge per-split partials (S,tn,doe)->(tn,doe)
    g32 = grid_ref[...]

    # K-fused first Linear: pack [agg | grid] into one bf16 buffer (K = doe+dd).
    cat_ref[:, 0:doe] = agg.astype(jnp.bfloat16)
    cat_ref[:, doe:doe + dd] = g32.astype(jnp.bfloat16)

    h = jnp.dot(cat_ref[...], nw1_ref[...],
                preferred_element_type=jnp.float32) + nb1_ref[...]
    h = _silu(h)
    y = jnp.dot(h.astype(jnp.bfloat16), nw2_ref[...],
                preferred_element_type=jnp.float32) + nb2_ref[...]
    out_ref[...] = _layernorm(y, g_ref[...], b_ref[...]) + g32


# ---------------------------------------------------------------------------
def _decoder_call(m2g_efeat, grid_nfeat, mesh_nfeat, src_idx, dst_idx, params,
                  edge_tile, node_tile, edge_splits):
    T, Ng, dd = grid_nfeat.shape
    _, Nm, ds = mesh_nfeat.shape
    E, de = m2g_efeat.shape
    hidden = params["eb1"].shape[-1]
    doe = params["eb2"].shape[-1]
    dod = params["nb2"].shape[-1]
    assert dod == dd, "residual requires output_dim_dst_nodes == input_dim_dst_nodes"
    for d in (de, ds, dd, doe, dod, hidden):
        assert d % 128 == 0, "feature dims must be lane-dense (multiples of 128)"
    assert edge_tile % 128 == 0 and node_tile % 8 == 0

    bf = lambda a: jnp.asarray(a, jnp.bfloat16)
    f32 = lambda a: jnp.asarray(a, jnp.float32)

    # ---- geometry ----------------------------------------------------------
    n_tiles = pl.cdiv(E, edge_tile)
    splits = max(1, min(int(edge_splits), int(n_tiles)))   # >1 only helps v7x (2 TCs) when T==1
    n_inner = pl.cdiv(n_tiles, splits)
    e_pad = splits * n_inner * edge_tile

    n_node_tiles = pl.cdiv(Ng, node_tile)
    ng_pad = n_node_tiles * node_tile
    din = de + ds + dd

    # ---- host-side clamp + pre-gather + concat (no in-kernel gather loops) --
    src = jnp.clip(jnp.asarray(src_idx, jnp.int32), 0, Nm - 1)
    dst = jnp.clip(jnp.asarray(dst_idx, jnp.int32), 0, Ng - 1)

    x_edge = jnp.concatenate(
        [jnp.broadcast_to(bf(m2g_efeat)[None], (T, E, de)),
         bf(mesh_nfeat)[:, src, :],
         bf(grid_nfeat)[:, dst, :]],
        axis=-1)
    x_edge = jnp.pad(x_edge, ((0, 0), (0, e_pad - E), (0, 0)))          # (T, e_pad, din) bf16

    # dst indices as a lane-resident row; padded edges -> sentinel ng_pad (zero one-hot row).
    dst_row = jnp.full((1, e_pad), ng_pad, jnp.int32).at[0, :E].set(dst)

    grid_p = jnp.pad(f32(grid_nfeat), ((0, 0), (0, ng_pad - Ng), (0, 0)))  # (T, ng_pad, dd) f32

    edge_weights = (bf(params["ew1"]), f32(params["eb1"]), bf(params["ew2"]),
                    f32(params["eb2"]), f32(params["eg"]), f32(params["ebt"]))
    node_weights = (bf(params["nw1"]), f32(params["nb1"]), bf(params["nw2"]),
                    f32(params["nb2"]), f32(params["ng"]), f32(params["nbt"]))

    def const_spec(shape):
        # Full-array block with a constant index map -> stays VMEM-resident across the grid.
        return pl.BlockSpec(shape, lambda *_: (0,) * len(shape))

    cp = pltpu.CompilerParams(
        dimension_semantics=("parallel", "parallel", "arbitrary"),
        vmem_limit_bytes=32 * 1024 * 1024,
    )

    # ---- stage 1: edge MLP + MXU scatter-sum -> per-split aggregates --------
    agg_partial = pl.pallas_call(
        _edge_agg_kernel,
        out_shape=jax.ShapeDtypeStruct((T, splits, ng_pad, doe), jnp.float32),
        grid=(T, splits, n_inner),
        in_specs=[
            pl.BlockSpec((1, edge_tile), lambda t, c, i: (0, c * n_inner + i)),
            pl.BlockSpec((None, edge_tile, din), lambda t, c, i: (t, c * n_inner + i, 0)),
        ] + [const_spec(w.shape) for w in edge_weights],
        out_specs=pl.BlockSpec((None, None, ng_pad, doe), lambda t, c, i: (t, c, 0, 0)),
        compiler_params=cp,
    )(dst_row, x_edge, *edge_weights)

    # ---- stage 2: node MLP + residual, tiled (parallel) over node tiles -----
    out = pl.pallas_call(
        _node_mlp_kernel,
        out_shape=jax.ShapeDtypeStruct((T, ng_pad, dod), jnp.float32),
        grid=(T, n_node_tiles),
        in_specs=[
            pl.BlockSpec((None, splits, node_tile, doe), lambda t, n: (t, 0, n, 0)),
            pl.BlockSpec((None, node_tile, dd), lambda t, n: (t, n, 0)),
        ] + [const_spec(w.shape) for w in node_weights],
        out_specs=pl.BlockSpec((None, node_tile, dod), lambda t, n: (t, n, 0)),
        scratch_shapes=[pltpu.VMEM((node_tile, doe + dd), jnp.bfloat16)],
        compiler_params=pltpu.CompilerParams(
            dimension_semantics=("parallel", "parallel"),
            vmem_limit_bytes=32 * 1024 * 1024,
        ),
    )(agg_partial, grid_p, *node_weights)

    return out[:, :Ng, :]


@functools.partial(jax.jit, static_argnames=("edge_tile", "node_tile", "edge_splits"))
def mesh_graph_decoder(m2g_efeat, grid_nfeat, mesh_nfeat, src_idx, dst_idx, params, *,
                       edge_tile=256, node_tile=128, edge_splits=2):
    """Mirror of MeshGraphDecoder.forward; optional leading time dim folded into the grids."""
    has_time = mesh_nfeat.ndim == 3
    if not has_time:
        mesh_nfeat = mesh_nfeat[None]
        grid_nfeat = grid_nfeat[None]
    out = _decoder_call(m2g_efeat, grid_nfeat, mesh_nfeat, src_idx, dst_idx, params,
                        edge_tile, node_tile, edge_splits)
    return out if has_time else out[0]


# ---------------------------------------------------------------------------
def init_params(key, de, ds, dd, doe, dod, hidden):
    """Deterministic synthetic params (uniform +-1/sqrt(fan_in), like torch Linear)."""
    ks = jax.random.split(key, 4)

    def lin(k, fan_in, fan_out):
        bound = 1.0 / jnp.sqrt(fan_in)
        kw, kb = jax.random.split(k)
        w = jax.random.uniform(kw, (fan_in, fan_out), jnp.float32, -bound, bound)
        b = jax.random.uniform(kb, (1, fan_out), jnp.float32, -bound, bound)
        return w, b

    ew1, eb1 = lin(ks[0], de + ds + dd, hidden)
    ew2, eb2 = lin(ks[1], hidden, doe)
    nw1, nb1 = lin(ks[2], doe + dd, hidden)
    nw2, nb2 = lin(ks[3], hidden, dod)
    return dict(
        ew1=ew1, eb1=eb1, ew2=ew2, eb2=eb2,
        eg=jnp.ones((1, doe), jnp.float32), ebt=jnp.zeros((1, doe), jnp.float32),
        nw1=nw1, nb1=nb1, nw2=nw2, nb2=nb2,
        ng=jnp.ones((1, dod), jnp.float32), nbt=jnp.zeros((1, dod), jnp.float32),
    )


def reference(m2g_efeat, grid_nfeat, mesh_nfeat, src_idx, dst_idx, params):
    """Pure-JAX reference with the same mixed precision (bf16 matmul inputs, f32 accumulation)."""
    bf16 = jnp.bfloat16
    dot = lambda a, b: jnp.dot(a.astype(bf16), b.astype(bf16), preferred_element_type=jnp.float32)
    x = jnp.concatenate(
        [m2g_efeat.astype(bf16), mesh_nfeat.astype(bf16)[src_idx], grid_nfeat.astype(bf16)[dst_idx]],
        axis=-1)
    h = _silu(dot(x, params["ew1"]) + params["eb1"])
    e_out = _layernorm(dot(h, params["ew2"]) + params["eb2"], params["eg"], params["ebt"])
    agg = jax.ops.segment_sum(e_out, dst_idx, num_segments=grid_nfeat.shape[0])
    cat = jnp.concatenate([agg.astype(bf16), grid_nfeat.astype(bf16)], axis=-1)
    h2 = _silu(dot(cat, params["nw1"]) + params["nb1"])
    n_out = _layernorm(dot(h2, params["nw2"]) + params["nb2"], params["ng"], params["nbt"])
    return n_out + grid_nfeat


if __name__ == "__main__":
    key = jax.random.PRNGKey(0)
    k1, k2, k3, k4, k5, kp, kt = jax.random.split(key, 7)

    # small, lane-dense shapes (all feature dims multiples of 128; module defaults are 512)
    E, Nm, Ng = 256, 64, 64
    de = ds = dd = doe = dod = hidden = 128

    m2g_efeat = jax.random.normal(k1, (E, de), jnp.float32)
    mesh_nfeat = jax.random.normal(k2, (Nm, ds), jnp.float32)
    grid_nfeat = jax.random.normal(k3, (Ng, dd), jnp.float32)
    src_idx = jax.random.randint(k4, (E,), 0, Nm, jnp.int32)
    dst_idx = jax.random.randint(k5, (E,), 0, Ng, jnp.int32)
    params = init_params(kp, de, ds, dd, doe, dod, hidden)

    # single-timestep path
    out = mesh_graph_decoder(m2g_efeat, grid_nfeat, mesh_nfeat, src_idx, dst_idx, params)
    out = jax.block_until_ready(out)
    ref = reference(m2g_efeat, grid_nfeat, mesh_nfeat, src_idx, dst_idx, params)
    assert out.shape == (Ng, dod)
    err = float(jnp.max(jnp.abs(out - ref)))
    assert err < 5e-3, f"single-step mismatch vs reference: {err}"

    # time-dim path (folded into the kernel grid; no per-step Python relaunch)
    T = 2
    mesh_t = jax.random.normal(kt, (T, Nm, ds), jnp.float32)
    grid_t = jnp.stack([grid_nfeat, grid_nfeat * 0.5 + 1.0])
    out_t = mesh_graph_decoder(m2g_efeat, grid_t, mesh_t, src_idx, dst_idx, params)
    out_t = jax.block_until_ready(out_t)
    ref_t = jnp.stack([
        reference(m2g_efeat, grid_t[t], mesh_t[t], src_idx, dst_idx, params) for t in range(T)
    ])
    assert out_t.shape == (T, Ng, dod)
    err_t = float(jnp.max(jnp.abs(out_t - ref_t)))
    assert err_t < 5e-3, f"time-dim mismatch vs reference: {err_t}"

    print("KERNEL_OK")
</pallas_src>

<mosaic_0001>
module attributes {stable_mosaic.version = 11 : i64} {
  func.func @_edge_agg_kernel(%arg0: i32, %arg1: i32, %arg2: i32, %arg3: memref<1x256xi32, #tpu.memory_space<vmem>>, %arg4: memref<1x256x384xbf16, #tpu.memory_space<vmem>>, %arg5: memref<384x128xbf16, #tpu.memory_space<vmem>>, %arg6: memref<1x128xf32, #tpu.memory_space<vmem>>, %arg7: memref<128x128xbf16, #tpu.memory_space<vmem>>, %arg8: memref<1x128xf32, #tpu.memory_space<vmem>>, %arg9: memref<1x128xf32, #tpu.memory_space<vmem>>, %arg10: memref<1x128xf32, #tpu.memory_space<vmem>>, %arg11: memref<1x1x128x128xf32, #tpu.memory_space<vmem>>) attributes {dimension_semantics = [#tpu.dimension_semantics<parallel>, #tpu.dimension_semantics<parallel>, #tpu.dimension_semantics<arbitrary>], iteration_bounds = array<i64: 1, 1, 1>, scalar_prefetch = 0 : i64, scratch_operands = 0 : i64, tpu.core_type = #tpu.core_type<tc>, window_params = [{transform_indices = @transform_0, window_bounds = array<i64: 1, 256>}, {transform_indices = @transform_1, window_bounds = array<i64: 1, 256, 384>}, {pipeline_mode = #tpu.pipeline_mode<synchronous>, transform_indices = @transform_2, window_bounds = array<i64: 384, 128>}, {pipeline_mode = #tpu.pipeline_mode<synchronous>, transform_indices = @transform_3, window_bounds = array<i64: 1, 128>}, {pipeline_mode = #tpu.pipeline_mode<synchronous>, transform_indices = @transform_4, window_bounds = array<i64: 128, 128>}, {pipeline_mode = #tpu.pipeline_mode<synchronous>, transform_indices = @transform_5, window_bounds = array<i64: 1, 128>}, {pipeline_mode = #tpu.pipeline_mode<synchronous>, transform_indices = @transform_6, window_bounds = array<i64: 1, 128>}, {pipeline_mode = #tpu.pipeline_mode<synchronous>, transform_indices = @transform_7, window_bounds = array<i64: 1, 128>}, {transform_indices = @transform_8, window_bounds = array<i64: 1, 1, 128, 128>}]} {
    %c0_i32 = arith.constant 0 : i32
    %0 = arith.cmpi eq, %arg2, %c0_i32 : i32
    %1 = arith.extui %0 : i1 to i32
    %c0_i32_0 = arith.constant 0 : i32
    %2 = arith.cmpi ne, %1, %c0_i32_0 : i32
    scf.if %2 {
      %cst_33 = arith.constant 0.000000e+00 : f32
      %59 = vector.broadcast %cst_33 : f32 to vector<128x128xf32>
      %c0_34 = arith.constant 0 : index
      %c0_35 = arith.constant 0 : index
      %c0_36 = arith.constant 0 : index
      %c0_37 = arith.constant 0 : index
      %60 = vector.load %arg11[%c0_34, %c0_35, %c0_36, %c0_37] : memref<1x1x128x128xf32, #tpu.memory_space<vmem>>, vector<1x1x128x128xf32>
      %61 = vector.shape_cast %60 : vector<1x1x128x128xf32> to vector<128x128xf32>
      %62 = vector.shape_cast %59 : vector<128x128xf32> to vector<1x1x128x128xf32>
      tpu.vector_store %arg11[%c0_34, %c0_35, %c0_36, %c0_37], %62 {strides = array<i32>} : memref<1x1x128x128xf32, #tpu.memory_space<vmem>>, vector<1x1x128x128xf32>,
    } else {
    }
    %c0 = arith.constant 0 : index
    %c0_1 = arith.constant 0 : index
    %c0_2 = arith.constant 0 : index
    %3 = vector.load %arg4[%c0, %c0_1, %c0_2] : memref<1x256x384xbf16, #tpu.memory_space<vmem>>, vector<1x256x384xbf16>
    %4 = vector.shape_cast %3 : vector<1x256x384xbf16> to vector<256x384xbf16>
    %c0_3 = arith.constant 0 : index
    %c0_4 = arith.constant 0 : index
    %5 = vector.load %arg5[%c0_3, %c0_4] : memref<384x128xbf16, #tpu.memory_space<vmem>>, vector<384x128xbf16>
    %cst = arith.constant dense<0.000000e+00> : vector<256x128xf32>
    %6 = tpu.matmul %4, %5, %cst {dimension_numbers = #tpu.dot_dimension_numbers<[1], [0], [0], [1], [0, 0, 1, 1], [], []>} : vector<256x384xbf16>, vector<384x128xbf16>, vector<256x128xf32> -> vector<256x128xf32>
    %c0_5 = arith.constant 0 : index
    %c0_6 = arith.constant 0 : index
    %7 = vector.load %arg6[%c0_5, %c0_6] : memref<1x128xf32, #tpu.memory_space<vmem>>, vector<1x128xf32>
    %8 = vector.broadcast %7 : vector<1x128xf32> to vector<256x128xf32>
    %9 = arith.addf %6, %8 : vector<256x128xf32>
    %10 = arith.negf %9 : vector<256x128xf32>
    %11 = math.exp %10 : vector<256x128xf32>
    %cst_7 = arith.constant 1.000000e+00 : f32
    %12 = vector.broadcast %cst_7 : f32 to vector<256x128xf32>
    %13 = arith.addf %12, %11 : vector<256x128xf32>
    %14 = arith.divf %12, %13 : vector<256x128xf32>
    %15 = arith.mulf %9, %14 : vector<256x128xf32>
    %16 = arith.truncf %15 : vector<256x128xf32> to vector<256x128xbf16>
    %c0_8 = arith.constant 0 : index
    %c0_9 = arith.constant 0 : index
    %17 = vector.load %arg7[%c0_8, %c0_9] : memref<128x128xbf16, #tpu.memory_space<vmem>>, vector<128x128xbf16>
    %cst_10 = arith.constant dense<0.000000e+00> : vector<256x128xf32>
    %18 = tpu.matmul %16, %17, %cst_10 {dimension_numbers = #tpu.dot_dimension_numbers<[1], [0], [0], [1], [0, 0, 1, 1], [], []>} : vector<256x128xbf16>, vector<128x128xbf16>, vector<256x128xf32> -> vector<256x128xf32>
    %c0_11 = arith.constant 0 : index
    %c0_12 = arith.constant 0 : index
    %19 = vector.load %arg8[%c0_11, %c0_12] : memref<1x128xf32, #tpu.memory_space<vmem>>, vector<1x128xf32>
    %20 = vector.broadcast %19 : vector<1x128xf32> to vector<256x128xf32>
    %21 = arith.addf %18, %20 : vector<256x128xf32>
    %c0_13 = arith.constant 0 : index
    %c0_14 = arith.constant 0 : index
    %22 = vector.load %arg9[%c0_13, %c0_14] : memref<1x128xf32, #tpu.memory_space<vmem>>, vector<1x128xf32>
    %c0_15 = arith.constant 0 : index
    %c0_16 = arith.constant 0 : index
    %23 = vector.load %arg10[%c0_15, %c0_16] : memref<1x128xf32, #tpu.memory_space<vmem>>, vector<1x128xf32>
    %cst_17 = arith.constant dense<0.000000e+00> : vector<256xf32>
    %24 = vector.multi_reduction <add>, %21, %cst_17 [1] : vector<256x128xf32> to vector<256xf32>
    %25 = vector.shape_cast %24 : vector<256xf32> to vector<256x1xf32>
    %cst_18 = arith.constant 1.280000e+02 : f32
    %26 = vector.broadcast %cst_18 : f32 to vector<256x1xf32>
    %27 = arith.divf %25, %26 : vector<256x1xf32>
    %28 = vector.broadcast %27 : vector<256x1xf32> to vector<256x128xf32>
    %29 = arith.subf %21, %28 : vector<256x128xf32>
    %30 = arith.mulf %29, %29 : vector<256x128xf32>
    %cst_19 = arith.constant dense<0.000000e+00> : vector<256xf32>
    %31 = vector.multi_reduction <add>, %30, %cst_19 [1] : vector<256x128xf32> to vector<256xf32>
    %32 = vector.shape_cast %31 : vector<256xf32> to vector<256x1xf32>
    %cst_20 = arith.constant 1.280000e+02 : f32
    %33 = vector.broadcast %cst_20 : f32 to vector<256x1xf32>
    %34 = arith.divf %32, %33 : vector<256x1xf32>
    %35 = vector.broadcast %27 : vector<256x1xf32> to vector<256x128xf32>
    %36 = arith.subf %21, %35 : vector<256x128xf32>
    %cst_21 = arith.constant 9.99999974E-6 : f32
    %37 = vector.broadcast %cst_21 : f32 to vector<256x1xf32>
    %38 = arith.addf %34, %37 : vector<256x1xf32>
    %39 = math.rsqrt %38 : vector<256x1xf32>
    %40 = vector.broadcast %39 : vector<256x1xf32> to vector<256x128xf32>
    %41 = arith.mulf %36, %40 : vector<256x128xf32>
    %42 = vector.broadcast %22 : vector<1x128xf32> to vector<256x128xf32>
    %43 = arith.mulf %41, %42 : vector<256x128xf32>
    %44 = vector.broadcast %23 : vector<1x128xf32> to vector<256x128xf32>
    %45 = arith.addf %43, %44 : vector<256x128xf32>
    %46 = tpu.iota {dimensions = array<i32: 0>} : vector<128x256xi32>
    %c0_22 = arith.constant 0 : index
    %c0_23 = arith.constant 0 : index
    %47 = vector.load %arg3[%c0_22, %c0_23] : memref<1x256xi32, #tpu.memory_space<vmem>>, vector<1x256xi32>
    %48 = vector.broadcast %47 : vector<1x256xi32> to vector<128x256xi32>
    %49 = arith.cmpi eq, %46, %48 : vector<128x256xi32>
    %50 = arith.extui %49 : vector<128x256xi1> to vector<128x256xi32>
    %51 = arith.sitofp %50 : vector<128x256xi32> to vector<128x256xf32>
    %c0_24 = arith.constant 0 : index
    %c0_25 = arith.constant 0 : index
    %c0_26 = arith.constant 0 : index
    %c0_27 = arith.constant 0 : index
    %52 = vector.load %arg11[%c0_24, %c0_25, %c0_26, %c0_27] : memref<1x1x128x128xf32, #tpu.memory_space<vmem>>, vector<1x1x128x128xf32>
    %53 = vector.shape_cast %52 : vector<1x1x128x128xf32> to vector<128x128xf32>
    %cst_28 = arith.constant dense<0.000000e+00> : vector<128x128xf32>
    %54 = tpu.matmul %51, %45, %cst_28 {dimension_numbers = #tpu.dot_dimension_numbers<[1], [0], [0], [1], [0, 0, 1, 1], [], []>} : vector<128x256xf32>, vector<256x128xf32>, vector<128x128xf32> -> vector<128x128xf32>
    %55 = arith.addf %53, %54 : vector<128x128xf32>
    %c0_29 = arith.constant 0 : index
    %c0_30 = arith.constant 0 : index
    %c0_31 = arith.constant 0 : index
    %c0_32 = arith.constant 0 : index
    %56 = vector.load %arg11[%c0_29, %c0_30, %c0_31, %c0_32] : memref<1x1x128x128xf32, #tpu.memory_space<vmem>>, vector<1x1x128x128xf32>
    %57 = vector.shape_cast %56 : vector<1x1x128x128xf32> to vector<128x128xf32>
    %58 = vector.shape_cast %55 : vector<128x128xf32> to vector<1x1x128x128xf32>
    tpu.vector_store %arg11[%c0_29, %c0_30, %c0_31, %c0_32], %58 {strides = array<i32>} : memref<1x1x128x128xf32, #tpu.memory_space<vmem>>, vector<1x1x128x128xf32>,
    return
  }
  func.func @transform_0(%arg0: i32, %arg1: i32, %arg2: i32) -> (i32, i32) {
    %c1_i32 = arith.constant 1 : i32
    %0 = arith.muli %arg1, %c1_i32 : i32
    %1 = arith.addi %0, %arg2 : i32
    %c0_i32 = arith.constant 0 : i32
    %c0_i32_0 = arith.constant 0 : i32
    return %c0_i32, %1 : i32, i32
  }
  func.func @transform_1(%arg0: i32, %arg1: i32, %arg2: i32) -> (i32, i32, i32) {
    %c1_i32 = arith.constant 1 : i32
    %0 = arith.muli %arg1, %c1_i32 : i32
    %1 = arith.addi %0, %arg2 : i32
    %c0_i32 = arith.constant 0 : i32
    %c0_i32_0 = arith.constant 0 : i32
    return %arg0, %1, %c0_i32 : i32, i32, i32
  }
  func.func @transform_2(%arg0: i32, %arg1: i32, %arg2: i32) -> (i32, i32) {
    %c0_i32 = arith.constant 0 : i32
    %c0_i32_0 = arith.constant 0 : i32
    %c0_i32_1 = arith.constant 0 : i32
    return %c0_i32, %c0_i32_0 : i32, i32
  }
  func.func @transform_3(%arg0: i32, %arg1: i32, %arg2: i32) -> (i32, i32) {
    %c0_i32 = arith.constant 0 : i32
    %c0_i32_0 = arith.constant 0 : i32
    %c0_i32_1 = arith.constant 0 : i32
    return %c0_i32, %c0_i32_0 : i32, i32
  }
  func.func @transform_4(%arg0: i32, %arg1: i32, %arg2: i32) -> (i32, i32) {
    %c0_i32 = arith.constant 0 : i32
    %c0_i32_0 = arith.constant 0 : i32
    %c0_i32_1 = arith.constant 0 : i32
    return %c0_i32, %c0_i32_0 : i32, i32
  }
  func.func @transform_5(%arg0: i32, %arg1: i32, %arg2: i32) -> (i32, i32) {
    %c0_i32 = arith.constant 0 : i32
    %c0_i32_0 = arith.constant 0 : i32
    %c0_i32_1 = arith.constant 0 : i32
    return %c0_i32, %c0_i32_0 : i32, i32
  }
  func.func @transform_6(%arg0: i32, %arg1: i32, %arg2: i32) -> (i32, i32) {
    %c0_i32 = arith.constant 0 : i32
    %c0_i32_0 = arith.constant 0 : i32
    %c0_i32_1 = arith.constant 0 : i32
    return %c0_i32, %c0_i32_0 : i32, i32
  }
  func.func @transform_7(%arg0: i32, %arg1: i32, %arg2: i32) -> (i32, i32) {
    %c0_i32 = arith.constant 0 : i32
    %c0_i32_0 = arith.constant 0 : i32
    %c0_i32_1 = arith.constant 0 : i32
    return %c0_i32, %c0_i32_0 : i32, i32
  }
  func.func @transform_8(%arg0: i32, %arg1: i32, %arg2: i32) -> (i32, i32, i32, i32) {
    %c0_i32 = arith.constant 0 : i32
    %c0_i32_0 = arith.constant 0 : i32
    %c0_i32_1 = arith.constant 0 : i32
    return %arg0, %arg1, %c0_i32, %c0_i32_0 : i32, i32, i32, i32
  }
}

module attributes {stable_mosaic.version = 11 : i64} {
  func.func @_node_mlp_kernel(%arg0: i32, %arg1: i32, %arg2: memref<1x1x128x128xf32, #tpu.memory_space<vmem>>, %arg3: memref<1x128x128xf32, #tpu.memory_space<vmem>>, %arg4: memref<256x128xbf16, #tpu.memory_space<vmem>>, %arg5: memref<1x128xf32, #tpu.memory_space<vmem>>, %arg6: memref<128x128xbf16, #tpu.memory_space<vmem>>, %arg7: memref<1x128xf32, #tpu.memory_space<vmem>>, %arg8: memref<1x128xf32, #tpu.memory_space<vmem>>, %arg9: memref<1x128xf32, #tpu.memory_space<vmem>>, %arg10: memref<1x128x128xf32, #tpu.memory_space<vmem>>, %arg11: memref<128x256xbf16, #tpu.memory_space<vmem>>) attributes {dimension_semantics = [#tpu.dimension_semantics<parallel>, #tpu.dimension_semantics<parallel>], iteration_bounds = array<i64: 1, 1>, scalar_prefetch = 0 : i64, scratch_operands = 1 : i64, tpu.core_type = #tpu.core_type<tc>, window_params = [{transform_indices = @transform_0, window_bounds = array<i64: 1, 1, 128, 128>}, {transform_indices = @transform_1, window_bounds = array<i64: 1, 128, 128>}, {pipeline_mode = #tpu.pipeline_mode<synchronous>, transform_indices = @transform_2, window_bounds = array<i64: 256, 128>}, {pipeline_mode = #tpu.pipeline_mode<synchronous>, transform_indices = @transform_3, window_bounds = array<i64: 1, 128>}, {pipeline_mode = #tpu.pipeline_mode<synchronous>, transform_indices = @transform_4, window_bounds = array<i64: 128, 128>}, {pipeline_mode = #tpu.pipeline_mode<synchronous>, transform_indices = @transform_5, window_bounds = array<i64: 1, 128>}, {pipeline_mode = #tpu.pipeline_mode<synchronous>, transform_indices = @transform_6, window_bounds = array<i64: 1, 128>}, {pipeline_mode = #tpu.pipeline_mode<synchronous>, transform_indices = @transform_7, window_bounds = array<i64: 1, 128>}, {transform_indices = @transform_8, window_bounds = array<i64: 1, 128, 128>}]} {
    %c0 = arith.constant 0 : index
    %c0_0 = arith.constant 0 : index
    %c0_1 = arith.constant 0 : index
    %c0_2 = arith.constant 0 : index
    %0 = vector.load %arg2[%c0, %c0_0, %c0_1, %c0_2] : memref<1x1x128x128xf32, #tpu.memory_space<vmem>>, vector<1x1x128x128xf32>
    %1 = vector.shape_cast %0 : vector<1x1x128x128xf32> to vector<1x128x128xf32>
    %cst = arith.constant dense<0.000000e+00> : vector<128x128xf32>
    %2 = vector.multi_reduction <add>, %1, %cst [0] : vector<1x128x128xf32> to vector<128x128xf32>
    %c0_3 = arith.constant 0 : index
    %c0_4 = arith.constant 0 : index
    %c0_5 = arith.constant 0 : index
    %3 = vector.load %arg3[%c0_3, %c0_4, %c0_5] : memref<1x128x128xf32, #tpu.memory_space<vmem>>, vector<1x128x128xf32>
    %4 = vector.shape_cast %3 : vector<1x128x128xf32> to vector<128x128xf32>
    %5 = arith.truncf %2 : vector<128x128xf32> to vector<128x128xbf16>
    %c0_6 = arith.constant 0 : index
    %c0_7 = arith.constant 0 : index
    %6 = vector.load %arg11[%c0_6, %c0_7] : memref<128x256xbf16, #tpu.memory_space<vmem>>, vector<128x128xbf16>
    tpu.vector_store %arg11[%c0_6, %c0_7], %5 {strides = array<i32>} : memref<128x256xbf16, #tpu.memory_space<vmem>>, vector<128x128xbf16>,
    %7 = arith.truncf %4 : vector<128x128xf32> to vector<128x128xbf16>
    %c0_8 = arith.constant 0 : index
    %c128 = arith.constant 128 : index
    %8 = vector.load %arg11[%c0_8, %c128] : memref<128x256xbf16, #tpu.memory_space<vmem>>, vector<128x128xbf16>
    tpu.vector_store %arg11[%c0_8, %c128], %7 {strides = array<i32>} : memref<128x256xbf16, #tpu.memory_space<vmem>>, vector<128x128xbf16>,
    %c0_9 = arith.constant 0 : index
    %c0_10 = arith.constant 0 : index
    %9 = vector.load %arg11[%c0_9, %c0_10] : memref<128x256xbf16, #tpu.memory_space<vmem>>, vector<128x256xbf16>
    %c0_11 = arith.constant 0 : index
    %c0_12 = arith.constant 0 : index
    %10 = vector.load %arg4[%c0_11, %c0_12] : memref<256x128xbf16, #tpu.memory_space<vmem>>, vector<256x128xbf16>
    %cst_13 = arith.constant dense<0.000000e+00> : vector<128x128xf32>
    %11 = tpu.matmul %9, %10, %cst_13 {dimension_numbers = #tpu.dot_dimension_numbers<[1], [0], [0], [1], [0, 0, 1, 1], [], []>} : vector<128x256xbf16>, vector<256x128xbf16>, vector<128x128xf32> -> vector<128x128xf32>
    %c0_14 = arith.constant 0 : index
    %c0_15 = arith.constant 0 : index
    %12 = vector.load %arg5[%c0_14, %c0_15] : memref<1x128xf32, #tpu.memory_space<vmem>>, vector<1x128xf32>
    %13 = vector.broadcast %12 : vector<1x128xf32> to vector<128x128xf32>
    %14 = arith.addf %11, %13 : vector<128x128xf32>
    %15 = arith.negf %14 : vector<128x128xf32>
    %16 = math.exp %15 : vector<128x128xf32>
    %cst_16 = arith.constant 1.000000e+00 : f32
    %17 = vector.broadcast %cst_16 : f32 to vector<128x128xf32>
    %18 = arith.addf %17, %16 : vector<128x128xf32>
    %19 = arith.divf %17, %18 : vector<128x128xf32>
    %20 = arith.mulf %14, %19 : vector<128x128xf32>
    %21 = arith.truncf %20 : vector<128x128xf32> to vector<128x128xbf16>
    %c0_17 = arith.constant 0 : index
    %c0_18 = arith.constant 0 : index
    %22 = vector.load %arg6[%c0_17, %c0_18] : memref<128x128xbf16, #tpu.memory_space<vmem>>, vector<128x128xbf16>
    %cst_19 = arith.constant dense<0.000000e+00> : vector<128x128xf32>
    %23 = tpu.matmul %21, %22, %cst_19 {dimension_numbers = #tpu.dot_dimension_numbers<[1], [0], [0], [1], [0, 0, 1, 1], [], []>} : vector<128x128xbf16>, vector<128x128xbf16>, vector<128x128xf32> -> vector<128x128xf32>
    %c0_20 = arith.constant 0 : index
    %c0_21 = arith.constant 0 : index
    %24 = vector.load %arg7[%c0_20, %c0_21] : memref<1x128xf32, #tpu.memory_space<vmem>>, vector<1x128xf32>
    %25 = vector.broadcast %24 : vector<1x128xf32> to vector<128x128xf32>
    %26 = arith.addf %23, %25 : vector<128x128xf32>
    %c0_22 = arith.constant 0 : index
    %c0_23 = arith.constant 0 : index
    %27 = vector.load %arg8[%c0_22, %c0_23] : memref<1x128xf32, #tpu.memory_space<vmem>>, vector<1x128xf32>
    %c0_24 = arith.constant 0 : index
    %c0_25 = arith.constant 0 : index
    %28 = vector.load %arg9[%c0_24, %c0_25] : memref<1x128xf32, #tpu.memory_space<vmem>>, vector<1x128xf32>
    %cst_26 = arith.constant dense<0.000000e+00> : vector<128xf32>
    %29 = vector.multi_reduction <add>, %26, %cst_26 [1] : vector<128x128xf32> to vector<128xf32>
    %30 = vector.shape_cast %29 : vector<128xf32> to vector<128x1xf32>
    %cst_27 = arith.constant 1.280000e+02 : f32
    %31 = vector.broadcast %cst_27 : f32 to vector<128x1xf32>
    %32 = arith.divf %30, %31 : vector<128x1xf32>
    %33 = vector.broadcast %32 : vector<128x1xf32> to vector<128x128xf32>
    %34 = arith.subf %26, %33 : vector<128x128xf32>
    %35 = arith.mulf %34, %34 : vector<128x128xf32>
    %cst_28 = arith.constant dense<0.000000e+00> : vector<128xf32>
    %36 = vector.multi_reduction <add>, %35, %cst_28 [1] : vector<128x128xf32> to vector<128xf32>
    %37 = vector.shape_cast %36 : vector<128xf32> to vector<128x1xf32>
    %cst_29 = arith.constant 1.280000e+02 : f32
    %38 = vector.broadcast %cst_29 : f32 to vector<128x1xf32>
    %39 = arith.divf %37, %38 : vector<128x1xf32>
    %40 = vector.broadcast %32 : vector<128x1xf32> to vector<128x128xf32>
    %41 = arith.subf %26, %40 : vector<128x128xf32>
    %cst_30 = arith.constant 9.99999974E-6 : f32
    %42 = vector.broadcast %cst_30 : f32 to vector<128x1xf32>
    %43 = arith.addf %39, %42 : vector<128x1xf32>
    %44 = math.rsqrt %43 : vector<128x1xf32>
    %45 = vector.broadcast %44 : vector<128x1xf32> to vector<128x128xf32>
    %46 = arith.mulf %41, %45 : vector<128x128xf32>
    %47 = vector.broadcast %27 : vector<1x128xf32> to vector<128x128xf32>
    %48 = arith.mulf %46, %47 : vector<128x128xf32>
    %49 = vector.broadcast %28 : vector<1x128xf32> to vector<128x128xf32>
    %50 = arith.addf %48, %49 : vector<128x128xf32>
    %51 = arith.addf %50, %4 : vector<128x128xf32>
    %c0_31 = arith.constant 0 : index
    %c0_32 = arith.constant 0 : index
    %c0_33 = arith.constant 0 : index
    %52 = vector.load %arg10[%c0_31, %c0_32, %c0_33] : memref<1x128x128xf32, #tpu.memory_space<vmem>>, vector<1x128x128xf32>
    %53 = vector.shape_cast %52 : vector<1x128x128xf32> to vector<128x128xf32>
    %54 = vector.shape_cast %51 : vector<128x128xf32> to vector<1x128x128xf32>
    tpu.vector_store %arg10[%c0_31, %c0_32, %c0_33], %54 {strides = array<i32>} : memref<1x128x128xf32, #tpu.memory_space<vmem>>, vector<1x128x128xf32>,
    return
  }
  func.func @transform_0(%arg0: i32, %arg1: i32) -> (i32, i32, i32, i32) {
    %c0_i32 = arith.constant 0 : i32
    %c0_i32_0 = arith.constant 0 : i32
    %c0_i32_1 = arith.constant 0 : i32
    return %arg0, %c0_i32, %arg1, %c0_i32_0 : i32, i32, i32, i32
  }
  func.func @transform_1(%arg0: i32, %arg1: i32) -> (i32, i32, i32) {
    %c0_i32 = arith.constant 0 : i32
    %c0_i32_0 = arith.constant 0 : i32
    return %arg0, %arg1, %c0_i32 : i32, i32, i32
  }
  func.func @transform_2(%arg0: i32, %arg1: i32) -> (i32, i32) {
    %c0_i32 = arith.constant 0 : i32
    %c0_i32_0 = arith.constant 0 : i32
    %c0_i32_1 = arith.constant 0 : i32
    return %c0_i32, %c0_i32_0 : i32, i32
  }
  func.func @transform_3(%arg0: i32, %arg1: i32) -> (i32, i32) {
    %c0_i32 = arith.constant 0 : i32
    %c0_i32_0 = arith.constant 0 : i32
    %c0_i32_1 = arith.constant 0 : i32
    return %c0_i32, %c0_i32_0 : i32, i32
  }
  func.func @transform_4(%arg0: i32, %arg1: i32) -> (i32, i32) {
    %c0_i32 = arith.constant 0 : i32
    %c0_i32_0 = arith.constant 0 : i32
    %c0_i32_1 = arith.constant 0 : i32
    return %c0_i32, %c0_i32_0 : i32, i32
  }
  func.func @transform_5(%arg0: i32, %arg1: i32) -> (i32, i32) {
    %c0_i32 = arith.constant 0 : i32
    %c0_i32_0 = arith.constant 0 : i32
    %c0_i32_1 = arith.constant 0 : i32
    return %c0_i32, %c0_i32_0 : i32, i32
  }
  func.func @transform_6(%arg0: i32, %arg1: i32) -> (i32, i32) {
    %c0_i32 = arith.constant 0 : i32
    %c0_i32_0 = arith.constant 0 : i32
    %c0_i32_1 = arith.constant 0 : i32
    return %c0_i32, %c0_i32_0 : i32, i32
  }
  func.func @transform_7(%arg0: i32, %arg1: i32) -> (i32, i32) {
    %c0_i32 = arith.constant 0 : i32
    %c0_i32_0 = arith.constant 0 : i32
    %c0_i32_1 = arith.constant 0 : i32
    return %c0_i32, %c0_i32_0 : i32, i32
  }
  func.func @transform_8(%arg0: i32, %arg1: i32) -> (i32, i32, i32) {
    %c0_i32 = arith.constant 0 : i32
    %c0_i32_0 = arith.constant 0 : i32
    return %arg0, %arg1, %c0_i32 : i32, i32, i32
  }
}

</mosaic_0001>

<bundles_post_ra>
// kernel: mesh_graph_decoder.3
= control target key start
LH: loop header
LB: loop body
LE: loop exit
PB: predicated region body
PF: predicated region fallthrough
CT: control target
= control target key end

     0   :  { %s2538_s2 = inlined_call_operand.vmem [shape: bf16[256,128], index: 2, kind: input, shape index: {}]   ;;  %s2539_s0 = inlined_call_operand.vmem [shape: f32[1,1,128,128], index: 0, kind: input, shape index: {}]   ;;  %s2540_s1 = inlined_call_operand.vmem [shape: f32[1,128,128], index: 1, kind: input, shape index: {}]   ;;  %s2541_s3 = inlined_call_operand.vmem [shape: f32[1,128], index: 3, kind: input, shape index: {}]   ;;  %s2542_s4 = inlined_call_operand.vmem [shape: bf16[128,128], index: 4, kind: input, shape index: {}]   ;;  %s2543_s5 = inlined_call_operand.vmem [shape: f32[1,128], index: 5, kind: input, shape index: {}]   ;;  %s2544_s6 = inlined_call_operand.vmem [shape: f32[1,128], index: 6, kind: input, shape index: {}]   ;;  %s2545_s7 = inlined_call_operand.vmem [shape: f32[1,128], index: 7, kind: input, shape index: {}]   ;;  %s2546_s8 = inlined_call_operand.vmem [shape: f32[1,128,128], index: 8, kind: output, shape index: {}]  }
   0x1   :  { %v1514_v0 = vld [vmem:[%s2538_s2 + $0x38] sm:$0xff]  ;;  %v1513_v2 = vld [vmem:[%s2538_s2 + $0x30] sm:$0xff]  ;;  %v1512_v4 = vld [vmem:[%s2538_s2 + $0x28] sm:$0xff] }
   0x2   :  { %v1726_v1 = vld [vmem:[%s2538_s2 + $0x78] sm:$0xff]  ;;  %369 = vmatpush.bf16.msra.mxu0 %v1514_v0  ;;  %1531 = vmatpush.bf16.msra.mxu3 %v1514_v0  ;;  %v1735_v3 = vld [vmem:[%s2538_s2 + $0x70] sm:$0xff]  ;;  %v29_v5 = vld [vmem:[%s2539_s0] sm:$0xff] }
   0x3   :  { %418 = vmatpush.bf16.msra.mxu1 %v1726_v1  ;;  %v30_v6 = vld [vmem:[%s2539_s0 + $0x8] sm:$0xff]  ;;  %v77_v7 = vpack.c.bf16 %v29_v5, %v29_v5  ;;  %v41_v9 = vld [vmem:[%s2539_s0 + $0x60] sm:$0xff]  ;;  %v31_v16 = vld [vmem:[%s2539_s0 + $0x10] sm:$0xff] }
   0x4   :  { %v78_v8 = vpack.c.bf16 %v30_v6, %v30_v6  ;;  %v42_v10 = vld [vmem:[%s2539_s0 + $0x68] sm:$0xff]  ;;  %v61_v11 = vld [vmem:[%s2540_s1] sm:$0xff]  ;;  %v89_v13 = vpack.c.bf16 %v41_v9, %v41_v9  ;;  %v32_v18 = vld [vmem:[%s2539_s0 + $0x18] sm:$0xff]  ;;  %v79_v22 = vpack.c.bf16 %v31_v16, %v31_v16 }
   0x5   :  { %v1759_v12 = vld [vmem:[%s2538_s2 + $0x68] sm:$0xff]  ;;  %v90_v14 = vpack.c.bf16 %v42_v10, %v42_v10  ;;  %93 = vst [vmem:[#allocation2] sm:$0xf] %v77_v7  ;;  %v109_v17 = vpack.c.bf16 %v61_v11, %v61_v11  ;;  %v43_v20 = vld [vmem:[%s2539_s0 + $0x70] sm:$0xff]  ;;  %v1511_v21 = vld [vmem:[%s2538_s2 + $0x20] sm:$0xff]  ;;  %v80_v25 = vpack.c.bf16 %v32_v18, %v32_v18 }
   0x6   :  { %370 = vmatpush.bf16.msra.mxu0 %v1513_v2  ;;  %1532 = vmatpush.bf16.msra.mxu3 %v1513_v2  ;;  %v62_v15 = vld [vmem:[%s2540_s1 + $0x8] sm:$0xff]  ;;  %94 = vst [vmem:[#allocation2 + $0x8] sm:$0xf] %v78_v8  ;;  %v44_v23 = vld [vmem:[%s2539_s0 + $0x78] sm:$0xff]  ;;  %v1783_v24 = vld [vmem:[%s2538_s2 + $0x60] sm:$0xff]  ;;  %v91_v27 = vpack.c.bf16 %v43_v20, %v43_v20 }
   0x7   :  { %419 = vmatpush.bf16.msra.mxu1 %v1735_v3  ;;  %v110_v19 = vpack.c.bf16 %v62_v15, %v62_v15  ;;  %105 = vst [vmem:[#allocation2 + $0x60] sm:$0xf] %v89_v13  ;;  %v63_v26 = vld [vmem:[%s2540_s1 + $0x10] sm:$0xff]  ;;  %v64_v28 = vld [vmem:[%s2540_s1 + $0x18] sm:$0xff]  ;;  %v92_v29 = vpack.c.bf16 %v44_v23, %v44_v23  ;;  %v33_v36 = vld [vmem:[%s2539_s0 + $0x20] sm:$0xff] }
   0x8   :  { %106 = vst [vmem:[#allocation2 + $0x68] sm:$0xf] %v90_v14  ;;  %v1510_v30 = vld [vmem:[%s2538_s2 + $0x18] sm:$0xff]  ;;  %v111_v31 = vpack.c.bf16 %v63_v26, %v63_v26  ;;  %v112_v33 = vpack.c.bf16 %v64_v28, %v64_v28  ;;  %v1509_v34 = vld [vmem:[%s2538_s2 + $0x10] sm:$0xff]  ;;  %v34_v37 = vld [vmem:[%s2539_s0 + $0x28] sm:$0xff]  ;;  %v81_v39 = vpack.c.bf16 %v33_v36, %v33_v36 }
   0x9   :  { %125 = vst [vmem:[#allocation2 + $0x4] sm:$0xf] %v109_v17  ;;  %v1798_v32 = vld [vmem:[%s2538_s2 + $0x58] sm:$0xff]  ;;  %v1807_v35 = vld [vmem:[%s2538_s2 + $0x50] sm:$0xff]  ;;  %v1508_v38 = vld [vmem:[%s2538_s2 + $0x8] sm:$0xff]  ;;  %v82_v40 = vpack.c.bf16 %v34_v37, %v34_v37 }
   0xa   :  { %371 = vmatpush.bf16.msra.mxu0 %v1512_v4  ;;  %1533 = vmatpush.bf16.msra.mxu3 %v1512_v4  ;;  %126 = vst [vmem:[#allocation2 + $0xc] sm:$0xf] %v110_v19  ;;  %v65_v41 = vld [vmem:[%s2540_s1 + $0x20] sm:$0xff]  ;;  %v66_v42 = vld [vmem:[%s2540_s1 + $0x28] sm:$0xff]  ;;  %v35_v61 = vld [vmem:[%s2539_s0 + $0x30] sm:$0xff] }
   0xb   :  { %420 = vmatpush.bf16.msra.mxu1 %v1759_v12  ;;  %95 = vst [vmem:[#allocation2 + $0x10] sm:$0xf] %v79_v22  ;;  %v1828_v43 = vld [vmem:[%s2538_s2 + $0x48] sm:$0xff]  ;;  %v113_v44 = vpack.c.bf16 %v65_v41, %v65_v41  ;;  %v114_v45 = vpack.c.bf16 %v66_v42, %v66_v42  ;;  %v73_v46 = vld [vmem:[%s2540_s1 + $0x60] sm:$0xff]  ;;  %v36_v62 = vld [vmem:[%s2539_s0 + $0x38] sm:$0xff]  ;;  %v83_v63 = vpack.c.bf16 %v35_v61, %v35_v61 }
   0xc   :  { %96 = vst [vmem:[#allocation2 + $0x18] sm:$0xf] %v80_v25  ;;  %v74_v47 = vld [vmem:[%s2540_s1 + $0x68] sm:$0xff]  ;;  %v1507_v48 = vld [vmem:[%s2538_s2] sm:$0xff]  ;;  %v121_v49 = vpack.c.bf16 %v73_v46, %v73_v46  ;;  %v84_v0 = vpack.c.bf16 %v36_v62, %v36_v62  ;;  %v68_v2 = vld [vmem:[%s2540_s1 + $0x38] sm:$0xff] }
   0xd   :  { %107 = vst [vmem:[#allocation2 + $0x70] sm:$0xf] %v91_v27  ;;  %v1842_v50 = vld [vmem:[%s2538_s2 + $0x40] sm:$0xff]  ;;  %v1492_v52 = vld [vmem:[#allocation2 + $0x4] sm:$0xf0]  ;;  %v122_v53 = vpack.c.bf16 %v74_v47, %v74_v47  ;;  %v75_v4 = vld [vmem:[%s2540_s1 + $0x70] sm:$0xff]  ;;  %v116_v6 = vpack.c.bf16 %v68_v2, %v68_v2 }
   0xe   :  { %372 = vmatpush.bf16.msra.mxu0 %v1511_v21  ;;  %1534 = vmatpush.bf16.msra.mxu3 %v1511_v21  ;;  %108 = vst [vmem:[#allocation2 + $0x78] sm:$0xf] %v92_v29  ;;  %v1317_v51 = vld [vmem:[#allocation2] sm:$0xf]  ;;  %v123_v7 = vpack.c.bf16 %v75_v4, %v75_v4  ;;  %v38_v19 = vld [vmem:[%s2539_s0 + $0x48] sm:$0xff]  ;;  %v40_v36 = vld [vmem:[%s2539_s0 + $0x58] sm:$0xff] }
   0xf   :  { %421 = vmatpush.bf16.msra.mxu1 %v1783_v24  ;;  %127 = vst [vmem:[#allocation2 + $0x14] sm:$0xf] %v111_v31  ;;  %v1365_v54 = vld [vmem:[#allocation2 + $0x60] sm:$0xf]  ;;  %v1504_v55 = vld [vmem:[#allocation2 + $0x64] sm:$0xf0]  ;;  %v1318_v58 = vor.u32 %v1492_v52, %v1317_v51  ;;  %v86_v21 = vpack.c.bf16 %v38_v19, %v38_v19 }
  0x10   :  { %128 = vst [vmem:[#allocation2 + $0x1c] sm:$0xf] %v112_v33  ;;  %v1491_v56 = vld [vmem:[#allocation2 + $0x4] sm:$0xf]  ;;  %v1366_v59 = vor.u32 %v1504_v55, %v1365_v54  ;;  %v70_v23 = vld [vmem:[%s2540_s1 + $0x48] sm:$0xff] }
  0x11   :  { %97 = vst [vmem:[#allocation2 + $0x20] sm:$0xf] %v81_v39  ;;  %v1319_v57 = vld [vmem:[#allocation2 + $0x8] sm:$0xf0]  ;;  %v69_v22 = vld [vmem:[%s2540_s1 + $0x40] sm:$0xff]  ;;  %v118_v25 = vpack.c.bf16 %v70_v23, %v70_v23  ;;  %v71_v39 = vld [vmem:[%s2540_s1 + $0x50] sm:$0xff] }
  0x12   :  { %373 = vmatpush.bf16.msra.mxu0 %v1510_v30  ;;  %1535 = vmatpush.bf16.msra.mxu3 %v1510_v30  ;;  %98 = vst [vmem:[#allocation2 + $0x28] sm:$0xf] %v82_v40  ;;  %v1322_v60 = vor.u32 %v1491_v56, %v1319_v57  ;;  %v1325_v9 = vld [vmem:[#allocation2 + $0x10] sm:$0xf]  ;;  %v72_v40 = vld [vmem:[%s2540_s1 + $0x58] sm:$0xff]  ;;  %v119_v41 = vpack.c.bf16 %v71_v39, %v71_v39  ;;  %v1528_v2 = vld [vmem:[%s2542_s4 + $0x28] sm:$0xff] }
  0x13   :  { %422 = vmatpush.bf16.msra.mxu1 %v1798_v32  ;;  %129 = vst [vmem:[#allocation2 + $0x24] sm:$0xf] %v113_v44  ;;  %v1494_v10 = vld [vmem:[#allocation2 + $0x14] sm:$0xf0]  ;;  %v120_v42 = vpack.c.bf16 %v72_v40, %v72_v40  ;;  %v1527_v4 = vld [vmem:[%s2542_s4 + $0x20] sm:$0xff] }
  0x14   :  { %130 = vst [vmem:[#allocation2 + $0x2c] sm:$0xf] %v114_v45  ;;  %v1373_v11 = vld [vmem:[#allocation2 + $0x70] sm:$0xf]  ;;  %v1326_v16 = vor.u32 %v1494_v10, %v1325_v9 }
  0x15   :  { %137 = vst [vmem:[#allocation2 + $0x64] sm:$0xf] %v121_v49  ;;  %v1506_v13 = vld [vmem:[#allocation2 + $0x74] sm:$0xf0]  ;;  %v1525_v9 = vld [vmem:[%s2542_s4 + $0x10] sm:$0xff] }
  0x16   :  { %374 = vmatpush.bf16.msra.mxu0 %v1509_v34  ;;  %1536 = vmatpush.bf16.msra.mxu3 %v1509_v34  ;;  %138 = vst [vmem:[#allocation2 + $0x6c] sm:$0xf] %v122_v53  ;;  %v1493_v14 = vld [vmem:[#allocation2 + $0x14] sm:$0xf]  ;;  %v1374_v17 = vor.u32 %v1506_v13, %v1373_v11 }
  0x17   :  { %423 = vmatpush.bf16.msra.mxu1 %v1807_v35  ;;  %99 = vst [vmem:[#allocation2 + $0x30] sm:$0xf] %v83_v63  ;;  %v1327_v15 = vld [vmem:[#allocation2 + $0x18] sm:$0xf0] }
  0x18   :  { %100 = vst [vmem:[#allocation2 + $0x38] sm:$0xf] %v84_v0  ;;  %v1330_v18 = vor.u32 %v1493_v14, %v1327_v15  ;;  %v1333_v26 = vld [vmem:[#allocation2 + $0x20] sm:$0xf]  ;;  %v1530_v0 = vld [vmem:[%s2542_s4 + $0x38] sm:$0xff]  ;;  %v1524_v14 = vld [vmem:[%s2542_s4 + $0x8] sm:$0xff] }
  0x19   :  { %132 = vst [vmem:[#allocation2 + $0x3c] sm:$0xf] %v116_v6  ;;  %v1496_v27 = vld [vmem:[#allocation2 + $0x24] sm:$0xf0]  ;;  %863 = vmatpush.bf16.msra.mxu2 %v1530_v0  ;;  %v1526_v6 = vld [vmem:[%s2542_s4 + $0x18] sm:$0xff] }
  0x1a   :  { %375 = vmatpush.bf16.msra.mxu0 %v1508_v38  ;;  %1537 = vmatpush.bf16.msra.mxu3 %v1508_v38  ;;  %139 = vst [vmem:[#allocation2 + $0x74] sm:$0xf] %v123_v7  ;;  %v1495_v30 = vld [vmem:[#allocation2 + $0x24] sm:$0xf]  ;;  %v88_v38 = vpack.c.bf16 %v40_v36, %v40_v36 }
  0x1b   :  { %424 = vmatpush.bf16.msra.mxu1 %v1828_v43  ;;  %102 = vst [vmem:[#allocation2 + $0x48] sm:$0xf] %v86_v21  ;;  %v1335_v31 = vld [vmem:[#allocation2 + $0x28] sm:$0xf0] }
  0x1c   :  { %134 = vst [vmem:[#allocation2 + $0x4c] sm:$0xf] %v118_v25  ;;  %v1503_v28 = vld [vmem:[#allocation2 + $0x64] sm:$0xf]  ;;  %v1338_v34 = vor.u32 %v1495_v30, %v1335_v31 }
  0x1d   :  { %v1367_v29 = vld [vmem:[#allocation2 + $0x68] sm:$0xf0]  ;;  %104 = vst [vmem:[#allocation2 + $0x58] sm:$0xf] %v88_v38 }
  0x1e   :  { %376 = vmatpush.bf16.msra.mxu0 %v1507_v48  ;;  %1538 = vmatpush.bf16.msra.mxu3 %v1507_v48  ;;  %v1370_v33 = vor.u32 %v1503_v28, %v1367_v29  ;;  %135 = vst [vmem:[#allocation2 + $0x54] sm:$0xf] %v119_v41 }
  0x1f   :  { %425 = vmatpush.bf16.msra.mxu1 %v1842_v50  ;;  %136 = vst [vmem:[#allocation2 + $0x5c] sm:$0xf] %v120_v42  ;;  %v1498_v44 = vld [vmem:[#allocation2 + $0x34] sm:$0xf0] }
  0x20   :  { %v1343_v48 = vld [vmem:[#allocation2 + $0x38] sm:$0xf0] }
  0x21   :  { %377 = vmatmul.bf16.vlgmr.msra.gmra.mxu0 %v1318_v58  ;;  %407 = vmatmul.bf16.vlgmr.msra.gmra.mxu3 %v1366_v59  ;;  %v1505_v45 = vld [vmem:[#allocation2 + $0x74] sm:$0xf] }
  0x22   :  { %1539 = vmatpush.bf16.msrb.mxu3 %v1726_v1  ;;  %426 = vmatmul.bf16.vlgmr.msra.gmra.mxu1 %v1322_v60  ;;  %v67_v1 = vld [vmem:[%s2540_s1 + $0x30] sm:$0xff]  ;;  %v1500_v53 = vld [vmem:[#allocation2 + $0x44] sm:$0xf0] }
  0x23   :  { %v115_v5 = vpack.c.bf16 %v67_v1, %v67_v1  ;;  %v1351_v55 = vld [vmem:[#allocation2 + $0x48] sm:$0xf0]  ;;  %v1529_v1 = vld [vmem:[%s2542_s4 + $0x30] sm:$0xff] }
  0x24   :  { %v1502_v59 = vld [vmem:[#allocation2 + $0x54] sm:$0xf0]  ;;  %864 = vmatpush.bf16.msra.mxu2 %v1529_v1 }
  0x25   :  { %131 = vst [vmem:[#allocation2 + $0x34] sm:$0xf] %v115_v5  ;;  %v1501_v60 = vld [vmem:[#allocation2 + $0x54] sm:$0xf]  ;;  %v1911_v5 = vld [vmem:[%s2541_s3] ss:$0 sm:$0xff] }
  0x26   :  { %1540 = vmatpush.bf16.msrb.mxu3 %v1735_v3  ;;  %v76_v3 = vld [vmem:[%s2540_s1 + $0x78] sm:$0xff] }
  0x27   :  { %v124_v8 = vpack.c.bf16 %v76_v3, %v76_v3  ;;  %v1359_v61 = vld [vmem:[#allocation2 + $0x58] sm:$0xf0] }
  0x28   :  { %v1362_v63 = vor.u32 %v1501_v60, %v1359_v61  ;;  %865 = vmatpush.bf16.msra.mxu2 %v1528_v2 }
  0x29   :  { %140 = vst [vmem:[#allocation2 + $0x7c] sm:$0xf] %v124_v8 }
  0x2a   :  { %1541 = vmatpush.bf16.msrb.mxu3 %v1759_v12  ;;  %v37_v12 = vld [vmem:[%s2539_s0 + $0x40] sm:$0xff] }
  0x2b   :  { %v85_v20 = vpack.c.bf16 %v37_v12, %v37_v12 }
  0x2c   :  { %v1497_v47 = vld [vmem:[#allocation2 + $0x34] sm:$0xf]  ;;  %866 = vmatpush.bf16.msra.mxu2 %v1527_v4 }
  0x2d   :  { %101 = vst [vmem:[#allocation2 + $0x40] sm:$0xf] %v85_v20  ;;  %v1346_v51 = vor.u32 %v1497_v47, %v1343_v48 }
  0x2e   :  { %1542 = vmatpush.bf16.msrb.mxu3 %v1783_v24  ;;  %v117_v24 = vpack.c.bf16 %v69_v22, %v69_v22 }
  0x30   :  { %133 = vst [vmem:[#allocation2 + $0x44] sm:$0xf] %v117_v24  ;;  %v1375_v46 = vld [vmem:[#allocation2 + $0x78] sm:$0xf0]  ;;  %867 = vmatpush.bf16.msra.mxu2 %v1526_v6 }
  0x31   :  { %382 = vmatmul.bf16.gmra.mxu0 %v1326_v16  ;;  %412 = vmatmul.bf16.gmra.mxu3 %v1374_v17 }
  0x32   :  { %1543 = vmatpush.bf16.msrb.mxu3 %v1798_v32  ;;  %431 = vmatmul.bf16.gmra.mxu1 %v1330_v18  ;;  %v1334_v32 = vor.u32 %v1496_v27, %v1333_v26  ;;  %v1523_v18 = vld [vmem:[%s2542_s4] sm:$0xff] }
  0x34   :  { %v1349_v52 = vld [vmem:[#allocation2 + $0x40] sm:$0xf]  ;;  %868 = vmatpush.bf16.msra.mxu2 %v1525_v9 }
  0x35   :  { %v1350_v56 = vor.u32 %v1500_v53, %v1349_v52 }
  0x36   :  { %1544 = vmatpush.bf16.msrb.mxu3 %v1807_v35  ;;  %v39_v35 = vld [vmem:[%s2539_s0 + $0x50] sm:$0xff] }
  0x37   :  { %v87_v37 = vpack.c.bf16 %v39_v35, %v39_v35  ;;  %v1499_v54 = vld [vmem:[#allocation2 + $0x44] sm:$0xf] }
  0x38   :  { %v1354_v57 = vor.u32 %v1499_v54, %v1351_v55  ;;  %869 = vmatpush.bf16.msra.mxu2 %v1524_v14 }
  0x39   :  { %103 = vst [vmem:[#allocation2 + $0x50] sm:$0xf] %v87_v37 }
  0x3a   :  { %1545 = vmatpush.bf16.msrb.mxu3 %v1828_v43  ;;  %v1341_v43 = vld [vmem:[#allocation2 + $0x30] sm:$0xf] }
  0x3b   :  { %v1342_v49 = vor.u32 %v1498_v44, %v1341_v43 }
  0x3c   :  { %870 = vmatpush.bf16.msra.mxu2 %v1523_v18 }
  0x3e   :  { %1546 = vmatpush.bf16.msrb.mxu3 %v1842_v50  ;;  %v1378_v50 = vor.u32 %v1505_v45, %v1375_v46 }
  0x40   :  { %v1357_v58 = vld [vmem:[#allocation2 + $0x50] sm:$0xf] }
  0x41   :  { %387 = vmatmul.bf16.gmra.mxu0 %v1334_v32  ;;  %456 = vmatmul.bf16.vlgmr.msrb.gmra.mxu3 %v1370_v33  ;;  %v1358_v62 = vor.u32 %v1502_v59, %v1357_v58 }
  0x42   :  { %436 = vmatmul.bf16.gmra.mxu1 %v1338_v34  ;;  %1547 = vmatpush.bf16.msra.mxu3 %v1530_v0 }
  0x46   :  { %1548 = vmatpush.bf16.msra.mxu3 %v1529_v1 }
  0x4a   :  { %1549 = vmatpush.bf16.msra.mxu3 %v1528_v2 }
  0x4e   :  { %1550 = vmatpush.bf16.msra.mxu3 %v1527_v4 }
  0x51   :  { %392 = vmatmul.bf16.gmra.mxu0 %v1342_v49  ;;  %461 = vmatmul.bf16.gmra.mxu3 %v1378_v50 }
  0x52   :  { %441 = vmatmul.bf16.gmra.mxu1 %v1346_v51  ;;  %1551 = vmatpush.bf16.msra.mxu3 %v1526_v6 }
  0x56   :  { %1552 = vmatpush.bf16.msra.mxu3 %v1525_v9 }
  0x5a   :  { %1553 = vmatpush.bf16.msra.mxu3 %v1524_v14 }
  0x5e   :  { %1554 = vmatpush.bf16.msra.mxu3 %v1523_v18 }
  0x61   :  { %397 = vmatmul.bf16.gmra.mxu0 %v1350_v56 }
  0x62   :  { %446 = vmatmul.bf16.gmra.mxu1 %v1354_v57 }
  0x71   :  { %402 = vmatmul.bf16.gmra.mxu0 %v1358_v62 }
  0x72   :  { %451 = vmatmul.bf16.gmra.mxu1 %v1362_v63 }
  0x9e   :  { %v378_v3 = vpop.f32.mrf.mxu0 }
  0x9f   :  { %v379_v7 = vadd.f32 %v1911_v5, %v378_v3  ;;  %v427_v8 = vpop.f32.mrf.mxu1 }
  0xa1   :  { %v1920_v10 = vadd.f32 %v427_v8, %v379_v7 }
  0xa3   :  { %v1443_v11 = vmul.f32 -1.442695, %v1920_v10 }
  0xa4   :  { %v1923_v13 = vpop.f32.mrf.mxu3 }
  0xa5   :  { %1560 = vpow2.f32 %v1443_v11  ;;  %v409_v60 = vadd.f32 %v1911_v5, %v1923_v13 }
  0xa6   :  { %v380_v15 = vpop.f32.mrf.mxu0 }
  0xa7   :  { %v381_v16 = vadd.f32 %v1911_v5, %v380_v15  ;;  %v429_v17 = vpop.f32.mrf.mxu1 }
  0xa9   :  { %v1932_v12 = vadd.f32 %v429_v17, %v381_v16 }
  0xab   :  { %v1561_v19 = vpop.eup %1560  ;;  %v1444_v20 = vmul.f32 -1.442695, %v1932_v12 }
  0xac   :  { %v515_v21 = vadd.f32 1.0, %v1561_v19  ;;  %v1935_v22 = vpop.f32.mrf.mxu3 }
  0xad   :  { %1562 = vpow2.f32 %v1444_v20 }
  0xae   :  { %1564 = vrcp.f32 %v515_v21  ;;  %v383_v23 = vpop.f32.mrf.mxu0  ;;  %v542_v46 = vand.u32 2147483648, %v515_v21  ;;  %vm536_vm1 = vweird.f32 %v515_v21  ;;  %v540_v48 = vand.u32 2147483647, %v515_v21 }
  0xaf   :  { %v384_v24 = vadd.f32 %v1911_v5, %v383_v23  ;;  %v432_v25 = vpop.f32.mrf.mxu1 }
  0xb0   :  { %v543_v57 = vor.u32 1.1754944e-38, %v542_v46  ;;  %vm541_vm4 = vcmp.eq.f32.partialorder %v540_v48, 8.507059e+37 }
  0xb1   :  { %v1938_v26 = vadd.f32 %v432_v25, %v384_v24 }
  0xb3   :  { %v1563_v27 = vpop.eup %1562  ;;  %v1445_v28 = vmul.f32 -1.442695, %v1938_v26 }
  0xb4   :  { %v1565_v29 = vpop.eup %1564  ;;  %v516_v30 = vadd.f32 1.0, %v1563_v27  ;;  %v1941_v31 = vpop.f32.mrf.mxu3 }
  0xb5   :  { %v532_v32 = vmul.f32 %v1565_v29, %v515_v21  ;;  %1566 = vpow2.f32 %v1445_v28  ;;  %vm537_vm0 = vweird.f32 %v1565_v29  ;;  %v411_v21 = vadd.f32 %v1911_v5, %v1935_v22 }
  0xb6   :  { %1568 = vrcp.f32 %v516_v30  ;;  %v385_v33 = vpop.f32.mrf.mxu0  ;;  %vm1952_vm2 = vmor %vm536_vm1, %vm537_vm0  ;;  %v557_v52 = vand.u32 2147483648, %v516_v30  ;;  %v555_v56 = vand.u32 2147483647, %v516_v30  ;;  %vm551_vm5 = vweird.f32 %v516_v30 }
  0xb7   :  { %v533_v34 = vsub.f32 1.0, %v532_v32  ;;  %v386_v35 = vadd.f32 %v1911_v5, %v385_v33  ;;  %v434_v36 = vpop.f32.mrf.mxu1  ;;  %v414_v48 = vadd.f32 %v1911_v5, %v1941_v31 }
  0xb8   :  { %v558_v0 = vor.u32 1.1754944e-38, %v557_v52  ;;  %vm556_vm7 = vcmp.eq.f32.partialorder %v555_v56, 8.507059e+37 }
  0xb9   :  { %v534_v37 = vmul.f32 %v1565_v29, %v533_v34  ;;  %v1944_v38 = vadd.f32 %v434_v36, %v386_v35 }
  0xbb   :  { %v1567_v39 = vpop.eup %1566  ;;  %v1446_v40 = vmul.f32 -1.442695, %v1944_v38  ;;  %v535_v44 = vadd.f32 %v1565_v29, %v534_v37 }
  0xbc   :  { %v1569_v41 = vpop.eup %1568  ;;  %v1947_v42 = vadd.f32 1.0, %v1567_v39  ;;  %v1949_v43 = vpop.f32.mrf.mxu3 }
  0xbd   :  { %v547_v45 = vmul.f32 %v1569_v41, %v516_v30  ;;  %1570 = vpow2.f32 %v1446_v40  ;;  %v539_v54 = vsel %vm1952_vm2, %v1565_v29, %v535_v44  ;;  %vm552_vm3 = vweird.f32 %v1569_v41 }
  0xbe   :  { %1572 = vrcp.f32 %v1947_v42  ;;  %v388_v47 = vpop.f32.mrf.mxu0  ;;  %v544_v63 = vsel %vm541_vm4, %v543_v57, %v539_v54  ;;  %vm553_vm6 = vmor %vm551_vm5, %vm552_vm3  ;;  %vm566_vm9 = vweird.f32 %v1947_v42  ;;  %v570_v29 = vand.u32 2147483647, %v1947_v42 }
  0xbf   :  { %v548_v49 = vsub.f32 1.0, %v547_v45  ;;  %v437_v50 = vpop.f32.mrf.mxu1  ;;  %v389_v53 = vadd.f32 %v1911_v5, %v388_v47  ;;  %v771_v11 = vmul.f32 %v544_v63, %v1920_v10  ;;  %v572_v22 = vand.u32 2147483648, %v1947_v42 }
  0xc0   :  { %vm571_vm12 = vcmp.eq.f32.partialorder %v570_v29, 8.507059e+37 }
  0xc1   :  { %v549_v55 = vmul.f32 %v1569_v41, %v548_v49  ;;  %v1959_v58 = vadd.f32 %v437_v50, %v389_v53  ;;  %v573_v47 = vor.u32 1.1754944e-38, %v572_v22 }
  0xc3   :  { %v1571_v59 = vpop.eup %1570  ;;  %v550_v61 = vadd.f32 %v1569_v41, %v549_v55  ;;  %v1447_v2 = vmul.f32 -1.442695, %v1959_v58 }
  0xc4   :  { %v1963_v62 = vpop.eup %1572  ;;  %v1965_v1 = vadd.f32 1.0, %v1571_v59  ;;  %v457_v4 = vpop.f32.mrf.mxu3 }
  0xc5   :  { %v554_v6 = vsel %vm553_vm6, %v1569_v41, %v550_v61  ;;  %v562_v3 = vmul.f32 %v1963_v62, %v1947_v42  ;;  %v1970_v7 = vadd.f32 %v457_v4, %v409_v60  ;;  %vm567_vm8 = vweird.f32 %v1963_v62 }
  0xc6   :  { %v559_v8 = vsel %vm556_vm7, %v558_v0, %v554_v6  ;;  %1574 = vrcp.f32 %v1965_v1  ;;  %v390_v9 = vpop.f32.mrf.mxu0  ;;  %vm1993_vm10 = vmor %vm566_vm9, %vm567_vm8  ;;  %v585_v35 = vand.u32 2147483647, %v1965_v1  ;;  %v587_v42 = vand.u32 2147483648, %v1965_v1 }
  0xc7   :  { %v772_v13 = vmul.f32 %v559_v8, %v1932_v12  ;;  %v563_v14 = vsub.f32 1.0, %v562_v3  ;;  %1576 = vpow2.f32 %v1447_v2  ;;  %v439_v15 = vpop.f32.mrf.mxu1  ;;  %v1455_v16 = vmul.f32 -1.442695, %v1970_v7 }
  0xc8   :  { %v391_v17 = vadd.f32 %v1911_v5, %v390_v9  ;;  %vm581_vm13 = vweird.f32 %v1965_v1  ;;  %v588_v52 = vor.u32 1.1754944e-38, %v587_v42  ;;  %vm586_vm15 = vcmp.eq.f32.partialorder %v585_v35, 8.507059e+37 }
  0xc9   :  { %v564_v18 = vmul.f32 %v1963_v62, %v563_v14  ;;  %v787_v19 = vpack.c.bf16 %v772_v13, %v771_v11  ;;  %1578 = vpow2.f32 %v1455_v16  ;;  %v416_v13 = vadd.f32 %v1911_v5, %v1949_v43 }
  0xca   :  { %v1978_v20 = vadd.f32 %v439_v15, %v391_v17 }
  0xcb   :  { %871 = vmatmul.bf16.vlgmr.msra.gmra.mxu2 %v787_v19  ;;  %v565_v12 = vadd.f32 %v1963_v62, %v564_v18 }
  0xcc   :  { %v1575_v10 = vpop.eup %1574  ;;  %v1448_v23 = vmul.f32 -1.442695, %v1978_v20  ;;  %v459_v24 = vpop.f32.mrf.mxu3 }
  0xcd   :  { %v1577_v25 = vpop.eup %1576  ;;  %v577_v27 = vmul.f32 %v1575_v10, %v1965_v1  ;;  %v1987_v28 = vadd.f32 %v459_v24, %v411_v21  ;;  %v569_v41 = vsel %vm1993_vm10, %v1963_v62, %v565_v12  ;;  %vm582_vm11 = vweird.f32 %v1575_v10 }
  0xce   :  { %v1991_v30 = vadd.f32 1.0, %v1577_v25  ;;  %1580 = vpow2.f32 %v1448_v23  ;;  %v393_v32 = vpop.f32.mrf.mxu0  ;;  %v574_v51 = vsel %vm571_vm12, %v573_v47, %v569_v41  ;;  %vm583_vm14 = vmor %vm581_vm13, %vm582_vm11 }
  0xcf   :  { %v578_v34 = vsub.f32 1.0, %v577_v27  ;;  %v1456_v36 = vmul.f32 -1.442695, %v1987_v28  ;;  %v394_v37 = vadd.f32 %v1911_v5, %v393_v32  ;;  %v442_v39 = vpop.f32.mrf.mxu1  ;;  %v1579_v40 = vpop.eup %1578  ;;  %v773_v62 = vmul.f32 %v574_v51, %v1938_v26 }
  0xd0   :  { %1582 = vrcp.f32 %v1991_v30  ;;  %v2005_v45 = vadd.f32 1.0, %v1579_v40  ;;  %v600_v2 = vand.u32 2147483647, %v1991_v30  ;;  %v602_v4 = vand.u32 2147483648, %v1991_v30 }
  0xd1   :  { %v579_v44 = vmul.f32 %v1575_v10, %v578_v34  ;;  %1584 = vpow2.f32 %v1456_v36  ;;  %v2007_v46 = vadd.f32 %v442_v39, %v394_v37  ;;  %vm596_vm0 = vweird.f32 %v1991_v30 }
  0xd2   :  { %1586 = vrcp.f32 %v2005_v45  ;;  %vm2041_vm1 = vcmp.eq.f32.partialorder %v600_v2, 8.507059e+37  ;;  %v603_v21 = vor.u32 1.1754944e-38, %v602_v4  ;;  %vm716_vm3 = vweird.f32 %v2005_v45 }
  0xd3   :  { %v580_v49 = vadd.f32 %v1575_v10, %v579_v44  ;;  %v1449_v53 = vmul.f32 -1.442695, %v2007_v46  ;;  %v720_v33 = vand.u32 2147483647, %v2005_v45  ;;  %v722_v34 = vand.u32 2147483648, %v2005_v45 }
  0xd4   :  { %v1581_v50 = vpop.eup %1580  ;;  %v462_v54 = vpop.f32.mrf.mxu3 }
  0xd5   :  { %v584_v55 = vsel %vm583_vm14, %v1575_v10, %v580_v49  ;;  %v2015_v56 = vadd.f32 1.0, %v1581_v50  ;;  %v2017_v57 = vadd.f32 %v462_v54, %v414_v48  ;;  %1588 = vpow2.f32 %v1449_v53 }
  0xd6   :  { %v2019_v31 = vpop.eup %1582  ;;  %v589_v59 = vsel %vm586_vm15, %v588_v52, %v584_v55  ;;  %v395_v60 = vpop.f32.mrf.mxu0  ;;  %vm721_vm12 = vcmp.eq.f32.partialorder %v720_v33, 8.507059e+37 }
  0xd7   :  { %v1585_v61 = vpop.eup %1584  ;;  %v774_v63 = vmul.f32 %v589_v59, %v1944_v38  ;;  %v592_v0 = vmul.f32 %v2019_v31, %v1991_v30  ;;  %1590 = vrcp.f32 %v2015_v56  ;;  %v444_v1 = vpop.f32.mrf.mxu1  ;;  %v1457_v9 = vmul.f32 -1.442695, %v2017_v57 }
  0xd8   :  { %v2028_v6 = vadd.f32 1.0, %v1585_v61  ;;  %v2030_v3 = vpop.eup %1586  ;;  %v396_v26 = vadd.f32 %v1911_v5, %v395_v60  ;;  %vm597_vm2 = vweird.f32 %v2019_v31  ;;  %v615_v29 = vand.u32 2147483647, %v2015_v56 }
  0xd9   :  { %v593_v8 = vsub.f32 1.0, %v592_v0  ;;  %v788_v38 = vpack.c.bf16 %v774_v63, %v773_v62  ;;  %v712_v11 = vmul.f32 %v2030_v3, %v2005_v45  ;;  %v617_v22 = vand.u32 2147483648, %v2015_v56  ;;  %vm2064_vm5 = vmor %vm596_vm0, %vm597_vm2 }
  0xda   :  { %1592 = vrcp.f32 %v2028_v6  ;;  %v2047_v43 = vadd.f32 %v444_v1, %v396_v26  ;;  %vm611_vm4 = vweird.f32 %v2015_v56  ;;  %vm717_vm6 = vweird.f32 %v2030_v3 }
  0xdb   :  { %v594_v14 = vmul.f32 %v2019_v31, %v593_v8  ;;  %876 = vmatmul.bf16.gmra.mxu2 %v788_v38  ;;  %v1589_v15 = vpop.eup %1588  ;;  %v713_v17 = vsub.f32 1.0, %v712_v11  ;;  %1594 = vpow2.f32 %v1457_v9  ;;  %vm2076_vm8 = vcmp.eq.f32.partialorder %v615_v29, 8.507059e+37  ;;  %vm2084_vm9 = vmor %vm716_vm3, %vm717_vm6 }
  0xdc   :  { %v464_v18 = vpop.f32.mrf.mxu3  ;;  %v2045_v10 = vadd.f32 1.0, %v1589_v15  ;;  %v1450_v40 = vmul.f32 -1.442695, %v2047_v43  ;;  %v618_v49 = vor.u32 1.1754944e-38, %v617_v22  ;;  %v737_v54 = vand.u32 2147483648, %v2028_v6 }
  0xdd   :  { %v1591_v19 = vpop.eup %1590  ;;  %v2049_v12 = vadd.f32 %v464_v18, %v416_v13  ;;  %v595_v23 = vadd.f32 %v2019_v31, %v594_v14  ;;  %v714_v24 = vmul.f32 %v2030_v3, %v713_v17  ;;  %v735_v45 = vand.u32 2147483647, %v2028_v6 }
  0xde   :  { %v607_v25 = vmul.f32 %v1591_v19, %v2015_v56  ;;  %v398_v27 = vpop.f32.mrf.mxu0  ;;  %1596 = vrcp.f32 %v2045_v10  ;;  %vm612_vm7 = vweird.f32 %v1591_v19  ;;  %v723_v0 = vor.u32 1.1754944e-38, %v722_v34 }
  0xdf   :  { %v447_v32 = vpop.f32.mrf.mxu1  ;;  %v715_v39 = vadd.f32 %v2030_v3, %v714_v24  ;;  %v1458_v41 = vmul.f32 -1.442695, %v2049_v12  ;;  %v599_v44 = vsel %vm2064_vm5, %v2019_v31, %v595_v23  ;;  %1598 = vpow2.f32 %v1450_v40  ;;  %vm613_vm10 = vmor %vm611_vm4, %vm612_vm7 }
  0xe0   :  { %v608_v35 = vsub.f32 1.0, %v607_v25  ;;  %v1593_v36 = vpop.eup %1592  ;;  %v604_v31 = vsel %vm2041_vm1, %v603_v21, %v599_v44  ;;  %v399_v2 = vadd.f32 %v1911_v5, %v398_v27  ;;  %vm731_vm13 = vweird.f32 %v2028_v6 }
  0xe1   :  { %v1595_v42 = vpop.eup %1594  ;;  %v727_v30 = vmul.f32 %v1593_v36, %v2028_v6  ;;  %1600 = vpow2.f32 %v1458_v41  ;;  %v719_v59 = vsel %vm2084_vm9, %v2030_v3, %v715_v39  ;;  %vm732_vm11 = vweird.f32 %v1593_v36 }
  0xe2   :  { %v609_v47 = vmul.f32 %v1591_v19, %v608_v35  ;;  %v2080_v50 = vadd.f32 1.0, %v1595_v42  ;;  %v738_v8 = vor.u32 1.1754944e-38, %v737_v54  ;;  %v775_v26 = vmul.f32 %v604_v31, %v1959_v58  ;;  %vm733_vm14 = vmor %vm731_vm13, %vm732_vm11 }
  0xe3   :  { %v728_v53 = vsub.f32 1.0, %v727_v30  ;;  %v724_v38 = vsel %vm721_vm12, %v723_v0, %v719_v59  ;;  %v2109_v11 = vadd.f32 %v447_v32, %v399_v2  ;;  %vm736_vm15 = vcmp.eq.f32.partialorder %v735_v45, 8.507059e+37 }
  0xe4   :  { %v610_v52 = vadd.f32 %v1591_v19, %v609_v47  ;;  %v2089_v55 = vpop.eup %1596  ;;  %1602 = vrcp.f32 %v2080_v50  ;;  %v783_v58 = vmul.f32 %v724_v38, %v1970_v7  ;;  %v630_v24 = vand.u32 2147483647, %v2045_v10 }
  0xe5   :  { %v729_v61 = vmul.f32 %v1593_v36, %v728_v53  ;;  %v622_v62 = vmul.f32 %v2089_v55, %v2045_v10  ;;  %v1599_v9 = vpop.eup %1598  ;;  %v1451_v25 = vmul.f32 -1.442695, %v2109_v11  ;;  %v750_v34 = vand.u32 2147483647, %v2080_v50 }
  0xe6   :  { %v614_v60 = vsel %vm613_vm10, %v1591_v19, %v610_v52  ;;  %v400_v63 = vpop.f32.mrf.mxu0  ;;  %v2112_v17 = vadd.f32 1.0, %v1599_v9  ;;  %v752_v35 = vand.u32 2147483648, %v2080_v50  ;;  %vm626_vm0 = vweird.f32 %v2045_v10 }
  0xe7   :  { %v619_v1 = vsel %vm2076_vm8, %v618_v49, %v614_v60  ;;  %v449_v56 = vpop.f32.mrf.mxu1  ;;  %v730_v3 = vadd.f32 %v1593_v36, %v729_v61  ;;  %v401_v13 = vadd.f32 %v1911_v5, %v400_v63  ;;  %v1601_v14 = vpop.eup %1600  ;;  %v623_v16 = vsub.f32 1.0, %v622_v62 }
  0xe8   :  { %v776_v4 = vmul.f32 %v619_v1, %v1978_v20  ;;  %v2116_v18 = vadd.f32 1.0, %v1601_v14  ;;  %1604 = vrcp.f32 %v2112_v17  ;;  %vm627_vm1 = vweird.f32 %v2089_v55 }
  0xe9   :  { %v734_v15 = vsel %vm733_vm14, %v1593_v36, %v730_v3  ;;  %v2125_v27 = vadd.f32 %v449_v56, %v401_v13  ;;  %v624_v22 = vmul.f32 %v2089_v55, %v623_v16  ;;  %vm2137_vm2 = vcmp.eq.f32.partialorder %v630_v24, 8.507059e+37  ;;  %vm2153_vm6 = vmor %vm626_vm0, %vm627_vm1 }
  0xea   :  { %v2114_v20 = vpop.eup %1602  ;;  %v739_v6 = vsel %vm736_vm15, %v738_v8, %v734_v15  ;;  %v789_v19 = vpack.c.bf16 %v776_v4, %v775_v26  ;;  %1606 = vrcp.f32 %v2116_v18  ;;  %vm746_vm3 = vweird.f32 %v2080_v50 }
  0xeb   :  { %v784_v21 = vmul.f32 %v739_v6, %v1987_v28  ;;  %v742_v23 = vmul.f32 %v2114_v20, %v2080_v50  ;;  %v632_v28 = vand.u32 2147483648, %v2045_v10  ;;  %1608 = vpow2.f32 %v1451_v25 }
  0xec   :  { %881 = vmatmul.bf16.gmra.mxu2 %v789_v19  ;;  %v1452_v36 = vmul.f32 -1.442695, %v2125_v27  ;;  %v625_v39 = vadd.f32 %v2089_v55, %v624_v22  ;;  %vm747_vm4 = vweird.f32 %v2114_v20  ;;  %vm2146_vm5 = vcmp.eq.f32.partialorder %v750_v34, 8.507059e+37 }
  0xed   :  { %v793_v29 = vpack.c.bf16 %v784_v21, %v783_v58  ;;  %v743_v32 = vsub.f32 1.0, %v742_v23  ;;  %v633_v44 = vor.u32 1.1754944e-38, %v632_v28  ;;  %v753_v49 = vor.u32 1.1754944e-38, %v752_v35  ;;  %vm2177_vm9 = vmor %vm746_vm3, %vm747_vm4 }
  0xee   :  { %v403_v7 = vpop.f32.mrf.mxu0  ;;  %v1605_v42 = vpop.eup %1604  ;;  %1610 = vpow2.f32 %v1452_v36  ;;  %vm641_vm7 = vweird.f32 %v2112_v17  ;;  %v645_v53 = vand.u32 2147483647, %v2112_v17  ;;  %v629_v59 = vsel %vm2153_vm6, %v2089_v55, %v625_v39 }
  0xef   :  { %v452_v33 = vpop.f32.mrf.mxu1  ;;  %901 = vmatmul.bf16.vlgmr.msra.gmra.mxu3 %v793_v29  ;;  %v404_v37 = vadd.f32 %v1911_v5, %v403_v7  ;;  %v744_v41 = vmul.f32 %v2114_v20, %v743_v32  ;;  %v637_v51 = vmul.f32 %v1605_v42, %v2112_v17  ;;  %v647_v10 = vand.u32 2147483648, %v2112_v17 }
  0xf0   :  { %v1607_v30 = vpop.eup %1606  ;;  %v765_v0 = vand.u32 2147483647, %v2116_v18  ;;  %vm642_vm8 = vweird.f32 %v1605_v42  ;;  %v767_v56 = vand.u32 2147483648, %v2116_v18  ;;  %v634_v8 = vsel %vm2137_vm2, %v633_v44, %v629_v59 }
  0xf1   :  { %v2143_v47 = vadd.f32 %v452_v33, %v404_v37  ;;  %v757_v54 = vmul.f32 %v1607_v30, %v2116_v18  ;;  %v745_v45 = vadd.f32 %v2114_v20, %v744_v41  ;;  %v638_v60 = vsub.f32 1.0, %v637_v51  ;;  %v1609_v62 = vpop.eup %1608  ;;  %vm643_vm11 = vmor %vm641_vm7, %vm642_vm8 }
  0xf2   :  { %v2169_v4 = vadd.f32 1.0, %v1609_v62  ;;  %vm762_vm10 = vweird.f32 %v1607_v30  ;;  %v648_v14 = vor.u32 1.1754944e-38, %v647_v10  ;;  %vm761_vm12 = vweird.f32 %v2116_v18 }
  0xf3   :  { %v1453_v31 = vmul.f32 -1.442695, %v2143_v47  ;;  %v758_v63 = vsub.f32 1.0, %v757_v54  ;;  %v639_v2 = vmul.f32 %v1605_v42, %v638_v60  ;;  %v749_v38 = vsel %vm2177_vm9, %v2114_v20, %v745_v45  ;;  %vm763_vm14 = vmor %vm761_vm12, %vm762_vm10 }
  0xf4   :  { %v1611_v3 = vpop.eup %1610  ;;  %vm646_vm13 = vcmp.eq.f32.partialorder %v645_v53, 8.507059e+37  ;;  %vm766_vm15 = vcmp.eq.f32.partialorder %v765_v0, 8.507059e+37  ;;  %v768_v19 = vor.u32 1.1754944e-38, %v767_v56  ;;  %v754_v20 = vsel %vm2146_vm5, %v753_v49, %v749_v38 }
  0xf5   :  { %1612 = vpow2.f32 %v1453_v31  ;;  %v640_v13 = vadd.f32 %v1605_v42, %v639_v2  ;;  %v524_v15 = vadd.f32 1.0, %v1611_v3  ;;  %v777_v17 = vmul.f32 %v634_v8, %v2007_v46 }
  0xf6   :  { %v405_v61 = vpop.f32.mrf.mxu0  ;;  %1614 = vrcp.f32 %v2169_v4  ;;  %v785_v32 = vmul.f32 %v754_v20, %v2017_v57  ;;  %v660_v37 = vand.u32 2147483647, %v2169_v4  ;;  %vm656_vm1 = vweird.f32 %v2169_v4 }
  0xf7   :  { %v406_v1 = vadd.f32 %v1911_v5, %v405_v61  ;;  %v454_v55 = vpop.f32.mrf.mxu1  ;;  %v759_v5 = vmul.f32 %v1607_v30, %v758_v63  ;;  %v644_v6 = vsel %vm643_vm11, %v1605_v42, %v640_v13  ;;  %1616 = vrcp.f32 %v524_v15 }
  0xf8   :  { %v649_v21 = vsel %vm646_vm13, %v648_v14, %v644_v6  ;;  %v675_v42 = vand.u32 2147483647, %v524_v15  ;;  %v677_v44 = vand.u32 2147483648, %v524_v15  ;;  %vm661_vm4 = vcmp.eq.f32.partialorder %v660_v37, 8.507059e+37  ;;  %v1557_v6 = vld [vmem:[%s2543_s5] ss:$0 sm:$0xff] }
  0xf9   :  { %v2181_v26 = vadd.f32 %v454_v55, %v406_v1  ;;  %v760_v50 = vadd.f32 %v1607_v30, %v759_v5  ;;  %v778_v24 = vmul.f32 %v649_v21, %v2047_v43  ;;  %vm671_vm5 = vweird.f32 %v524_v15 }
  0xfa   :  { %v678_v31 = vor.u32 1.1754944e-38, %v677_v44  ;;  %vm676_vm7 = vcmp.eq.f32.partialorder %v675_v42, 8.507059e+37  ;;  %v1674_v44 = vmov 128.0  }
  0xfb   :  { %v1454_v16 = vmul.f32 -1.442695, %v2181_v26  ;;  %v1613_v58 = vpop.eup %1612  ;;  %v764_v23 = vsel %vm763_vm14, %v1607_v30, %v760_v50  ;;  %v790_v7 = vpack.c.bf16 %v778_v24, %v777_v17 }
  0xfc   :  { %v769_v18 = vsel %vm766_vm15, %v768_v19, %v764_v23  ;;  %v2196_v29 = vadd.f32 1.0, %v1613_v58  ;;  %v1615_v22 = vpop.eup %1614 }
  0xfd   :  { %v786_v25 = vmul.f32 %v769_v18, %v2049_v12  ;;  %1618 = vpow2.f32 %v1454_v16  ;;  %v652_v28 = vmul.f32 %v1615_v22, %v2169_v4  ;;  %886 = vmatmul.bf16.gmra.mxu2 %v790_v7  ;;  %v1617_v34 = vpop.eup %1616  ;;  %vm657_vm0 = vweird.f32 %v1615_v22 }
  0xfe   :  { %1620 = vrcp.f32 %v2196_v29  ;;  %v667_v35 = vmul.f32 %v1617_v34, %v524_v15  ;;  %v662_v12 = vand.u32 2147483648, %v2169_v4  ;;  %vm658_vm2 = vmor %vm656_vm1, %vm657_vm0  ;;  %vm672_vm3 = vweird.f32 %v1617_v34 }
  0xff   :  { %v794_v33 = vpack.c.bf16 %v786_v25, %v785_v32  ;;  %v653_v46 = vsub.f32 1.0, %v652_v28  ;;  %vm673_vm6 = vmor %vm671_vm5, %vm672_vm3  ;;  %v692_v4 = vand.u32 2147483648, %v2196_v29  ;;  %vm686_vm10 = vweird.f32 %v2196_v29 }
 0x100   :  { %v668_v39 = vsub.f32 1.0, %v667_v35  ;;  %v663_v51 = vor.u32 1.1754944e-38, %v662_v12  ;;  %v690_v8 = vand.u32 2147483647, %v2196_v29 }
 0x101   :  { %906 = vmatmul.bf16.gmra.mxu3 %v794_v33  ;;  %v654_v36 = vmul.f32 %v1615_v22, %v653_v46  ;;  %v693_v5 = vor.u32 1.1754944e-38, %v692_v4 }
 0x102   :  { %v669_v30 = vmul.f32 %v1617_v34, %v668_v39  ;;  %vm691_vm15 = vcmp.eq.f32.partialorder %v690_v8, 8.507059e+37 }
 0x103   :  { %v1619_v43 = vpop.eup %1618  ;;  %v655_v41 = vadd.f32 %v1615_v22, %v654_v36 }
 0x104   :  { %v526_v57 = vadd.f32 1.0, %v1619_v43  ;;  %v1621_v40 = vpop.eup %1620  ;;  %v670_v52 = vadd.f32 %v1617_v34, %v669_v30 }
 0x105   :  { %v682_v48 = vmul.f32 %v1621_v40, %v2196_v29  ;;  %v659_v49 = vsel %vm658_vm2, %v1615_v22, %v655_v41  ;;  %vm687_vm8 = vweird.f32 %v1621_v40 }
 0x106   :  { %1622 = vrcp.f32 %v526_v57  ;;  %v664_v54 = vsel %vm661_vm4, %v663_v51, %v659_v49  ;;  %v674_v59 = vsel %vm673_vm6, %v1617_v34, %v670_v52  ;;  %v707_v56 = vand.u32 2147483648, %v526_v57  ;;  %vm688_vm11 = vmor %vm686_vm10, %vm687_vm8 }
 0x107   :  { %v683_v53 = vsub.f32 1.0, %v682_v48  ;;  %v679_v45 = vsel %vm676_vm7, %v678_v31, %v674_v59  ;;  %v779_v10 = vmul.f32 %v664_v54, %v2109_v11  ;;  %v705_v3 = vand.u32 2147483647, %v526_v57 }
 0x108   :  { %v780_v61 = vmul.f32 %v679_v45, %v2125_v27  ;;  %vm701_vm12 = vweird.f32 %v526_v57  ;;  %v708_v9 = vor.u32 1.1754944e-38, %v707_v56  ;;  %1624 = vrcp.f32 %v1674_v44 }
 0x109   :  { %v684_v62 = vmul.f32 %v1621_v40, %v683_v53  ;;  %vm706_vm14 = vcmp.eq.f32.partialorder %v705_v3, 8.507059e+37 }
 0x10a   :  { %v791_v0 = vpack.c.bf16 %v780_v61, %v779_v10 }
 0x10b   :  { %v685_v2 = vadd.f32 %v1621_v40, %v684_v62 }
 0x10c   :  { %v1623_v60 = vpop.eup %1622 }
 0x10d   :  { %v697_v63 = vmul.f32 %v1623_v60, %v526_v57  ;;  %891 = vmatmul.bf16.gmra.mxu2 %v791_v0  ;;  %vm702_vm9 = vweird.f32 %v1623_v60  ;;  %v689_v27 = vsel %vm688_vm11, %v1621_v40, %v685_v2 }
 0x10e   :  { %vm703_vm13 = vmor %vm701_vm12, %vm702_vm9  ;;  %v694_v14 = vsel %vm691_vm15, %v693_v5, %v689_v27  ;;  %v1625_v49 = vpop.eup %1624 }
 0x10f   :  { %v698_v1 = vsub.f32 1.0, %v697_v63  ;;  %v781_v15 = vmul.f32 %v694_v14, %v2143_v47  ;;  %v947_v51 = vmul.f32 128.0, %v1625_v49  ;;  %vm951_vm0 = vweird.f32 %v1625_v49 }
 0x111   :  { %v699_v55 = vmul.f32 %v1623_v60, %v698_v1  ;;  %v948_v53 = vsub.f32 1.0, %v947_v51 }
 0x113   :  { %v700_v11 = vadd.f32 %v1623_v60, %v699_v55  ;;  %v949_v54 = vmul.f32 %v1625_v49, %v948_v53 }
 0x115   :  { %v704_v38 = vsel %vm703_vm13, %v1623_v60, %v700_v11  ;;  %v950_v31 = vadd.f32 %v1625_v49, %v949_v54 }
 0x116   :  { %v709_v13 = vsel %vm706_vm14, %v708_v9, %v704_v38 }
 0x117   :  { %v782_v50 = vmul.f32 %v709_v13, %v2181_v26  ;;  %v2257_v59 = vsel %vm951_vm0, %v1625_v49, %v950_v31 }
 0x119   :  { %v792_v16 = vpack.c.bf16 %v782_v50, %v781_v15 }
 0x11d   :  { %896 = vmatmul.bf16.gmra.mxu2 %v792_v16 }
 0x14e   :  { %v872_v19 = vpop.f32.mrf.mxu2 }
 0x14f   :  { %v873_v58 = vadd.f32 %v1557_v6, %v872_v19 }
 0x151   :  { %914 = vadd.xlane.f32.xlu0 %v873_v58 }
 0x156   :  { %v874_v20 = vpop.f32.mrf.mxu2 }
 0x157   :  { %v875_v21 = vadd.f32 %v1557_v6, %v874_v20 }
 0x159   :  { %916 = vadd.xlane.f32.xlu0 %v875_v21 }
 0x15e   :  { %v877_v23 = vpop.f32.mrf.mxu2 }
 0x15f   :  { %v2215_v17 = vadd.f32 %v1557_v6, %v877_v23 }
 0x161   :  { %918 = vadd.xlane.f32.xlu1 %v2215_v17 }
 0x166   :  { %v879_v26 = vpop.f32.mrf.mxu2 }
 0x167   :  { %v2218_v24 = vadd.f32 %v1557_v6, %v879_v26 }
 0x169   :  { %920 = vadd.xlane.f32.xlu1 %v2218_v24 }
 0x16f   :  { %v882_v47 = vpop.f32.mrf.mxu2 }
 0x170   :  { %v2221_v18 = vadd.f32 %v1557_v6, %v882_v47 }
 0x172   :  { %922 = vadd.xlane.f32.xlu2 %v2221_v18  ;;  %v902_v25 = vpop.f32.mrf.mxu3 }
 0x173   :  { %v2224_v29 = vadd.f32 %v1557_v6, %v902_v25 }
 0x175   :  { %938 = vadd.xlane.f32.xlu0 %v2224_v29 }
 0x177   :  { %v884_v22 = vpop.f32.mrf.mxu2 }
 0x178   :  { %v2227_v32 = vadd.f32 %v1557_v6, %v884_v22 }
 0x17a   :  { %924 = vadd.xlane.f32.xlu2 %v2227_v32  ;;  %v904_v7 = vpop.f32.mrf.mxu3 }
 0x17b   :  { %v2230_v28 = vadd.f32 %v1557_v6, %v904_v7 }
 0x17d   :  { %940 = vadd.xlane.f32.xlu1 %v2230_v28 }
 0x180   :  { %v887_v33 = vpop.f32.mrf.mxu2 }
 0x181   :  { %v2233_v34 = vadd.f32 %v1557_v6, %v887_v33 }
 0x183   :  { %926 = vadd.xlane.f32.xlu0 %v2233_v34 }
 0x184   :  { %v907_v12 = vpop.f32.mrf.mxu3 }
 0x185   :  { %v2254_v52 = vadd.f32 %v1557_v6, %v907_v12 }
 0x188   :  { %v889_v46 = vpop.f32.mrf.mxu2 }
 0x189   :  { %v2236_v35 = vadd.f32 %v1557_v6, %v889_v46 }
 0x18b   :  { %928 = vadd.xlane.f32.xlu1 %v2236_v35 }
 0x18c   :  { %v909_v57 = vpop.f32.mrf.mxu3 }
 0x18d   :  { %v2245_v41 = vadd.f32 %v1557_v6, %v909_v57 }
 0x190   :  { %v892_v43 = vpop.f32.mrf.mxu2 }
 0x191   :  { %v2239_v36 = vadd.f32 %v1557_v6, %v892_v43 }
 0x193   :  { %930 = vadd.xlane.f32.xlu2 %v2239_v36 }
 0x198   :  { %v894_v37 = vpop.f32.mrf.mxu2 }
 0x199   :  { %v2242_v39 = vadd.f32 %v1557_v6, %v894_v37 }
 0x19b   :  { %932 = vadd.xlane.f32.xlu0 %v2242_v39 }
 0x1a0   :  { %v897_v40 = vpop.f32.mrf.mxu2 }
 0x1a1   :  { %v2247_v42 = vadd.f32 %v1557_v6, %v897_v40 }
 0x1a3   :  { %934 = vadd.xlane.f32.xlu1 %v2247_v42  ;;  %944 = vadd.xlane.f32.xlu0 %v2245_v41 }
 0x1a8   :  { %v899_v30 = vpop.f32.mrf.mxu2 }
 0x1a9   :  { %v2251_v48 = vadd.f32 %v1557_v6, %v899_v30 }
 0x1ab   :  { %936 = vadd.xlane.f32.xlu2 %v2251_v48 }
 0x1b3   :  { %942 = vadd.xlane.f32.xlu2 %v2254_v52 }
 0x1c4   :  { %v915_v45 = vpop.xlane.xlu0 %914 }
 0x1c5   :  { %v953_v60 = vmul.f32 %v2257_v59, %v915_v45 }
 0x1c7   :  { %v2260_v10 = vsub.f32 %v873_v58, %v953_v60 }
 0x1c9   :  { %v985_v61 = vmul.f32 %v2260_v10, %v2260_v10 }
 0x1cb   :  { %1001 = vadd.xlane.f32.xlu1 %v985_v61 }
 0x1cc   :  { %v917_v62 = vpop.xlane.xlu0 %916 }
 0x1cd   :  { %v954_v63 = vmul.f32 %v2257_v59, %v917_v62 }
 0x1cf   :  { %v2265_v0 = vsub.f32 %v875_v21, %v954_v63 }
 0x1d1   :  { %v986_v1 = vmul.f32 %v2265_v0, %v2265_v0 }
 0x1d3   :  { %1003 = vadd.xlane.f32.xlu2 %v986_v1 }
 0x1d4   :  { %v919_v2 = vpop.xlane.xlu1 %918 }
 0x1d5   :  { %v955_v56 = vmul.f32 %v2257_v59, %v919_v2 }
 0x1d7   :  { %v2271_v4 = vsub.f32 %v2215_v17, %v955_v56 }
 0x1d9   :  { %v987_v55 = vmul.f32 %v2271_v4, %v2271_v4 }
 0x1db   :  { %1005 = vadd.xlane.f32.xlu0 %v987_v55 }
 0x1dc   :  { %v921_v3 = vpop.xlane.xlu1 %920 }
 0x1dd   :  { %v956_v8 = vmul.f32 %v2257_v59, %v921_v3 }
 0x1df   :  { %v2277_v11 = vsub.f32 %v2218_v24, %v956_v8 }
 0x1e1   :  { %v988_v27 = vmul.f32 %v2277_v11, %v2277_v11 }
 0x1e3   :  { %1007 = vadd.xlane.f32.xlu1 %v988_v27 }
 0x1e5   :  { %v923_v9 = vpop.xlane.xlu2 %922 }
 0x1e6   :  { %v957_v5 = vmul.f32 %v2257_v59, %v923_v9 }
 0x1e8   :  { %v2283_v38 = vsub.f32 %v2221_v18, %v957_v5  ;;  %v939_v13 = vpop.xlane.xlu0 %938 }
 0x1e9   :  { %v965_v14 = vmul.f32 %v2257_v59, %v939_v13 }
 0x1ea   :  { %v989_v50 = vmul.f32 %v2283_v38, %v2283_v38 }
 0x1eb   :  { %v2289_v15 = vsub.f32 %v2224_v29, %v965_v14 }
 0x1ec   :  { %1009 = vadd.xlane.f32.xlu2 %v989_v50 }
 0x1ed   :  { %v925_v16 = vpop.xlane.xlu2 %924  ;;  %v997_v6 = vmul.f32 %v2289_v15, %v2289_v15 }
 0x1ee   :  { %v958_v19 = vmul.f32 %v2257_v59, %v925_v16 }
 0x1ef   :  { %1025 = vadd.xlane.f32.xlu1 %v997_v6  ;;  %v2359_v6 = vld [vmem:[%s2544_s6] ss:$0 sm:$0xff] }
 0x1f0   :  { %v2295_v58 = vsub.f32 %v2227_v32, %v958_v19  ;;  %v941_v21 = vpop.xlane.xlu1 %940 }
 0x1f1   :  { %v966_v30 = vmul.f32 %v2257_v59, %v941_v21  ;;  %v2364_v21 = vld [vmem:[%s2545_s7] ss:$0 sm:$0xff] }
 0x1f2   :  { %v990_v20 = vmul.f32 %v2295_v58, %v2295_v58 }
 0x1f3   :  { %v2337_v53 = vsub.f32 %v2230_v28, %v966_v30 }
 0x1f4   :  { %1011 = vadd.xlane.f32.xlu0 %v990_v20 }
 0x1f5   :  { %v998_v31 = vmul.f32 %v2337_v53, %v2337_v53 }
 0x1f6   :  { %v927_v23 = vpop.xlane.xlu0 %926 }
 0x1f7   :  { %v959_v17 = vmul.f32 %v2257_v59, %v927_v23 }
 0x1f9   :  { %v2301_v26 = vsub.f32 %v2233_v34, %v959_v17 }
 0x1fb   :  { %v991_v24 = vmul.f32 %v2301_v26, %v2301_v26 }
 0x1fd   :  { %1013 = vadd.xlane.f32.xlu1 %v991_v24 }
 0x1fe   :  { %v929_v47 = vpop.xlane.xlu1 %928 }
 0x1ff   :  { %v960_v18 = vmul.f32 %v2257_v59, %v929_v47 }
 0x201   :  { %v2307_v25 = vsub.f32 %v2236_v35, %v960_v18 }
 0x203   :  { %v992_v29 = vmul.f32 %v2307_v25, %v2307_v25 }
 0x205   :  { %1015 = vadd.xlane.f32.xlu2 %v992_v29 }
 0x206   :  { %v931_v22 = vpop.xlane.xlu2 %930 }
 0x207   :  { %v961_v32 = vmul.f32 %v2257_v59, %v931_v22 }
 0x209   :  { %v2313_v7 = vsub.f32 %v2239_v36, %v961_v32 }
 0x20b   :  { %v993_v33 = vmul.f32 %v2313_v7, %v2313_v7 }
 0x20d   :  { %1017 = vadd.xlane.f32.xlu0 %v993_v33 }
 0x20e   :  { %v933_v34 = vpop.xlane.xlu0 %932 }
 0x20f   :  { %v962_v46 = vmul.f32 %v2257_v59, %v933_v34 }
 0x211   :  { %v2319_v35 = vsub.f32 %v2242_v39, %v962_v46 }
 0x213   :  { %v994_v43 = vmul.f32 %v2319_v35, %v2319_v35 }
 0x215   :  { %1019 = vadd.xlane.f32.xlu1 %v994_v43  ;;  %v1658_v43 = vld [vmem:[%s2540_s1] sm:$0xff] }
 0x216   :  { %v935_v12 = vpop.xlane.xlu1 %934  ;;  %v945_v37 = vpop.xlane.xlu0 %944 }
 0x217   :  { %v963_v57 = vmul.f32 %v2257_v59, %v935_v12  ;;  %v968_v36 = vmul.f32 %v2257_v59, %v945_v37 }
 0x219   :  { %v2326_v40 = vsub.f32 %v2247_v42, %v963_v57  ;;  %v2329_v44 = vsub.f32 %v2245_v41, %v968_v36 }
 0x21b   :  { %v995_v39 = vmul.f32 %v2326_v40, %v2326_v40  ;;  %v1000_v49 = vmul.f32 %v2329_v44, %v2329_v44 }
 0x21d   :  { %1021 = vadd.xlane.f32.xlu2 %v995_v39  ;;  %1031 = vadd.xlane.f32.xlu1 %v1000_v49 }
 0x21e   :  { %v937_v51 = vpop.xlane.xlu2 %936 }
 0x21f   :  { %v964_v42 = vmul.f32 %v2257_v59, %v937_v51 }
 0x221   :  { %v2341_v54 = vsub.f32 %v2251_v48, %v964_v42 }
 0x223   :  { %v996_v41 = vmul.f32 %v2341_v54, %v2341_v54 }
 0x225   :  { %1023 = vadd.xlane.f32.xlu0 %v996_v41  ;;  %1027 = vadd.xlane.f32.xlu2 %v998_v31 }
 0x226   :  { %v943_v45 = vpop.xlane.xlu2 %942 }
 0x227   :  { %v967_v60 = vmul.f32 %v2257_v59, %v943_v45 }
 0x229   :  { %v2349_v61 = vsub.f32 %v2254_v52, %v967_v60  ;;  %v1659_v60 = vld [vmem:[%s2540_s1 + $0x8] sm:$0xff] }
 0x22b   :  { %v999_v28 = vmul.f32 %v2349_v61, %v2349_v61 }
 0x22d   :  { %1029 = vadd.xlane.f32.xlu0 %v999_v28 }
 0x23e   :  { %v1002_v48 = vpop.xlane.xlu1 %1001 }
 0x23f   :  { %v1033_v62 = vmul.f32 %v1002_v48, %v2257_v59 }
 0x241   :  { %v1049_v63 = vadd.f32 1e-05, %v1033_v62 }
 0x243   :  { %1626 = vrsqrt.f32 %v1049_v63  ;;  %vm1071_vm2 = vweird.f32 %v1049_v63 }
 0x246   :  { %v1004_v1 = vpop.xlane.xlu2 %1003 }
 0x247   :  { %v1034_v2 = vmul.f32 %v1004_v1, %v2257_v59 }
 0x249   :  { %v1627_v56 = vpop.eup %1626  ;;  %v1050_v55 = vadd.f32 1e-05, %v1034_v2 }
 0x24a   :  { %v1066_v3 = vmul.f32 %v1627_v56, %v1049_v63  ;;  %vm1072_vm1 = vweird.f32 %v1627_v56 }
 0x24b   :  { %1628 = vrsqrt.f32 %v1050_v55  ;;  %vm1073_vm3 = vmor %vm1071_vm2, %vm1072_vm1  ;;  %vm1081_vm5 = vweird.f32 %v1050_v55 }
 0x24c   :  { %v1067_v8 = vmul.f32 %v1627_v56, %v1066_v3 }
 0x24e   :  { %v1068_v27 = vmul.f32 0.5, %v1067_v8  ;;  %v1006_v52 = vpop.xlane.xlu0 %1005 }
 0x24f   :  { %v1035_v9 = vmul.f32 %v1006_v52, %v2257_v59 }
 0x250   :  { %v1069_v5 = vsub.f32 1.5, %v1068_v27 }
 0x251   :  { %v1629_v13 = vpop.eup %1628  ;;  %v1051_v14 = vadd.f32 1e-05, %v1035_v9 }
 0x252   :  { %v1070_v50 = vmul.f32 %v1627_v56, %v1069_v5  ;;  %v1076_v16 = vmul.f32 %v1629_v13, %v1050_v55  ;;  %vm1082_vm4 = vweird.f32 %v1629_v13 }
 0x253   :  { %1630 = vrsqrt.f32 %v1051_v14  ;;  %vm1083_vm6 = vmor %vm1081_vm5, %vm1082_vm4  ;;  %vm1091_vm8 = vweird.f32 %v1051_v14 }
 0x254   :  { %v1074_v19 = vsel %vm1073_vm3, %v1627_v56, %v1070_v50  ;;  %v1077_v20 = vmul.f32 %v1629_v13, %v1076_v16 }
 0x255   :  { %v1225_v23 = vmul.f32 %v1074_v19, %v2260_v10 }
 0x256   :  { %v1078_v17 = vmul.f32 0.5, %v1077_v20  ;;  %v1008_v24 = vpop.xlane.xlu1 %1007 }
 0x257   :  { %v1244_v47 = vmul.f32 %v2359_v6, %v1225_v23  ;;  %v1036_v18 = vmul.f32 %v1008_v24, %v2257_v59 }
 0x258   :  { %v1079_v29 = vsub.f32 1.5, %v1078_v17 }
 0x259   :  { %v1631_v22 = vpop.eup %1630  ;;  %v1263_v32 = vadd.f32 %v2364_v21, %v1244_v47  ;;  %v1052_v33 = vadd.f32 1e-05, %v1036_v18 }
 0x25a   :  { %v1080_v34 = vmul.f32 %v1629_v13, %v1079_v29  ;;  %v1086_v46 = vmul.f32 %v1631_v22, %v1051_v14  ;;  %vm1092_vm7 = vweird.f32 %v1631_v22 }
 0x25b   :  { %v1279_v10 = vadd.f32 %v1658_v43, %v1263_v32  ;;  %1632 = vrsqrt.f32 %v1052_v33  ;;  %vm1093_vm9 = vmor %vm1091_vm8, %vm1092_vm7  ;;  %vm1101_vm11 = vweird.f32 %v1052_v33 }
 0x25c   :  { %v1084_v12 = vsel %vm1083_vm6, %v1629_v13, %v1080_v34  ;;  %v1087_v37 = vmul.f32 %v1631_v22, %v1086_v46  ;;  %v1661_v34 = vld [vmem:[%s2540_s1 + $0x18] sm:$0xff] }
 0x25d   :  { %1295 = vst [vmem:[%s2546_s8] sm:$0xff] %v1279_v10  ;;  %v1226_v57 = vmul.f32 %v1084_v12, %v2265_v0 }
 0x25e   :  { %v1088_v36 = vmul.f32 0.5, %v1087_v37 }
 0x25f   :  { %v1245_v30 = vmul.f32 %v2359_v6, %v1226_v57  ;;  %v1010_v49 = vpop.xlane.xlu2 %1009 }
 0x260   :  { %v1089_v39 = vsub.f32 1.5, %v1088_v36  ;;  %v1037_v41 = vmul.f32 %v1010_v49, %v2257_v59 }
 0x261   :  { %v1633_v51 = vpop.eup %1632  ;;  %v1264_v42 = vadd.f32 %v2364_v21, %v1245_v30 }
 0x262   :  { %v1090_v31 = vmul.f32 %v1631_v22, %v1089_v39  ;;  %v1096_v45 = vmul.f32 %v1633_v51, %v1052_v33  ;;  %v1053_v0 = vadd.f32 1e-05, %v1037_v41  ;;  %v1026_v48 = vpop.xlane.xlu1 %1025  ;;  %vm1102_vm10 = vweird.f32 %v1633_v51 }
 0x263   :  { %v1280_v28 = vadd.f32 %v1659_v60, %v1264_v42  ;;  %v1045_v1 = vmul.f32 %v1026_v48, %v2257_v59  ;;  %vm1103_vm12 = vmor %vm1101_vm11, %vm1102_vm10 }
 0x264   :  { %v1094_v62 = vsel %vm1093_vm9, %v1631_v22, %v1090_v31  ;;  %v1097_v63 = vmul.f32 %v1633_v51, %v1096_v45  ;;  %1634 = vrsqrt.f32 %v1053_v0  ;;  %vm1111_vm14 = vweird.f32 %v1053_v0 }
 0x265   :  { %1296 = vst [vmem:[%s2546_s8 + $0x8] sm:$0xff] %v1280_v28  ;;  %v1227_v2 = vmul.f32 %v1094_v62, %v2271_v4  ;;  %v1061_v55 = vadd.f32 1e-05, %v1045_v1  ;;  %v1660_v4 = vld [vmem:[%s2540_s1 + $0x10] sm:$0xff] }
 0x266   :  { %v1098_v56 = vmul.f32 0.5, %v1097_v63 }
 0x267   :  { %v1246_v3 = vmul.f32 %v2359_v6, %v1227_v2  ;;  %1636 = vrsqrt.f32 %v1061_v55  ;;  %v1012_v27 = vpop.xlane.xlu0 %1011  ;;  %vm1191_vm1 = vweird.f32 %v1061_v55 }
 0x268   :  { %v1099_v8 = vsub.f32 1.5, %v1098_v56  ;;  %v1038_v9 = vmul.f32 %v1012_v27, %v2257_v59 }
 0x269   :  { %v1265_v52 = vadd.f32 %v2364_v21, %v1246_v3  ;;  %v1663_v3 = vld [vmem:[%s2540_s1 + $0x60] sm:$0xff] }
 0x26a   :  { %v1100_v5 = vmul.f32 %v1633_v51, %v1099_v8  ;;  %v1635_v13 = vpop.eup %1634  ;;  %v1054_v50 = vadd.f32 1e-05, %v1038_v9 }
 0x26b   :  { %v1281_v14 = vadd.f32 %v1660_v4, %v1265_v52  ;;  %v1106_v19 = vmul.f32 %v1635_v13, %v1053_v0  ;;  %vm1112_vm13 = vweird.f32 %v1635_v13 }
 0x26c   :  { %v1104_v16 = vsel %vm1103_vm12, %v1633_v51, %v1100_v5  ;;  %1638 = vrsqrt.f32 %v1054_v50  ;;  %vm1113_vm15 = vmor %vm1111_vm14, %vm1112_vm13  ;;  %vm1121_vm4 = vweird.f32 %v1054_v50 }
 0x26d   :  { %1297 = vst [vmem:[%s2546_s8 + $0x10] sm:$0xff] %v1281_v14  ;;  %v1228_v20 = vmul.f32 %v1104_v16, %v2277_v11  ;;  %v1637_v23 = vpop.eup %1636  ;;  %v1107_v17 = vmul.f32 %v1635_v13, %v1106_v19 }
 0x26e   :  { %v1186_v47 = vmul.f32 %v1637_v23, %v1061_v55  ;;  %vm1192_vm0 = vweird.f32 %v1637_v23 }
 0x26f   :  { %v1247_v24 = vmul.f32 %v2359_v6, %v1228_v20  ;;  %v1108_v18 = vmul.f32 0.5, %v1107_v17  ;;  %vm1193_vm2 = vmor %vm1191_vm1, %vm1192_vm0 }
 0x270   :  { %v1187_v22 = vmul.f32 %v1637_v23, %v1186_v47  ;;  %v1014_v37 = vpop.xlane.xlu1 %1013 }
 0x271   :  { %v1266_v29 = vadd.f32 %v2364_v21, %v1247_v24  ;;  %v1109_v32 = vsub.f32 1.5, %v1108_v18  ;;  %v1039_v30 = vmul.f32 %v1014_v37, %v2257_v59 }
 0x272   :  { %v1639_v33 = vpop.eup %1638  ;;  %v1188_v43 = vmul.f32 0.5, %v1187_v22 }
 0x273   :  { %v1282_v46 = vadd.f32 %v1661_v34, %v1266_v29  ;;  %v1110_v11 = vmul.f32 %v1635_v13, %v1109_v32  ;;  %v1116_v10 = vmul.f32 %v1639_v33, %v1054_v50  ;;  %v1055_v42 = vadd.f32 1e-05, %v1039_v30 }
 0x274   :  { %v1189_v12 = vsub.f32 1.5, %v1188_v43  ;;  %vm1122_vm3 = vweird.f32 %v1639_v33 }
 0x275   :  { %1298 = vst [vmem:[%s2546_s8 + $0x18] sm:$0xff] %v1282_v46  ;;  %v1114_v57 = vsel %vm1113_vm15, %v1635_v13, %v1110_v11  ;;  %v1117_v36 = vmul.f32 %v1639_v33, %v1116_v10  ;;  %1640 = vrsqrt.f32 %v1055_v42  ;;  %vm1123_vm5 = vmor %vm1121_vm4, %vm1122_vm3  ;;  %vm1131_vm7 = vweird.f32 %v1055_v42 }
 0x276   :  { %v1229_v39 = vmul.f32 %v1114_v57, %v2283_v38  ;;  %v1190_v49 = vmul.f32 %v1637_v23, %v1189_v12  ;;  %v1662_v38 = vld [vmem:[%s2540_s1 + $0x20] sm:$0xff]  ;;  %v1665_v57 = vld [vmem:[%s2540_s1 + $0x30] sm:$0xff] }
 0x277   :  { %v1118_v51 = vmul.f32 0.5, %v1117_v36 }
 0x278   :  { %v1248_v41 = vmul.f32 %v2359_v6, %v1229_v39  ;;  %v1194_v31 = vsel %vm1193_vm2, %v1637_v23, %v1190_v49  ;;  %v1016_v63 = vpop.xlane.xlu2 %1015 }
 0x279   :  { %v1237_v45 = vmul.f32 %v1194_v31, %v2289_v15  ;;  %v1119_v60 = vsub.f32 1.5, %v1118_v51  ;;  %v1040_v15 = vmul.f32 %v1016_v63, %v2257_v59  ;;  %v1666_v63 = vld [vmem:[%s2540_s1 + $0x38] sm:$0xff] }
 0x27a   :  { %v1267_v28 = vadd.f32 %v2364_v21, %v1248_v41 }
 0x27b   :  { %v1256_v0 = vmul.f32 %v2359_v6, %v1237_v45  ;;  %v1120_v48 = vmul.f32 %v1639_v33, %v1119_v60  ;;  %v1641_v55 = vpop.eup %1640  ;;  %v1056_v27 = vadd.f32 1e-05, %v1040_v15 }
 0x27c   :  { %v1283_v62 = vadd.f32 %v1662_v38, %v1267_v28  ;;  %v1126_v9 = vmul.f32 %v1641_v55, %v1055_v42  ;;  %vm1132_vm6 = vweird.f32 %v1641_v55 }
 0x27d   :  { %v1275_v1 = vadd.f32 %v2364_v21, %v1256_v0  ;;  %v1124_v2 = vsel %vm1123_vm5, %v1639_v33, %v1120_v48  ;;  %1642 = vrsqrt.f32 %v1056_v27  ;;  %vm1133_vm8 = vmor %vm1131_vm7, %vm1132_vm6  ;;  %vm1141_vm10 = vweird.f32 %v1056_v27 }
 0x27e   :  { %1299 = vst [vmem:[%s2546_s8 + $0x20] sm:$0xff] %v1283_v62  ;;  %v1230_v56 = vmul.f32 %v1124_v2, %v2295_v58  ;;  %v1127_v13 = vmul.f32 %v1641_v55, %v1126_v9  ;;  %v1664_v58 = vld [vmem:[%s2540_s1 + $0x28] sm:$0xff] }
 0x27f   :  { %v1291_v8 = vadd.f32 %v1663_v3, %v1275_v1 }
 0x280   :  { %v1249_v52 = vmul.f32 %v2359_v6, %v1230_v56  ;;  %v1128_v14 = vmul.f32 0.5, %v1127_v13  ;;  %v1018_v50 = vpop.xlane.xlu0 %1017 }
 0x281   :  { %1307 = vst [vmem:[%s2546_s8 + $0x60] sm:$0xff] %v1291_v8  ;;  %v1041_v16 = vmul.f32 %v1018_v50, %v2257_v59 }
 0x282   :  { %v1268_v5 = vadd.f32 %v2364_v21, %v1249_v52  ;;  %v1129_v19 = vsub.f32 1.5, %v1128_v14 }
 0x283   :  { %v1643_v20 = vpop.eup %1642  ;;  %v1057_v23 = vadd.f32 1e-05, %v1041_v16 }
 0x284   :  { %v1284_v4 = vadd.f32 %v1664_v58, %v1268_v5  ;;  %v1130_v17 = vmul.f32 %v1641_v55, %v1129_v19  ;;  %v1136_v24 = vmul.f32 %v1643_v20, %v1056_v27  ;;  %vm1142_vm9 = vweird.f32 %v1643_v20  ;;  %v1667_v19 = vld [vmem:[%s2540_s1 + $0x40] sm:$0xff] }
 0x285   :  { %1644 = vrsqrt.f32 %v1057_v23  ;;  %vm1143_vm11 = vmor %vm1141_vm10, %vm1142_vm9  ;;  %vm1151_vm13 = vweird.f32 %v1057_v23 }
 0x286   :  { %1300 = vst [vmem:[%s2546_s8 + $0x28] sm:$0xff] %v1284_v4  ;;  %v1134_v47 = vsel %vm1133_vm8, %v1641_v55, %v1130_v17  ;;  %v1137_v18 = vmul.f32 %v1643_v20, %v1136_v24 }
 0x287   :  { %v1231_v29 = vmul.f32 %v1134_v47, %v2301_v26 }
 0x288   :  { %v1138_v22 = vmul.f32 0.5, %v1137_v18  ;;  %v1020_v32 = vpop.xlane.xlu1 %1019 }
 0x289   :  { %v1250_v33 = vmul.f32 %v2359_v6, %v1231_v29  ;;  %v1042_v34 = vmul.f32 %v1020_v32, %v2257_v59 }
 0x28a   :  { %v1139_v46 = vsub.f32 1.5, %v1138_v22 }
 0x28b   :  { %v1645_v43 = vpop.eup %1644  ;;  %v1269_v11 = vadd.f32 %v2364_v21, %v1250_v33  ;;  %v1058_v10 = vadd.f32 1e-05, %v1042_v34 }
 0x28c   :  { %v1140_v12 = vmul.f32 %v1643_v20, %v1139_v46  ;;  %v1146_v37 = vmul.f32 %v1645_v43, %v1057_v23  ;;  %vm1152_vm12 = vweird.f32 %v1645_v43 }
 0x28d   :  { %v1285_v26 = vadd.f32 %v1665_v57, %v1269_v11  ;;  %1646 = vrsqrt.f32 %v1058_v10  ;;  %vm1153_vm14 = vmor %vm1151_vm13, %vm1152_vm12  ;;  %vm1161_vm0 = vweird.f32 %v1058_v10 }
 0x28e   :  { %v1144_v36 = vsel %vm1143_vm11, %v1643_v20, %v1140_v12  ;;  %v1147_v30 = vmul.f32 %v1645_v43, %v1146_v37 }
 0x28f   :  { %1301 = vst [vmem:[%s2546_s8 + $0x30] sm:$0xff] %v1285_v26  ;;  %v1232_v39 = vmul.f32 %v1144_v36, %v2307_v25  ;;  %v1668_v26 = vld [vmem:[%s2540_s1 + $0x48] sm:$0xff] }
 0x290   :  { %v1148_v49 = vmul.f32 0.5, %v1147_v30  ;;  %v1022_v51 = vpop.xlane.xlu2 %1021  ;;  %v1032_v42 = vpop.xlane.xlu1 %1031 }
 0x291   :  { %v1251_v41 = vmul.f32 %v2359_v6, %v1232_v39  ;;  %v1043_v31 = vmul.f32 %v1022_v51, %v2257_v59  ;;  %v1048_v45 = vmul.f32 %v1032_v42, %v2257_v59 }
 0x292   :  { %v1149_v60 = vsub.f32 1.5, %v1148_v49 }
 0x293   :  { %v1647_v28 = vpop.eup %1646  ;;  %v1270_v0 = vadd.f32 %v2364_v21, %v1251_v41  ;;  %v1059_v48 = vadd.f32 1e-05, %v1043_v31  ;;  %v2451_v38 = vadd.f32 1e-05, %v1048_v45 }
 0x294   :  { %v1150_v62 = vmul.f32 %v1645_v43, %v1149_v60  ;;  %v1156_v25 = vmul.f32 %v1647_v28, %v1058_v10  ;;  %vm1162_vm15 = vweird.f32 %v1647_v28 }
 0x295   :  { %v1286_v1 = vadd.f32 %v1666_v63, %v1270_v0  ;;  %1648 = vrsqrt.f32 %v1059_v48  ;;  %vm1163_vm1 = vmor %vm1161_vm0, %vm1162_vm15  ;;  %vm1171_vm4 = vweird.f32 %v1059_v48  ;;  %vm1221_vm6 = vweird.f32 %v2451_v38 }
 0x296   :  { %v1154_v2 = vsel %vm1153_vm14, %v1645_v43, %v1150_v62  ;;  %v1157_v15 = vmul.f32 %v1647_v28, %v1156_v25  ;;  %1650 = vrsqrt.f32 %v2451_v38 }
 0x297   :  { %1302 = vst [vmem:[%s2546_s8 + $0x38] sm:$0xff] %v1286_v1  ;;  %v1233_v56 = vmul.f32 %v1154_v2, %v2313_v7 }
 0x298   :  { %v1158_v55 = vmul.f32 0.5, %v1157_v15  ;;  %v1028_v3 = vpop.xlane.xlu2 %1027  ;;  %v1024_v8 = vpop.xlane.xlu0 %1023 }
 0x299   :  { %v1252_v27 = vmul.f32 %v2359_v6, %v1233_v56  ;;  %v1046_v52 = vmul.f32 %v1028_v3, %v2257_v59  ;;  %v1044_v9 = vmul.f32 %v1024_v8, %v2257_v59  ;;  %v1670_v56 = vld [vmem:[%s2540_s1 + $0x78] sm:$0xff] }
 0x29a   :  { %v1159_v5 = vsub.f32 1.5, %v1158_v55 }
 0x29b   :  { %v1649_v13 = vpop.eup %1648  ;;  %v1271_v58 = vadd.f32 %v2364_v21, %v1252_v27  ;;  %v2465_v4 = vadd.f32 1e-05, %v1046_v52  ;;  %v2467_v14 = vadd.f32 1e-05, %v1044_v9 }
 0x29c   :  { %v1651_v50 = vpop.eup %1650  ;;  %v1160_v7 = vmul.f32 %v1647_v28, %v1159_v5  ;;  %v1166_v16 = vmul.f32 %v1649_v13, %v1059_v48  ;;  %vm1172_vm2 = vweird.f32 %v1649_v13 }
 0x29d   :  { %v1287_v20 = vadd.f32 %v1667_v19, %v1271_v58  ;;  %v1216_v23 = vmul.f32 %v1651_v50, %v2451_v38  ;;  %1652 = vrsqrt.f32 %v2465_v4  ;;  %vm1222_vm3 = vweird.f32 %v1651_v50  ;;  %vm1173_vm5 = vmor %vm1171_vm4, %vm1172_vm2 }
 0x29e   :  { %v1164_v17 = vsel %vm1163_vm1, %v1647_v28, %v1160_v7  ;;  %v1167_v24 = vmul.f32 %v1649_v13, %v1166_v16  ;;  %1654 = vrsqrt.f32 %v2467_v14  ;;  %vm1223_vm7 = vmor %vm1221_vm6, %vm1222_vm3  ;;  %vm1201_vm10 = vweird.f32 %v2465_v4 }
 0x29f   :  { %1303 = vst [vmem:[%s2546_s8 + $0x40] sm:$0xff] %v1287_v20  ;;  %v1234_v47 = vmul.f32 %v1164_v17, %v2319_v35  ;;  %v1217_v18 = vmul.f32 %v1651_v50, %v1216_v23  ;;  %vm1181_vm12 = vweird.f32 %v2467_v14 }
 0x2a0   :  { %v1168_v29 = vmul.f32 0.5, %v1167_v24  ;;  %v1030_v22 = vpop.xlane.xlu0 %1029 }
 0x2a1   :  { %v1253_v32 = vmul.f32 %v2359_v6, %v1234_v47  ;;  %v1218_v33 = vmul.f32 0.5, %v1217_v18  ;;  %v1047_v34 = vmul.f32 %v1030_v22, %v2257_v59  ;;  %v1673_v47 = vld [vmem:[%s2540_s1 + $0x70] sm:$0xff] }
 0x2a2   :  { %v1169_v46 = vsub.f32 1.5, %v1168_v29 }
 0x2a3   :  { %v1653_v43 = vpop.eup %1652  ;;  %v1272_v11 = vadd.f32 %v2364_v21, %v1253_v32  ;;  %v1219_v10 = vsub.f32 1.5, %v1218_v33  ;;  %v1063_v12 = vadd.f32 1e-05, %v1047_v34 }
 0x2a4   :  { %v1655_v37 = vpop.eup %1654  ;;  %v1170_v57 = vmul.f32 %v1649_v13, %v1169_v46  ;;  %v1196_v35 = vmul.f32 %v1653_v43, %v2465_v4  ;;  %vm1202_vm8 = vweird.f32 %v1653_v43 }
 0x2a5   :  { %v1288_v36 = vadd.f32 %v1668_v26, %v1272_v11  ;;  %v1220_v59 = vmul.f32 %v1651_v50, %v1219_v10  ;;  %v1176_v30 = vmul.f32 %v1655_v37, %v2467_v14  ;;  %1656 = vrsqrt.f32 %v1063_v12  ;;  %vm1203_vm11 = vmor %vm1201_vm10, %vm1202_vm8 }
 0x2a6   :  { %v1174_v39 = vsel %vm1173_vm5, %v1649_v13, %v1170_v57  ;;  %v1197_v49 = vmul.f32 %v1653_v43, %v1196_v35  ;;  %vm1182_vm9 = vweird.f32 %v1655_v37  ;;  %vm1211_vm15 = vweird.f32 %v1063_v12 }
 0x2a7   :  { %1304 = vst [vmem:[%s2546_s8 + $0x48] sm:$0xff] %v1288_v36  ;;  %v1235_v51 = vmul.f32 %v1174_v39, %v2326_v40  ;;  %v1224_v42 = vsel %vm1223_vm7, %v1651_v50, %v1220_v59  ;;  %v1177_v41 = vmul.f32 %v1655_v37, %v1176_v30  ;;  %vm1183_vm13 = vmor %vm1181_vm12, %vm1182_vm9 }
 0x2a8   :  { %v1240_v31 = vmul.f32 %v1224_v42, %v2329_v44  ;;  %v1198_v45 = vmul.f32 0.5, %v1197_v49  ;;  %v1669_v44 = vld [vmem:[%s2540_s1 + $0x50] sm:$0xff] }
 0x2a9   :  { %v1254_v60 = vmul.f32 %v2359_v6, %v1235_v51  ;;  %v1178_v28 = vmul.f32 0.5, %v1177_v41 }
 0x2aa   :  { %v1259_v0 = vmul.f32 %v2359_v6, %v1240_v31  ;;  %v1199_v48 = vsub.f32 1.5, %v1198_v45 }
 0x2ab   :  { %v1273_v38 = vadd.f32 %v2364_v21, %v1254_v60  ;;  %v1179_v62 = vsub.f32 1.5, %v1178_v28  ;;  %v1657_v25 = vpop.eup %1656 }
 0x2ac   :  { %v1278_v63 = vadd.f32 %v2364_v21, %v1259_v0  ;;  %v1200_v40 = vmul.f32 %v1653_v43, %v1199_v48  ;;  %v1206_v15 = vmul.f32 %v1657_v25, %v1063_v12  ;;  %vm1212_vm14 = vweird.f32 %v1657_v25 }
 0x2ad   :  { %v1289_v1 = vadd.f32 %v1669_v44, %v1273_v38  ;;  %v1180_v2 = vmul.f32 %v1655_v37, %v1179_v62  ;;  %vm1213_vm0 = vmor %vm1211_vm15, %vm1212_vm14 }
 0x2ae   :  { %v1294_v55 = vadd.f32 %v1670_v56, %v1278_v63  ;;  %v1204_v3 = vsel %vm1203_vm11, %v1653_v43, %v1200_v40  ;;  %v1207_v52 = vmul.f32 %v1657_v25, %v1206_v15 }
 0x2af   :  { %1305 = vst [vmem:[%s2546_s8 + $0x50] sm:$0xff] %v1289_v1  ;;  %v1238_v8 = vmul.f32 %v1204_v3, %v2337_v53  ;;  %v1184_v27 = vsel %vm1183_vm13, %v1655_v37, %v1180_v2  ;;  %v1671_v53 = vld [vmem:[%s2540_s1 + $0x68] sm:$0xff] }
 0x2b0   :  { %1310 = vst [vmem:[%s2546_s8 + $0x78] sm:$0xff] %v1294_v55  ;;  %v1236_v9 = vmul.f32 %v1184_v27, %v2341_v54  ;;  %v1208_v13 = vmul.f32 0.5, %v1207_v52  ;;  %v1672_v54 = vld [vmem:[%s2540_s1 + $0x58] sm:$0xff] }
 0x2b1   :  { %v1257_v5 = vmul.f32 %v2359_v6, %v1238_v8 }
 0x2b2   :  { %v1255_v58 = vmul.f32 %v2359_v6, %v1236_v9  ;;  %v1209_v14 = vsub.f32 1.5, %v1208_v13 }
 0x2b3   :  { %v1276_v4 = vadd.f32 %v2364_v21, %v1257_v5 }
 0x2b4   :  { %v1274_v50 = vadd.f32 %v2364_v21, %v1255_v58  ;;  %v1210_v16 = vmul.f32 %v1657_v25, %v1209_v14 }
 0x2b5   :  { %v1292_v7 = vadd.f32 %v1671_v53, %v1276_v4 }
 0x2b6   :  { %v1290_v19 = vadd.f32 %v1672_v54, %v1274_v50  ;;  %v1214_v20 = vsel %vm1213_vm0, %v1657_v25, %v1210_v16 }
 0x2b7   :  { %1308 = vst [vmem:[%s2546_s8 + $0x68] sm:$0xff] %v1292_v7  ;;  %v1239_v23 = vmul.f32 %v1214_v20, %v2349_v61 }
 0x2b8   :  { %1306 = vst [vmem:[%s2546_s8 + $0x58] sm:$0xff] %v1290_v19 }
 0x2b9   :  { %v1258_v17 = vmul.f32 %v2359_v6, %v1239_v23 }
 0x2bb   :  { %v1277_v24 = vadd.f32 %v2364_v21, %v1258_v17 }
 0x2bd   :  { %v1293_v18 = vadd.f32 %v1673_v47, %v1277_v24 }
 0x2bf   :  { %1309 = vst [vmem:[%s2546_s8 + $0x70] sm:$0xff] %v1293_v18 }

// kernel: mesh_graph_decoder.2
= control target key start
LH: loop header
LB: loop body
LE: loop exit
PB: predicated region body
PF: predicated region fallthrough
CT: control target
= control target key end

     0   :  { %s5604_s2 = inlined_call_operand.vmem [shape: bf16[384,128], index: 2, kind: input, shape index: {}]   ;;  %s5605_s1 = inlined_call_operand.vmem [shape: bf16[1,256,384], index: 1, kind: input, shape index: {}]   ;;  %s5606_s3 = inlined_call_operand.vmem [shape: f32[1,128], index: 3, kind: input, shape index: {}]   ;;  %s5607_s4 = inlined_call_operand.vmem [shape: bf16[128,128], index: 4, kind: input, shape index: {}]   ;;  %s5608_s5 = inlined_call_operand.vmem [shape: f32[1,128], index: 5, kind: input, shape index: {}]   ;;  %s5609_s6 = inlined_call_operand.vmem [shape: f32[1,128], index: 6, kind: input, shape index: {}]   ;;  %s5610_s7 = inlined_call_operand.vmem [shape: f32[1,128], index: 7, kind: input, shape index: {}]   ;;  %s5611_s0 = inlined_call_operand.vmem [shape: s32[1,256], index: 0, kind: input, shape index: {}]   ;;  %s5612_s8 = inlined_call_operand.vmem [shape: f32[1,1,128,128], index: 8, kind: output, shape index: {}]  }
   0x1   :  { %v3186_v0 = vld [vmem:[%s5604_s2 + $0x38] sm:$0xff]  ;;  %v3185_v2 = vld [vmem:[%s5604_s2 + $0x30] sm:$0xff]  ;;  %v3184_v4 = vld [vmem:[%s5604_s2 + $0x28] sm:$0xff] }
   0x2   :  { %v3194_v1 = vld [vmem:[%s5604_s2 + $0x78] sm:$0xff]  ;;  %3211 = vmatpush.bf16.msra.mxu2 %v3186_v0  ;;  %v3193_v3 = vld [vmem:[%s5604_s2 + $0x70] sm:$0xff]  ;;  %609 = vmatpush.bf16.msra.mxu0 %v3186_v0  ;;  %v3192_v5 = vld [vmem:[%s5604_s2 + $0x68] sm:$0xff] }
   0x3   :  { %3219 = vmatpush.bf16.msra.mxu3 %v3194_v1  ;;  %698 = vmatpush.bf16.msra.mxu1 %v3194_v1  ;;  %v3183_v6 = vld [vmem:[%s5604_s2 + $0x20] sm:$0xff]  ;;  %v3182_v8 = vld [vmem:[%s5604_s2 + $0x18] sm:$0xff]  ;;  %v3181_v10 = vld [vmem:[%s5604_s2 + $0x10] sm:$0xff] }
   0x4   :  { %v3191_v7 = vld [vmem:[%s5604_s2 + $0x60] sm:$0xff]  ;;  %v3190_v9 = vld [vmem:[%s5604_s2 + $0x58] sm:$0xff]  ;;  %v3189_v11 = vld [vmem:[%s5604_s2 + $0x50] sm:$0xff] }
   0x5   :  { %v3180_v12 = vld [vmem:[%s5604_s2 + $0x8] sm:$0xff]  ;;  %v3179_v14 = vld [vmem:[%s5604_s2] sm:$0xff]  ;;  %v2863_v19 = vld [vmem:[%s5605_s1 + $0x12c] sm:$0xf0] }
   0x6   :  { %3212 = vmatpush.bf16.msra.mxu2 %v3185_v2  ;;  %610 = vmatpush.bf16.msra.mxu0 %v3185_v2  ;;  %v3188_v13 = vld [vmem:[%s5604_s2 + $0x48] sm:$0xff]  ;;  %v3187_v15 = vld [vmem:[%s5604_s2 + $0x40] sm:$0xff]  ;;  %v3202_v22 = vld [vmem:[%s5604_s2 + $0xb8] sm:$0xff] }
   0x7   :  { %3220 = vmatpush.bf16.msra.mxu3 %v3193_v3  ;;  %699 = vmatpush.bf16.msra.mxu1 %v3193_v3  ;;  %v2861_v16 = vld [vmem:[%s5605_s1 + $0x120] sm:$0xf]  ;;  %v3168_v17 = vld [vmem:[%s5605_s1 + $0x128] sm:$0xf0]  ;;  %v3167_v18 = vld [vmem:[%s5605_s1 + $0x124] sm:$0xf] }
   0x8   :  { %v2862_v20 = vor.u32 %v3168_v17, %v2861_v16  ;;  %v2866_v21 = vor.u32 %v3167_v18, %v2863_v19  ;;  %v3201_v23 = vld [vmem:[%s5604_s2 + $0xb0] sm:$0xff]  ;;  %v3200_v24 = vld [vmem:[%s5604_s2 + $0xa8] sm:$0xff]  ;;  %v2873_v25 = vld [vmem:[%s5605_s1 + $0x138] sm:$0xf] }
   0x9   :  { %v3171_v26 = vld [vmem:[%s5605_s1 + $0x140] sm:$0xf0]  ;;  %v3170_v27 = vld [vmem:[%s5605_s1 + $0x13c] sm:$0xf]  ;;  %v2875_v28 = vld [vmem:[%s5605_s1 + $0x144] sm:$0xf0] }
   0xa   :  { %3213 = vmatpush.bf16.msra.mxu2 %v3184_v4  ;;  %611 = vmatpush.bf16.msra.mxu0 %v3184_v4  ;;  %v3199_v29 = vld [vmem:[%s5604_s2 + $0xa0] sm:$0xff]  ;;  %v2874_v30 = vor.u32 %v3171_v26, %v2873_v25  ;;  %v2878_v31 = vor.u32 %v3170_v27, %v2875_v28  ;;  %v3198_v32 = vld [vmem:[%s5604_s2 + $0x98] sm:$0xff]  ;;  %v3197_v33 = vld [vmem:[%s5604_s2 + $0x90] sm:$0xff] }
   0xb   :  { %3221 = vmatpush.bf16.msra.mxu3 %v3192_v5  ;;  %700 = vmatpush.bf16.msra.mxu1 %v3192_v5  ;;  %v2717_v34 = vld [vmem:[%s5605_s1] sm:$0xf]  ;;  %v3132_v35 = vld [vmem:[%s5605_s1 + $0x8] sm:$0xf0]  ;;  %v3131_v36 = vld [vmem:[%s5605_s1 + $0x4] sm:$0xf] }
   0xc   :  { %v2719_v37 = vld [vmem:[%s5605_s1 + $0xc] sm:$0xf0]  ;;  %v2718_v38 = vor.u32 %v3132_v35, %v2717_v34  ;;  %v3196_v40 = vld [vmem:[%s5604_s2 + $0x88] sm:$0xff]  ;;  %v3174_v42 = vld [vmem:[%s5605_s1 + $0x158] sm:$0xf0] }
   0xd   :  { %v2722_v39 = vor.u32 %v3131_v36, %v2719_v37  ;;  %v2885_v41 = vld [vmem:[%s5605_s1 + $0x150] sm:$0xf]  ;;  %v3173_v43 = vld [vmem:[%s5605_s1 + $0x154] sm:$0xf]  ;;  %v2887_v44 = vld [vmem:[%s5605_s1 + $0x15c] sm:$0xf0] }
   0xe   :  { %3214 = vmatpush.bf16.msra.mxu2 %v3183_v6  ;;  %612 = vmatpush.bf16.msra.mxu0 %v3183_v6  ;;  %v3195_v45 = vld [vmem:[%s5604_s2 + $0x80] sm:$0xff]  ;;  %v2886_v46 = vor.u32 %v3174_v42, %v2885_v41  ;;  %v2890_v47 = vor.u32 %v3173_v43, %v2887_v44  ;;  %v2729_v48 = vld [vmem:[%s5605_s1 + $0x18] sm:$0xf]  ;;  %v3134_v50 = vld [vmem:[%s5605_s1 + $0x1c] sm:$0xf] }
   0xf   :  { %3222 = vmatpush.bf16.msra.mxu3 %v3191_v7  ;;  %701 = vmatpush.bf16.msra.mxu1 %v3191_v7  ;;  %v3135_v49 = vld [vmem:[%s5605_s1 + $0x20] sm:$0xf0]  ;;  %v2731_v52 = vld [vmem:[%s5605_s1 + $0x24] sm:$0xf0]  ;;  %v3177_v55 = vld [vmem:[%s5605_s1 + $0x170] sm:$0xf0] }
  0x10   :  { %v2730_v51 = vor.u32 %v3135_v49, %v2729_v48  ;;  %v2734_v53 = vor.u32 %v3134_v50, %v2731_v52  ;;  %v2897_v54 = vld [vmem:[%s5605_s1 + $0x168] sm:$0xf]  ;;  %v3176_v56 = vld [vmem:[%s5605_s1 + $0x16c] sm:$0xf]  ;;  %v2899_v57 = vld [vmem:[%s5605_s1 + $0x174] sm:$0xf0] }
  0x11   :  { %v2898_v58 = vor.u32 %v3177_v55, %v2897_v54  ;;  %v2902_v59 = vor.u32 %v3176_v56, %v2899_v57  ;;  %v2741_v60 = vld [vmem:[%s5605_s1 + $0x30] sm:$0xf]  ;;  %v3138_v61 = vld [vmem:[%s5605_s1 + $0x38] sm:$0xf0]  ;;  %v3137_v62 = vld [vmem:[%s5605_s1 + $0x34] sm:$0xf] }
  0x12   :  { %3215 = vmatpush.bf16.msra.mxu2 %v3182_v8  ;;  %613 = vmatpush.bf16.msra.mxu0 %v3182_v8  ;;  %v2742_v63 = vor.u32 %v3138_v61, %v2741_v60  ;;  %v2743_v0 = vld [vmem:[%s5605_s1 + $0x3c] sm:$0xf0]  ;;  %v2725_v2 = vld [vmem:[%s5605_s1 + $0x8] sm:$0xf]  ;;  %v3133_v3 = vld [vmem:[%s5605_s1 + $0x10] sm:$0xf0] }
  0x13   :  { %3223 = vmatpush.bf16.msra.mxu3 %v3190_v9  ;;  %702 = vmatpush.bf16.msra.mxu1 %v3190_v9  ;;  %v2746_v1 = vor.u32 %v3137_v62, %v2743_v0  ;;  %v2726_v4 = vor.u32 %v3133_v3, %v2725_v2  ;;  %v2753_v5 = vld [vmem:[%s5605_s1 + $0x48] sm:$0xf]  ;;  %v3141_v6 = vld [vmem:[%s5605_s1 + $0x50] sm:$0xf0]  ;;  %v3140_v7 = vld [vmem:[%s5605_s1 + $0x4c] sm:$0xf] }
  0x14   :  { %v2754_v8 = vor.u32 %v3141_v6, %v2753_v5  ;;  %v2755_v9 = vld [vmem:[%s5605_s1 + $0x54] sm:$0xf0]  ;;  %v3143_v16 = vld [vmem:[%s5605_s1 + $0x64] sm:$0xf]  ;;  %v2767_v18 = vld [vmem:[%s5605_s1 + $0x6c] sm:$0xf0] }
  0x15   :  { %v2770_v19 = vor.u32 %v3143_v16, %v2767_v18  ;;  %v2761_v26 = vld [vmem:[%s5605_s1 + $0x50] sm:$0xf]  ;;  %v3142_v27 = vld [vmem:[%s5605_s1 + $0x58] sm:$0xf0]  ;;  %v2773_v35 = vld [vmem:[%s5605_s1 + $0x68] sm:$0xf] }
  0x16   :  { %3216 = vmatpush.bf16.msra.mxu2 %v3181_v10  ;;  %614 = vmatpush.bf16.msra.mxu0 %v3181_v10  ;;  %v2758_v10 = vor.u32 %v3140_v7, %v2755_v9  ;;  %v3146_v28 = vld [vmem:[%s5605_s1 + $0x7c] sm:$0xf]  ;;  %v3145_v36 = vld [vmem:[%s5605_s1 + $0x70] sm:$0xf0]  ;;  %v3714_v41 = vld [vmem:[%s5606_s3] ss:$0 sm:$0xff] }
  0x17   :  { %3224 = vmatpush.bf16.msra.mxu3 %v3189_v11  ;;  %703 = vmatpush.bf16.msra.mxu1 %v3189_v11  ;;  %v2737_v11 = vld [vmem:[%s5605_s1 + $0x20] sm:$0xf]  ;;  %v3149_v37 = vld [vmem:[%s5605_s1 + $0x94] sm:$0xf]  ;;  %v3148_v50 = vld [vmem:[%s5605_s1 + $0x88] sm:$0xf0] }
  0x18   :  { %v2785_v49 = vld [vmem:[%s5605_s1 + $0x80] sm:$0xf]  ;;  %v2803_v52 = vld [vmem:[%s5605_s1 + $0xb4] sm:$0xf0]  ;;  %v3156_v0 = vld [vmem:[%s5605_s1 + $0xc8] sm:$0xf0] }
  0x19   :  { %v2786_v56 = vor.u32 %v3148_v50, %v2785_v49  ;;  %v2797_v2 = vld [vmem:[%s5605_s1 + $0x98] sm:$0xf]  ;;  %v3151_v3 = vld [vmem:[%s5605_s1 + $0xa0] sm:$0xf0]  ;;  %v2815_v5 = vld [vmem:[%s5605_s1 + $0xcc] sm:$0xf0] }
  0x1a   :  { %3217 = vmatpush.bf16.msra.mxu2 %v3180_v12  ;;  %615 = vmatpush.bf16.msra.mxu0 %v3180_v12  ;;  %v3136_v12 = vld [vmem:[%s5605_s1 + $0x28] sm:$0xf0]  ;;  %v2798_v9 = vor.u32 %v3151_v3, %v2797_v2  ;;  %v3159_v18 = vld [vmem:[%s5605_s1 + $0xe0] sm:$0xf0]  ;;  %v2839_v49 = vld [vmem:[%s5605_s1 + $0xfc] sm:$0xf0] }
  0x1b   :  { %3225 = vmatpush.bf16.msra.mxu3 %v3188_v13  ;;  %704 = vmatpush.bf16.msra.mxu1 %v3188_v13  ;;  %v2738_v13 = vor.u32 %v3136_v12, %v2737_v11 }
  0x1e   :  { %3218 = vmatpush.bf16.msra.mxu2 %v3179_v14  ;;  %616 = vmatpush.bf16.msra.mxu0 %v3179_v14  ;;  %v2765_v14 = vld [vmem:[%s5605_s1 + $0x60] sm:$0xf] }
  0x1f   :  { %3226 = vmatpush.bf16.msra.mxu3 %v3187_v15  ;;  %705 = vmatpush.bf16.msra.mxu1 %v3187_v15  ;;  %v3144_v15 = vld [vmem:[%s5605_s1 + $0x68] sm:$0xf0] }
  0x20   :  { %v2766_v17 = vor.u32 %v3144_v15, %v2765_v14 }
  0x21   :  { %677 = vmatmul.bf16.vlgmr.msra.gmra.mxu2 %v2862_v20  ;;  %617 = vmatmul.bf16.vlgmr.msra.gmra.mxu0 %v2718_v38  ;;  %v2749_v20 = vld [vmem:[%s5605_s1 + $0x38] sm:$0xf]  ;;  %v2791_v38 = vld [vmem:[%s5605_s1 + $0x9c] sm:$0xf0] }
  0x22   :  { %766 = vmatmul.bf16.vlgmr.msra.gmra.mxu3 %v2866_v21  ;;  %787 = vmatpush.bf16.msrb.mxu2 %v3202_v22  ;;  %v3139_v21 = vld [vmem:[%s5605_s1 + $0x40] sm:$0xf0] }
  0x23   :  { %706 = vmatmul.bf16.vlgmr.msra.gmra.mxu1 %v2722_v39  ;;  %v2750_v22 = vor.u32 %v3139_v21, %v2749_v20  ;;  %v2794_v39 = vor.u32 %v3149_v37, %v2791_v38  ;;  %v3154_v21 = vld [vmem:[%s5605_s1 + $0xb8] sm:$0xf0]  ;;  %v3208_v37 = vld [vmem:[%s5607_s4 + $0x28] sm:$0xff] }
  0x26   :  { %788 = vmatpush.bf16.msrb.mxu2 %v3201_v23  ;;  %v2777_v23 = vld [vmem:[%s5605_s1 + $0x78] sm:$0xf] }
  0x2a   :  { %789 = vmatpush.bf16.msrb.mxu2 %v3200_v24  ;;  %v3147_v24 = vld [vmem:[%s5605_s1 + $0x80] sm:$0xf0] }
  0x2b   :  { %v2778_v25 = vor.u32 %v3147_v24, %v2777_v23  ;;  %v3158_v23 = vld [vmem:[%s5605_s1 + $0xdc] sm:$0xf]  ;;  %v2827_v24 = vld [vmem:[%s5605_s1 + $0xe4] sm:$0xf0] }
  0x2e   :  { %790 = vmatpush.bf16.msrb.mxu2 %v3199_v29  ;;  %v2779_v29 = vld [vmem:[%s5605_s1 + $0x84] sm:$0xf0] }
  0x31   :  { %682 = vmatmul.bf16.gmra.mxu2 %v2874_v30  ;;  %622 = vmatmul.bf16.gmra.mxu0 %v2730_v51  ;;  %v2782_v30 = vor.u32 %v3146_v28, %v2779_v29  ;;  %v3152_v51 = vld [vmem:[%s5605_s1 + $0xac] sm:$0xf]  ;;  %v3210_v29 = vld [vmem:[%s5607_s4 + $0x38] sm:$0xff] }
  0x32   :  { %771 = vmatmul.bf16.gmra.mxu3 %v2878_v31  ;;  %791 = vmatpush.bf16.msrb.mxu2 %v3198_v32  ;;  %v2762_v31 = vor.u32 %v3142_v27, %v2761_v26  ;;  %v2789_v32 = vld [vmem:[%s5605_s1 + $0x90] sm:$0xf] }
  0x33   :  { %711 = vmatmul.bf16.gmra.mxu1 %v2734_v53  ;;  %v2806_v53 = vor.u32 %v3152_v51, %v2803_v52  ;;  %1600 = vmatpush.bf16.msrb.mxu3 %v3210_v29 }
  0x36   :  { %792 = vmatpush.bf16.msrb.mxu2 %v3197_v33  ;;  %v3150_v33 = vld [vmem:[%s5605_s1 + $0x98] sm:$0xf0] }
  0x37   :  { %v2790_v34 = vor.u32 %v3150_v33, %v2789_v32  ;;  %v3209_v32 = vld [vmem:[%s5607_s4 + $0x30] sm:$0xff] }
  0x38   :  { %1601 = vmatpush.bf16.msrb.mxu3 %v3209_v32 }
  0x3a   :  { %793 = vmatpush.bf16.msrb.mxu2 %v3196_v40  ;;  %v2774_v40 = vor.u32 %v3145_v36, %v2773_v35 }
  0x3c   :  { %1602 = vmatpush.bf16.msrb.mxu3 %v3208_v37 }
  0x3e   :  { %794 = vmatpush.bf16.msrb.mxu2 %v3195_v45 }
  0x41   :  { %687 = vmatmul.bf16.gmra.mxu2 %v2886_v46  ;;  %627 = vmatmul.bf16.gmra.mxu0 %v2742_v63  ;;  %v2801_v46 = vld [vmem:[%s5605_s1 + $0xa8] sm:$0xf]  ;;  %v2813_v63 = vld [vmem:[%s5605_s1 + $0xc0] sm:$0xf] }
  0x42   :  { %776 = vmatmul.bf16.gmra.mxu3 %v2890_v47  ;;  %v3153_v47 = vld [vmem:[%s5605_s1 + $0xb0] sm:$0xf0] }
  0x43   :  { %716 = vmatmul.bf16.gmra.mxu1 %v2746_v1  ;;  %v2802_v48 = vor.u32 %v3153_v47, %v2801_v46  ;;  %v2814_v1 = vor.u32 %v3156_v0, %v2813_v63  ;;  %v3207_v47 = vld [vmem:[%s5607_s4 + $0x20] sm:$0xff]  ;;  %v3205_v63 = vld [vmem:[%s5607_s4 + $0x10] sm:$0xff] }
  0x44   :  { %1603 = vmatpush.bf16.msrb.mxu3 %v3207_v47 }
  0x51   :  { %692 = vmatmul.bf16.gmra.mxu2 %v2898_v58  ;;  %632 = vmatmul.bf16.gmra.mxu0 %v2754_v8 }
  0x52   :  { %781 = vmatmul.bf16.gmra.mxu3 %v2902_v59 }
  0x53   :  { %721 = vmatmul.bf16.gmra.mxu1 %v2758_v10 }
  0x61   :  { %795 = vmatmul.bf16.vlgmr.msrb.gmra.mxu2 %v2726_v4  ;;  %637 = vmatmul.bf16.gmra.mxu0 %v2766_v17  ;;  %v3155_v4 = vld [vmem:[%s5605_s1 + $0xc4] sm:$0xf]  ;;  %v2825_v17 = vld [vmem:[%s5605_s1 + $0xd8] sm:$0xf] }
  0x62   :  { %v2818_v6 = vor.u32 %v3155_v4, %v2815_v5  ;;  %v2826_v20 = vor.u32 %v3159_v18, %v2825_v17  ;;  %v2849_v4 = vld [vmem:[%s5605_s1 + $0x108] sm:$0xf]  ;;  %v3165_v5 = vld [vmem:[%s5605_s1 + $0x110] sm:$0xf0]  ;;  %v2851_v17 = vld [vmem:[%s5605_s1 + $0x114] sm:$0xf0] }
  0x63   :  { %726 = vmatmul.bf16.gmra.mxu1 %v2770_v19  ;;  %v2809_v19 = vld [vmem:[%s5605_s1 + $0xb0] sm:$0xf] }
  0x64   :  { %v2810_v28 = vor.u32 %v3154_v21, %v2809_v19 }
  0x71   :  { %800 = vmatmul.bf16.gmra.mxu2 %v2738_v13  ;;  %642 = vmatmul.bf16.gmra.mxu0 %v2778_v25  ;;  %v2830_v25 = vor.u32 %v3158_v23, %v2827_v24 }
  0x73   :  { %731 = vmatmul.bf16.gmra.mxu1 %v2782_v30 }
  0x81   :  { %805 = vmatmul.bf16.gmra.mxu2 %v2750_v22  ;;  %647 = vmatmul.bf16.gmra.mxu0 %v2790_v34 }
  0x83   :  { %736 = vmatmul.bf16.gmra.mxu1 %v2794_v39  ;;  %v2837_v39 = vld [vmem:[%s5605_s1 + $0xf0] sm:$0xf] }
  0x91   :  { %810 = vmatmul.bf16.gmra.mxu2 %v2762_v31  ;;  %652 = vmatmul.bf16.gmra.mxu0 %v2802_v48  ;;  %v3161_v48 = vld [vmem:[%s5605_s1 + $0xf4] sm:$0xf] }
  0x92   :  { %v2842_v51 = vor.u32 %v3161_v48, %v2839_v49 }
  0x93   :  { %741 = vmatmul.bf16.gmra.mxu1 %v2806_v53 }
  0x9e   :  { %v3744_v61 = vpop.f32.mrf.mxu0 }
  0x9f   :  { %v619_v52 = vadd.f32 %v3714_v41, %v3744_v61 }
  0xa0   :  { %v3746_v62 = vpop.f32.mrf.mxu1 }
  0xa1   :  { %815 = vmatmul.bf16.gmra.mxu2 %v2774_v40  ;;  %657 = vmatmul.bf16.gmra.mxu0 %v2814_v1  ;;  %v3162_v40 = vld [vmem:[%s5605_s1 + $0xf8] sm:$0xf0] }
  0xa3   :  { %746 = vmatmul.bf16.gmra.mxu1 %v2818_v6  ;;  %v2833_v6 = vld [vmem:[%s5605_s1 + $0xe0] sm:$0xf] }
  0xa4   :  { %v678_v42 = vpop.f32.mrf.mxu2 }
  0xa5   :  { %v767_v43 = vpop.f32.mrf.mxu3  ;;  %v679_v44 = vadd.f32 %v3714_v41, %v678_v42  ;;  %v2821_v42 = vld [vmem:[%s5605_s1 + $0xc8] sm:$0xf] }
  0xa6   :  { %v3770_v10 = vpop.f32.mrf.mxu0 }
  0xa7   :  { %v3717_v45 = vadd.f32 %v767_v43, %v679_v44  ;;  %v3157_v43 = vld [vmem:[%s5605_s1 + $0xd0] sm:$0xf0]  ;;  %v2838_v44 = vor.u32 %v3162_v40, %v2837_v39  ;;  %v621_v1 = vadd.f32 %v3714_v41, %v3770_v10  ;;  %v2850_v10 = vor.u32 %v3165_v5, %v2849_v4 }
  0xa8   :  { %v3772_v11 = vpop.f32.mrf.mxu1  ;;  %v2822_v53 = vor.u32 %v3157_v43, %v2821_v42 }
  0xac   :  { %v3737_v54 = vpop.f32.mrf.mxu2 }
  0xad   :  { %v3739_v55 = vpop.f32.mrf.mxu3 }
  0xae   :  { %v3777_v16 = vpop.f32.mrf.mxu0 }
  0xb0   :  { %v3791_v22 = vpop.f32.mrf.mxu1 }
  0xb1   :  { %820 = vmatmul.bf16.gmra.mxu2 %v2786_v56  ;;  %662 = vmatmul.bf16.gmra.mxu0 %v2826_v20  ;;  %v3206_v56 = vld [vmem:[%s5607_s4 + $0x18] sm:$0xff]  ;;  %v624_v20 = vadd.f32 %v3714_v41, %v3777_v16 }
  0xb2   :  { %1604 = vmatpush.bf16.msrb.mxu3 %v3206_v56 }
  0xb3   :  { %751 = vmatmul.bf16.gmra.mxu1 %v2830_v25  ;;  %v713_v29 = vadd.f32 %v3791_v22, %v624_v20  ;;  %v2845_v22 = vld [vmem:[%s5605_s1 + $0xf8] sm:$0xf] }
  0xb4   :  { %v683_v57 = vpop.f32.mrf.mxu2 }
  0xb5   :  { %v772_v58 = vpop.f32.mrf.mxu3  ;;  %v684_v59 = vadd.f32 %v3714_v41, %v683_v57  ;;  %v708_v57 = vadd.f32 %v3746_v62, %v619_v52  ;;  %v3204_v62 = vld [vmem:[%s5607_s4 + $0x8] sm:$0xff] }
  0xb6   :  { %v3806_v30 = vpop.f32.mrf.mxu0  ;;  %1605 = vmatpush.bf16.msrb.mxu3 %v3205_v63 }
  0xb7   :  { %v3742_v60 = vadd.f32 %v772_v58, %v684_v59 }
  0xb8   :  { %v3808_v31 = vpop.f32.mrf.mxu1 }
  0xba   :  { %1606 = vmatpush.bf16.msrb.mxu3 %v3204_v62 }
  0xbc   :  { %v3766_v7 = vpop.f32.mrf.mxu2 }
  0xbd   :  { %v3768_v8 = vpop.f32.mrf.mxu3 }
  0xbe   :  { %v3819_v38 = vpop.f32.mrf.mxu0 }
  0xbf   :  { %v629_v48 = vadd.f32 %v3714_v41, %v3819_v38 }
  0xc0   :  { %v3833_v46 = vpop.f32.mrf.mxu1 }
  0xc1   :  { %825 = vmatmul.bf16.gmra.mxu2 %v2798_v9  ;;  %667 = vmatmul.bf16.gmra.mxu0 %v2838_v44  ;;  %v3160_v9 = vld [vmem:[%s5605_s1 + $0xe8] sm:$0xf0]  ;;  %v3163_v44 = vld [vmem:[%s5605_s1 + $0x100] sm:$0xf0] }
  0xc3   :  { %756 = vmatmul.bf16.gmra.mxu1 %v2842_v51 }
  0xc4   :  { %v688_v12 = vpop.f32.mrf.mxu2 }
  0xc5   :  { %v777_v13 = vpop.f32.mrf.mxu3  ;;  %v689_v14 = vadd.f32 %v3714_v41, %v688_v12  ;;  %v710_v12 = vadd.f32 %v3772_v11, %v621_v1  ;;  %v2834_v11 = vor.u32 %v3160_v9, %v2833_v6 }
  0xc6   :  { %v3852_v58 = vpop.f32.mrf.mxu0 }
  0xc7   :  { %v3775_v15 = vadd.f32 %v777_v13, %v689_v14  ;;  %v3203_v13 = vld [vmem:[%s5607_s4] sm:$0xff]  ;;  %v3164_v14 = vld [vmem:[%s5605_s1 + $0x10c] sm:$0xf] }
  0xc8   :  { %v3854_v59 = vpop.f32.mrf.mxu1  ;;  %v2854_v19 = vor.u32 %v3164_v14, %v2851_v17  ;;  %1607 = vmatpush.bf16.msrb.mxu3 %v3203_v13 }
  0xcc   :  { %v3799_v26 = vpop.f32.mrf.mxu2 }
  0xcd   :  { %v3801_v27 = vpop.f32.mrf.mxu3 }
  0xce   :  { %v3867_v3 = vpop.f32.mrf.mxu0 }
  0xd0   :  { %v3895_v23 = vpop.f32.mrf.mxu1 }
  0xd1   :  { %830 = vmatmul.bf16.gmra.mxu2 %v2810_v28  ;;  %672 = vmatmul.bf16.gmra.mxu0 %v2850_v10 }
  0xd3   :  { %761 = vmatmul.bf16.gmra.mxu1 %v2854_v19  ;;  %v631_v19 = vadd.f32 %v3714_v41, %v3852_v58 }
  0xd4   :  { %v693_v33 = vpop.f32.mrf.mxu2 }
  0xd5   :  { %v782_v34 = vpop.f32.mrf.mxu3  ;;  %v694_v35 = vadd.f32 %v3714_v41, %v693_v33 }
  0xd6   :  { %v3899_v32 = vpop.f32.mrf.mxu0 }
  0xd7   :  { %v3814_v36 = vadd.f32 %v782_v34, %v694_v35  ;;  %v626_v35 = vadd.f32 %v3714_v41, %v3806_v30 }
  0xd8   :  { %v3906_v39 = vpop.f32.mrf.mxu1 }
  0xd9   :  { %v715_v30 = vadd.f32 %v3808_v31, %v626_v35 }
  0xdc   :  { %v3844_v50 = vpop.f32.mrf.mxu2 }
  0xde   :  { %v3919_v56 = vpop.f32.mrf.mxu0 }
  0xe0   :  { %v3925_v38 = vpop.f32.mrf.mxu1 }
  0xe1   :  { %835 = vmatmul.bf16.gmra.mxu2 %v2822_v53  ;;  %v2846_v53 = vor.u32 %v3163_v44, %v2845_v22 }
  0xe4   :  { %v796_v61 = vpop.f32.mrf.mxu2 }
  0xe5   :  { %v3859_v0 = vadd.f32 %v796_v61, %v708_v57 }
  0xe7   :  { %v3003_v2 = vmul.f32 -1.442695, %v3859_v0 }
  0xe9   :  { %3234 = vpow2.f32 %v3003_v2  ;;  %v718_v2 = vadd.f32 %v3833_v46, %v629_v48  ;;  %v634_v48 = vadd.f32 %v3714_v41, %v3867_v3 }
  0xec   :  { %v798_v18 = vpop.f32.mrf.mxu2 }
  0xed   :  { %v3893_v21 = vadd.f32 %v798_v18, %v710_v12 }
  0xef   :  { %v3235_v24 = vpop.eup %3234  ;;  %v3004_v25 = vmul.f32 -1.442695, %v3893_v21 }
  0xf0   :  { %v972_v28 = vadd.f32 1.0, %v3235_v24 }
  0xf1   :  { %3236 = vpow2.f32 %v3004_v25  ;;  %840 = vmatmul.bf16.gmra.mxu2 %v2834_v11  ;;  %v3939_v25 = vpop.f32.mrf.mxu0 }
  0xf2   :  { %3238 = vrcp.f32 %v972_v28  ;;  %v1015_v4 = vand.u32 2147483648, %v972_v28  ;;  %vm1009_vm1 = vweird.f32 %v972_v28  ;;  %v1013_v5 = vand.u32 2147483647, %v972_v28 }
  0xf4   :  { %v801_v33 = vpop.f32.mrf.mxu2  ;;  %v1016_v18 = vor.u32 1.1754944e-38, %v1015_v4  ;;  %vm1014_vm4 = vcmp.eq.f32.partialorder %v1013_v5, 8.507059e+37 }
  0xf5   :  { %v3901_v16 = vadd.f32 %v801_v33, %v713_v29 }
  0xf7   :  { %v3237_v34 = vpop.eup %3236  ;;  %v3005_v37 = vmul.f32 -1.442695, %v3901_v16 }
  0xf8   :  { %v3239_v40 = vpop.eup %3238  ;;  %v973_v42 = vadd.f32 1.0, %v3237_v34 }
  0xf9   :  { %v1005_v43 = vmul.f32 %v3239_v40, %v972_v28  ;;  %3240 = vpow2.f32 %v3005_v37  ;;  %vm1010_vm0 = vweird.f32 %v3239_v40 }
  0xfa   :  { %3242 = vrcp.f32 %v973_v42  ;;  %vm3928_vm2 = vmor %vm1009_vm1, %vm1010_vm0  ;;  %v1028_v10 = vand.u32 2147483647, %v973_v42  ;;  %v1030_v12 = vand.u32 2147483648, %v973_v42  ;;  %vm1024_vm5 = vweird.f32 %v973_v42 }
  0xfb   :  { %v1006_v47 = vsub.f32 1.0, %v1005_v43 }
  0xfc   :  { %v803_v49 = vpop.f32.mrf.mxu2  ;;  %v1031_v33 = vor.u32 1.1754944e-38, %v1030_v12  ;;  %vm1029_vm7 = vcmp.eq.f32.partialorder %v1028_v10, 8.507059e+37 }
  0xfd   :  { %v1007_v51 = vmul.f32 %v3239_v40, %v1006_v47  ;;  %v3917_v52 = vadd.f32 %v803_v49, %v715_v30  ;;  %v720_v47 = vadd.f32 %v3854_v59, %v631_v19  ;;  %v3954_v30 = vpop.f32.mrf.mxu1  ;;  %v723_v59 = vadd.f32 %v3895_v23, %v634_v48 }
  0xfe   :  { %v636_v19 = vadd.f32 %v3714_v41, %v3899_v32  ;;  %v639_v48 = vadd.f32 %v3714_v41, %v3919_v56 }
  0xff   :  { %v3241_v57 = vpop.eup %3240  ;;  %v3006_v63 = vmul.f32 -1.442695, %v3917_v52  ;;  %v1008_v62 = vadd.f32 %v3239_v40, %v1007_v51 }
 0x100   :  { %v3243_v61 = vpop.eup %3242  ;;  %v3922_v1 = vadd.f32 1.0, %v3241_v57 }
 0x101   :  { %v1020_v31 = vmul.f32 %v3243_v61, %v973_v42  ;;  %3244 = vpow2.f32 %v3006_v63  ;;  %845 = vmatmul.bf16.gmra.mxu2 %v2846_v53  ;;  %v1012_v13 = vsel %vm3928_vm2, %v3239_v40, %v1008_v62  ;;  %vm1025_vm3 = vweird.f32 %v3243_v61  ;;  %v2857_v40 = vld [vmem:[%s5605_s1 + $0x110] sm:$0xf]  ;;  %v3166_v42 = vld [vmem:[%s5605_s1 + $0x118] sm:$0xf0] }
 0x102   :  { %3246 = vrcp.f32 %v3922_v1  ;;  %v1017_v29 = vsel %vm1014_vm4, %v1016_v18, %v1012_v13  ;;  %vm1026_vm6 = vmor %vm1024_vm5, %vm1025_vm3  ;;  %v2858_v63 = vor.u32 %v3166_v42, %v2857_v40  ;;  %v1045_v4 = vand.u32 2147483648, %v3922_v1  ;;  %v2869_v40 = vld [vmem:[%s5605_s1 + $0x128] sm:$0xf] }
 0x103   :  { %v1021_v6 = vsub.f32 1.0, %v1020_v31  ;;  %v1484_v43 = vmul.f32 %v1017_v29, %v3859_v0  ;;  %v3965_v31 = vpop.f32.mrf.mxu0  ;;  %vm1039_vm9 = vweird.f32 %v3922_v1  ;;  %v1043_v5 = vand.u32 2147483647, %v3922_v1 }
 0x104   :  { %v806_v46 = vpop.f32.mrf.mxu2 }
 0x105   :  { %v1022_v14 = vmul.f32 %v3243_v61, %v1021_v6  ;;  %v3934_v17 = vadd.f32 %v806_v46, %v718_v2  ;;  %v3981_v18 = vpop.f32.mrf.mxu1  ;;  %vm1044_vm12 = vcmp.eq.f32.partialorder %v1043_v5, 8.507059e+37 }
 0x107   :  { %v3245_v20 = vpop.eup %3244  ;;  %v1023_v11 = vadd.f32 %v3243_v61, %v1022_v14  ;;  %v3007_v24 = vmul.f32 -1.442695, %v3934_v17 }
 0x108   :  { %v3247_v28 = vpop.eup %3246  ;;  %v3941_v34 = vadd.f32 1.0, %v3245_v20 }
 0x109   :  { %v1027_v35 = vsel %vm1026_vm6, %v3243_v61, %v1023_v11  ;;  %v1035_v37 = vmul.f32 %v3247_v28, %v3922_v1  ;;  %3248 = vpow2.f32 %v3007_v24  ;;  %vm1040_vm8 = vweird.f32 %v3247_v28 }
 0x10a   :  { %v1032_v58 = vsel %vm1029_vm7, %v1031_v33, %v1027_v35  ;;  %3250 = vrcp.f32 %v3941_v34  ;;  %vm3971_vm10 = vmor %vm1039_vm9, %vm1040_vm8  ;;  %v1058_v10 = vand.u32 2147483647, %v3941_v34  ;;  %v1060_v12 = vand.u32 2147483648, %v3941_v34 }
 0x10b   :  { %v1485_v22 = vmul.f32 %v1032_v58, %v3893_v21  ;;  %v1036_v44 = vsub.f32 1.0, %v1035_v37  ;;  %v1046_v1 = vor.u32 1.1754944e-38, %v1045_v4  ;;  %vm1054_vm13 = vweird.f32 %v3941_v34 }
 0x10c   :  { %v808_v49 = vpop.f32.mrf.mxu2  ;;  %v1061_v35 = vor.u32 1.1754944e-38, %v1060_v12  ;;  %vm1059_vm15 = vcmp.eq.f32.partialorder %v1058_v10, 8.507059e+37 }
 0x10d   :  { %v1037_v51 = vmul.f32 %v3247_v28, %v1036_v44  ;;  %v3958_v53 = vadd.f32 %v808_v49, %v720_v47  ;;  %v1516_v57 = vpack.c.bf16 %v1485_v22, %v1484_v43  ;;  %v725_v22 = vadd.f32 %v3906_v39, %v636_v19  ;;  %v4000_v47 = vpop.f32.mrf.mxu0 }
 0x10f   :  { %v3249_v61 = vpop.eup %3248  ;;  %v3008_v2 = vmul.f32 -1.442695, %v3958_v53  ;;  %1608 = vmatmul.bf16.vlgmr.msrb.gmra.mxu3 %v1516_v57  ;;  %v1038_v62 = vadd.f32 %v3247_v28, %v1037_v51 }
 0x110   :  { %v3251_v0 = vpop.eup %3250  ;;  %v3961_v21 = vadd.f32 1.0, %v3249_v61 }
 0x111   :  { %3252 = vpow2.f32 %v3008_v2  ;;  %850 = vmatmul.bf16.gmra.mxu2 %v2858_v63  ;;  %v1050_v3 = vmul.f32 %v3251_v0, %v3941_v34  ;;  %v1042_v46 = vsel %vm3971_vm10, %v3247_v28, %v1038_v62  ;;  %vm1055_vm11 = vweird.f32 %v3251_v0  ;;  %v3169_v34 = vld [vmem:[%s5605_s1 + $0x130] sm:$0xf0] }
 0x112   :  { %3254 = vrcp.f32 %v3961_v21  ;;  %v1047_v33 = vsel %vm1044_vm12, %v1046_v1, %v1042_v46  ;;  %vm1056_vm14 = vmor %vm1054_vm13, %vm1055_vm11  ;;  %v2870_v61 = vor.u32 %v3169_v34, %v2869_v40  ;;  %vm1069_vm1 = vweird.f32 %v3961_v21  ;;  %v3172_v40 = vld [vmem:[%s5605_s1 + $0x148] sm:$0xf0] }
 0x113   :  { %v1051_v6 = vsub.f32 1.0, %v1050_v3  ;;  %v1486_v42 = vmul.f32 %v1047_v33, %v3901_v16  ;;  %v4007_v16 = vpop.f32.mrf.mxu1  ;;  %v1075_v3 = vand.u32 2147483648, %v3961_v21  ;;  %v1073_v4 = vand.u32 2147483647, %v3961_v21 }
 0x114   :  { %v811_v23 = vpop.f32.mrf.mxu2  ;;  %v641_v1 = vadd.f32 %v3714_v41, %v3939_v25 }
 0x115   :  { %v3979_v13 = vadd.f32 %v811_v23, %v723_v59  ;;  %v1052_v14 = vmul.f32 %v3251_v0, %v1051_v6  ;;  %vm1074_vm4 = vcmp.eq.f32.partialorder %v1073_v4, 8.507059e+37 }
 0x117   :  { %v3253_v20 = vpop.eup %3252  ;;  %v3009_v11 = vmul.f32 -1.442695, %v3979_v13  ;;  %v1053_v24 = vadd.f32 %v3251_v0, %v1052_v14  ;;  %v4027_v14 = vpop.f32.mrf.mxu0 }
 0x118   :  { %v3255_v29 = vpop.eup %3254  ;;  %v3987_v28 = vadd.f32 1.0, %v3253_v20 }
 0x119   :  { %v1065_v37 = vmul.f32 %v3255_v29, %v3961_v21  ;;  %3256 = vpow2.f32 %v3009_v11  ;;  %v1057_v58 = vsel %vm1056_vm14, %v3251_v0, %v1053_v24  ;;  %vm1070_vm0 = vweird.f32 %v3255_v29 }
 0x11a   :  { %3258 = vrcp.f32 %v3987_v28  ;;  %v1062_v32 = vsel %vm1059_vm15, %v1061_v35, %v1057_v58  ;;  %vm4017_vm2 = vmor %vm1069_vm1, %vm1070_vm0  ;;  %v1088_v9 = vand.u32 2147483647, %v3987_v28  ;;  %v1090_v23 = vand.u32 2147483648, %v3987_v28 }
 0x11b   :  { %v1066_v43 = vsub.f32 1.0, %v1065_v37  ;;  %v1487_v44 = vmul.f32 %v1062_v32, %v3917_v52  ;;  %v728_v52 = vadd.f32 %v3925_v38, %v639_v48  ;;  %v1076_v21 = vor.u32 1.1754944e-38, %v1075_v3  ;;  %v4039_v25 = vpop.f32.mrf.mxu1 }
 0x11c   :  { %v813_v49 = vpop.f32.mrf.mxu2  ;;  %vm1084_vm5 = vweird.f32 %v3987_v28  ;;  %v1091_v35 = vor.u32 1.1754944e-38, %v1090_v23  ;;  %vm1089_vm7 = vcmp.eq.f32.partialorder %v1088_v9, 8.507059e+37  ;;  %v644_v48 = vadd.f32 %v3714_v41, %v3965_v31 }
 0x11d   :  { %v1067_v51 = vmul.f32 %v3255_v29, %v1066_v43  ;;  %v4004_v57 = vadd.f32 %v813_v49, %v725_v22  ;;  %v1517_v63 = vpack.c.bf16 %v1487_v44, %v1486_v42  ;;  %v730_v43 = vadd.f32 %v3954_v30, %v641_v1 }
 0x11f   :  { %v3257_v2 = vpop.eup %3256  ;;  %v3010_v0 = vmul.f32 -1.442695, %v4004_v57  ;;  %1613 = vmatmul.bf16.gmra.mxu3 %v1517_v63  ;;  %v1068_v62 = vadd.f32 %v3255_v29, %v1067_v51 }
 0x120   :  { %v3259_v39 = vpop.eup %3258  ;;  %v4009_v59 = vadd.f32 1.0, %v3257_v2 }
 0x121   :  { %3260 = vpow2.f32 %v3010_v0  ;;  %855 = vmatmul.bf16.gmra.mxu2 %v2870_v61  ;;  %v1080_v56 = vmul.f32 %v3259_v39, %v3987_v28  ;;  %v1072_v10 = vsel %vm4017_vm2, %v3255_v29, %v1068_v62  ;;  %vm1085_vm3 = vweird.f32 %v3259_v39  ;;  %v2881_v28 = vld [vmem:[%s5605_s1 + $0x140] sm:$0xf] }
 0x122   :  { %3262 = vrcp.f32 %v4009_v59  ;;  %v1077_v29 = vsel %vm1074_vm4, %v1076_v21, %v1072_v10  ;;  %vm1086_vm6 = vmor %vm1084_vm5, %vm1085_vm3  ;;  %v2882_v63 = vor.u32 %v3172_v40, %v2881_v28  ;;  %v1105_v62 = vand.u32 2147483648, %v4009_v59 }
 0x123   :  { %v1081_v5 = vsub.f32 1.0, %v1080_v56  ;;  %v1488_v34 = vmul.f32 %v1077_v29, %v3934_v17  ;;  %v4057_v17 = vpop.f32.mrf.mxu0  ;;  %v4067_v3 = vpop.f32.mrf.mxu1  ;;  %vm1099_vm9 = vweird.f32 %v4009_v59  ;;  %v1103_v4 = vand.u32 2147483647, %v4009_v59 }
 0x124   :  { %v816_v38 = vpop.f32.mrf.mxu2  ;;  %v646_v10 = vadd.f32 %v3714_v41, %v4000_v47  ;;  %v1106_v21 = vor.u32 1.1754944e-38, %v1105_v62 }
 0x125   :  { %v4025_v12 = vadd.f32 %v816_v38, %v728_v52  ;;  %v1082_v46 = vmul.f32 %v3259_v39, %v1081_v5  ;;  %vm1104_vm13 = vcmp.eq.f32.partialorder %v1103_v4, 8.507059e+37 }
 0x126   :  { %v735_v28 = vadd.f32 %v4007_v16, %v646_v10 }
 0x127   :  { %v3261_v19 = vpop.eup %3260  ;;  %v3011_v20 = vmul.f32 -1.442695, %v4025_v12  ;;  %v1083_v11 = vadd.f32 %v3259_v39, %v1082_v46 }
 0x128   :  { %v4033_v24 = vpop.eup %3262  ;;  %v4035_v33 = vadd.f32 1.0, %v3261_v19 }
 0x129   :  { %v1095_v37 = vmul.f32 %v4033_v24, %v4009_v59  ;;  %3264 = vpow2.f32 %v3011_v20  ;;  %v1087_v58 = vsel %vm1086_vm6, %v3259_v39, %v1083_v11  ;;  %vm1100_vm8 = vweird.f32 %v4033_v24 }
 0x12a   :  { %3266 = vrcp.f32 %v4035_v33  ;;  %v1092_v32 = vsel %vm1089_vm7, %v1091_v35, %v1087_v58  ;;  %v1120_v5 = vand.u32 2147483648, %v4035_v33  ;;  %vm4072_vm10 = vmor %vm1099_vm9, %vm1100_vm8  ;;  %v1118_v59 = vand.u32 2147483647, %v4035_v33  ;;  %v3175_v58 = vld [vmem:[%s5605_s1 + $0x160] sm:$0xf0] }
 0x12b   :  { %v1096_v42 = vsub.f32 1.0, %v1095_v37  ;;  %v1489_v22 = vmul.f32 %v1092_v32, %v3958_v53  ;;  %v733_v53 = vadd.f32 %v3981_v18, %v644_v48  ;;  %vm1114_vm12 = vweird.f32 %v4035_v33  ;;  %v4089_v37 = vpop.f32.mrf.mxu0 }
 0x12c   :  { %v818_v44 = vpop.f32.mrf.mxu2  ;;  %v1121_v29 = vor.u32 1.1754944e-38, %v1120_v5  ;;  %vm1119_vm15 = vcmp.eq.f32.partialorder %v1118_v59, 8.507059e+37 }
 0x12d   :  { %v4053_v49 = vadd.f32 %v818_v44, %v730_v43  ;;  %v1518_v51 = vpack.c.bf16 %v1489_v22, %v1488_v34  ;;  %v1097_v61 = vmul.f32 %v4033_v24, %v1096_v42  ;;  %v649_v42 = vadd.f32 %v3714_v41, %v4027_v14 }
 0x12f   :  { %v3265_v2 = vpop.eup %3264  ;;  %v3012_v0 = vmul.f32 -1.442695, %v4053_v49  ;;  %1618 = vmatmul.bf16.gmra.mxu3 %v1518_v51  ;;  %v1098_v52 = vadd.f32 %v4033_v24, %v1097_v61 }
 0x130   :  { %v3267_v39 = vpop.eup %3266  ;;  %v4059_v30 = vadd.f32 1.0, %v3265_v2 }
 0x131   :  { %3268 = vpow2.f32 %v3012_v0  ;;  %860 = vmatmul.bf16.gmra.mxu2 %v2882_v63  ;;  %v1110_v31 = vmul.f32 %v3267_v39, %v4035_v33  ;;  %vm1115_vm11 = vweird.f32 %v3267_v39  ;;  %v1102_v23 = vsel %vm4072_vm10, %v4033_v24, %v1098_v52  ;;  %v2893_v33 = vld [vmem:[%s5605_s1 + $0x158] sm:$0xf]  ;;  %v4105_v63 = vpop.f32.mrf.mxu1 }
 0x132   :  { %3270 = vrcp.f32 %v4059_v30  ;;  %vm1116_vm14 = vmor %vm1114_vm12, %vm1115_vm11  ;;  %v1107_v35 = vsel %vm1104_vm13, %v1106_v21, %v1102_v23  ;;  %v2894_v51 = vor.u32 %v3175_v58, %v2893_v33  ;;  %vm1129_vm1 = vweird.f32 %v4059_v30 }
 0x133   :  { %v1111_v56 = vsub.f32 1.0, %v1110_v31  ;;  %v1490_v34 = vmul.f32 %v1107_v35, %v3979_v13  ;;  %v738_v13 = vadd.f32 %v4039_v25, %v649_v42  ;;  %v1133_v31 = vand.u32 2147483647, %v4059_v30  ;;  %v4116_v62 = vpop.f32.mrf.mxu0 }
 0x134   :  { %v821_v18 = vpop.f32.mrf.mxu2  ;;  %v651_v23 = vadd.f32 %v3714_v41, %v4057_v17 }
 0x135   :  { %v4076_v38 = vadd.f32 %v821_v18, %v733_v53  ;;  %v1112_v9 = vmul.f32 %v3267_v39, %v1111_v56  ;;  %v1135_v53 = vand.u32 2147483648, %v4059_v30  ;;  %vm1134_vm4 = vcmp.eq.f32.partialorder %v1133_v31, 8.507059e+37 }
 0x137   :  { %v3269_v46 = vpop.eup %3268  ;;  %v3013_v1 = vmul.f32 -1.442695, %v4076_v38  ;;  %v1113_v19 = vadd.f32 %v3267_v39, %v1112_v9 }
 0x138   :  { %v3271_v20 = vpop.eup %3270  ;;  %v4086_v11 = vadd.f32 1.0, %v3269_v46 }
 0x139   :  { %v1125_v24 = vmul.f32 %v3271_v20, %v4059_v30  ;;  %3272 = vpow2.f32 %v3013_v1  ;;  %v1117_v47 = vsel %vm1116_vm14, %v3267_v39, %v1113_v19  ;;  %vm1130_vm0 = vweird.f32 %v3271_v20  ;;  %v4132_v21 = vpop.f32.mrf.mxu1 }
 0x13a   :  { %3274 = vrcp.f32 %v4086_v11  ;;  %v1122_v40 = vsel %vm1119_vm15, %v1121_v29, %v1117_v47  ;;  %vm4118_vm2 = vmor %vm1129_vm1, %vm1130_vm0  ;;  %v1148_v56 = vand.u32 2147483647, %v4086_v11  ;;  %v1150_v4 = vand.u32 2147483648, %v4086_v11  ;;  %v3178_v47 = vld [vmem:[%s5605_s1 + $0x178] sm:$0xf0] }
 0x13b   :  { %v1126_v32 = vsub.f32 1.0, %v1125_v24  ;;  %v1491_v22 = vmul.f32 %v1122_v40, %v4004_v57  ;;  %v1136_v30 = vor.u32 1.1754944e-38, %v1135_v53  ;;  %vm1144_vm5 = vweird.f32 %v4086_v11 }
 0x13c   :  { %v823_v43 = vpop.f32.mrf.mxu2  ;;  %vm1149_vm7 = vcmp.eq.f32.partialorder %v1148_v56, 8.507059e+37  ;;  %v654_v40 = vadd.f32 %v3714_v41, %v4089_v37 }
 0x13d   :  { %v1127_v44 = vmul.f32 %v3271_v20, %v1126_v32  ;;  %v4103_v48 = vadd.f32 %v823_v43, %v735_v28  ;;  %v1519_v61 = vpack.c.bf16 %v1491_v22, %v1490_v34  ;;  %v740_v28 = vadd.f32 %v4067_v3, %v651_v23 }
 0x13f   :  { %v3273_v2 = vpop.eup %3272  ;;  %v3014_v0 = vmul.f32 -1.442695, %v4103_v48  ;;  %1623 = vmatmul.bf16.gmra.mxu3 %v1519_v61  ;;  %v1128_v14 = vadd.f32 %v3271_v20, %v1127_v44 }
 0x140   :  { %v3275_v16 = vpop.eup %3274  ;;  %v4108_v39 = vadd.f32 1.0, %v3273_v2 }
 0x141   :  { %v1140_v57 = vmul.f32 %v3275_v16, %v4086_v11  ;;  %3276 = vpow2.f32 %v3014_v0  ;;  %865 = vmatmul.bf16.gmra.mxu2 %v2894_v51  ;;  %v1132_v5 = vsel %vm4118_vm2, %v3271_v20, %v1128_v14  ;;  %vm1145_vm3 = vweird.f32 %v3275_v16  ;;  %v2905_v11 = vld [vmem:[%s5605_s1 + $0x170] sm:$0xf]  ;;  %v658_v51 = vpop.f32.mrf.mxu0  ;;  %v747_v37 = vpop.f32.mrf.mxu1 }
 0x142   :  { %3278 = vrcp.f32 %v4108_v39  ;;  %v1137_v19 = vsel %vm1134_vm4, %v1136_v30, %v1132_v5  ;;  %vm1146_vm6 = vmor %vm1144_vm5, %vm1145_vm3  ;;  %v1151_v20 = vor.u32 1.1754944e-38, %v1150_v4  ;;  %v2906_v44 = vor.u32 %v3178_v47, %v2905_v11 }
 0x143   :  { %v1141_v52 = vsub.f32 1.0, %v1140_v57  ;;  %v1492_v33 = vmul.f32 %v1137_v19, %v4025_v12  ;;  %vm1159_vm9 = vweird.f32 %v4108_v39  ;;  %v1163_v14 = vand.u32 2147483647, %v4108_v39 }
 0x144   :  { %v826_v18 = vpop.f32.mrf.mxu2  ;;  %v656_v5 = vadd.f32 %v3714_v41, %v4116_v62  ;;  %v659_v47 = vadd.f32 %v3714_v41, %v658_v51 }
 0x145   :  { %v1142_v6 = vmul.f32 %v3275_v16, %v1141_v52  ;;  %v4126_v9 = vadd.f32 %v826_v18, %v738_v13  ;;  %v1165_v13 = vand.u32 2147483648, %v4108_v39  ;;  %vm1164_vm12 = vcmp.eq.f32.partialorder %v1163_v14, 8.507059e+37 }
 0x147   :  { %v3277_v10 = vpop.eup %3276  ;;  %v1143_v59 = vadd.f32 %v3275_v16, %v1142_v6  ;;  %v3015_v46 = vmul.f32 -1.442695, %v4126_v9  ;;  %v1166_v18 = vor.u32 1.1754944e-38, %v1165_v13 }
 0x148   :  { %v3279_v1 = vpop.eup %3278  ;;  %v983_v29 = vadd.f32 1.0, %v3277_v10 }
 0x149   :  { %v1147_v35 = vsel %vm1146_vm6, %v3275_v16, %v1143_v59  ;;  %v1155_v24 = vmul.f32 %v3279_v1, %v4108_v39  ;;  %3280 = vpow2.f32 %v3015_v46  ;;  %vm1160_vm8 = vweird.f32 %v3279_v1  ;;  %v660_v23 = vpop.f32.mrf.mxu0  ;;  %v749_v11 = vpop.f32.mrf.mxu1 }
 0x14a   :  { %v1152_v17 = vsel %vm1149_vm7, %v1151_v20, %v1147_v35  ;;  %3282 = vrcp.f32 %v983_v29  ;;  %vm4156_vm10 = vmor %vm1159_vm9, %vm1160_vm8  ;;  %v1180_v31 = vand.u32 2147483648, %v983_v29  ;;  %vm1174_vm13 = vweird.f32 %v983_v29 }
 0x14b   :  { %v1493_v58 = vmul.f32 %v1152_v17, %v4053_v49  ;;  %v1156_v32 = vsub.f32 1.0, %v1155_v24  ;;  %v743_v49 = vadd.f32 %v4105_v63, %v654_v40  ;;  %v1178_v63 = vand.u32 2147483647, %v983_v29 }
 0x14c   :  { %v828_v34 = vpop.f32.mrf.mxu2  ;;  %v1181_v46 = vor.u32 1.1754944e-38, %v1180_v31  ;;  %v745_v17 = vadd.f32 %v4132_v21, %v656_v5 }
 0x14d   :  { %v1157_v42 = vmul.f32 %v3279_v1, %v1156_v32  ;;  %v4146_v43 = vadd.f32 %v828_v34, %v740_v28  ;;  %v1520_v22 = vpack.c.bf16 %v1493_v58, %v1492_v33  ;;  %vm1179_vm15 = vcmp.eq.f32.partialorder %v1178_v63, 8.507059e+37 }
 0x14f   :  { %v3281_v61 = vpop.eup %3280  ;;  %v3016_v2 = vmul.f32 -1.442695, %v4146_v43  ;;  %1628 = vmatmul.bf16.gmra.mxu3 %v1520_v22  ;;  %v1158_v3 = vadd.f32 %v3279_v1, %v1157_v42 }
 0x150   :  { %v3283_v0 = vpop.eup %3282  ;;  %v4149_v12 = vadd.f32 1.0, %v3281_v61 }
 0x151   :  { %v1170_v16 = vmul.f32 %v3283_v0, %v983_v29  ;;  %3284 = vpow2.f32 %v3016_v2  ;;  %870 = vmatmul.bf16.gmra.mxu2 %v2906_v44  ;;  %v1162_v25 = vsel %vm4156_vm10, %v3279_v1, %v1158_v3  ;;  %vm1175_vm11 = vweird.f32 %v3283_v0  ;;  %v663_v21 = vpop.f32.mrf.mxu0  ;;  %v752_v14 = vpop.f32.mrf.mxu1 }
 0x152   :  { %3286 = vrcp.f32 %v4149_v12  ;;  %v1167_v59 = vsel %vm1164_vm12, %v1166_v18, %v1162_v25  ;;  %vm1176_vm14 = vmor %vm1174_vm13, %vm1175_vm11  ;;  %v1195_v41 = vand.u32 2147483648, %v4149_v12  ;;  %vm1189_vm1 = vweird.f32 %v4149_v12 }
 0x153   :  { %v1171_v57 = vsub.f32 1.0, %v1170_v16  ;;  %v1494_v62 = vmul.f32 %v1167_v59, %v4076_v38  ;;  %v748_v38 = vadd.f32 %v747_v37, %v659_v47  ;;  %v1193_v51 = vand.u32 2147483647, %v4149_v12 }
 0x154   :  { %v831_v52 = vpop.f32.mrf.mxu2 }
 0x155   :  { %v1172_v56 = vmul.f32 %v3283_v0, %v1171_v57  ;;  %v4162_v4 = vadd.f32 %v831_v52, %v743_v49  ;;  %v1196_v57 = vor.u32 1.1754944e-38, %v1195_v41  ;;  %vm1194_vm4 = vcmp.eq.f32.partialorder %v1193_v51, 8.507059e+37 }
 0x157   :  { %v3285_v39 = vpop.eup %3284  ;;  %v1173_v6 = vadd.f32 %v3283_v0, %v1172_v56  ;;  %v3017_v30 = vmul.f32 -1.442695, %v4162_v4 }
 0x158   :  { %v3287_v10 = vpop.eup %3286  ;;  %v985_v1 = vadd.f32 1.0, %v3285_v39 }
 0x159   :  { %v1177_v19 = vsel %vm1176_vm14, %v3283_v0, %v1173_v6  ;;  %v1185_v20 = vmul.f32 %v3287_v10, %v4149_v12  ;;  %3288 = vpow2.f32 %v3017_v30  ;;  %vm1190_vm0 = vweird.f32 %v3287_v10  ;;  %v4192_v12 = vld [vmem:[%s5606_s3] ss:$0 sm:$0xff]  ;;  %v754_v47 = vpop.f32.mrf.mxu1 }
 0x15a   :  { %v1182_v35 = vsel %vm1179_vm15, %v1181_v46, %v1177_v19  ;;  %3290 = vrcp.f32 %v985_v1  ;;  %vm4181_vm2 = vmor %vm1189_vm1, %vm1190_vm0  ;;  %v1208_v0 = vand.u32 2147483647, %v985_v1  ;;  %v1210_v49 = vand.u32 2147483648, %v985_v1 }
 0x15b   :  { %v1495_v24 = vmul.f32 %v1182_v35, %v4103_v48  ;;  %v1186_v29 = vsub.f32 1.0, %v1185_v20  ;;  %v661_v53 = vadd.f32 %v4192_v12, %v660_v23  ;;  %vm1204_vm5 = vweird.f32 %v985_v1 }
 0x15c   :  { %v833_v33 = vpop.f32.mrf.mxu2  ;;  %v1211_v18 = vor.u32 1.1754944e-38, %v1210_v49  ;;  %vm1209_vm7 = vcmp.eq.f32.partialorder %v1208_v0, 8.507059e+37  ;;  %v664_v19 = vadd.f32 %v4192_v12, %v663_v21 }
 0x15d   :  { %v1187_v58 = vmul.f32 %v3287_v10, %v1186_v29  ;;  %v4172_v32 = vadd.f32 %v833_v33, %v745_v17  ;;  %v1521_v28 = vpack.c.bf16 %v1495_v24, %v1494_v62  ;;  %v750_v46 = vadd.f32 %v749_v11, %v661_v53 }
 0x15f   :  { %v3289_v40 = vpop.eup %3288  ;;  %v3018_v34 = vmul.f32 -1.442695, %v4172_v32  ;;  %1633 = vmatmul.bf16.gmra.mxu3 %v1521_v28  ;;  %v1188_v48 = vadd.f32 %v3287_v10, %v1187_v58 }
 0x160   :  { %v3291_v42 = vpop.eup %3290  ;;  %v4175_v22 = vadd.f32 1.0, %v3289_v40 }
 0x161   :  { %v1200_v44 = vmul.f32 %v3291_v42, %v985_v1  ;;  %3292 = vpow2.f32 %v3018_v34  ;;  %v1192_v16 = vsel %vm4181_vm2, %v3287_v10, %v1188_v48  ;;  %vm1205_vm3 = vweird.f32 %v3291_v42  ;;  %v665_v1 = vpop.f32.mrf.mxu0 }
 0x162   :  { %3294 = vrcp.f32 %v4175_v22  ;;  %v1197_v56 = vsel %vm1194_vm4, %v1196_v57, %v1192_v16  ;;  %vm1206_vm6 = vmor %vm1204_vm5, %vm1205_vm3  ;;  %v1225_v28 = vand.u32 2147483648, %v4175_v22  ;;  %vm1219_vm9 = vweird.f32 %v4175_v22 }
 0x163   :  { %v1201_v61 = vsub.f32 1.0, %v1200_v44  ;;  %v1496_v23 = vmul.f32 %v1197_v56, %v4126_v9  ;;  %v753_v9 = vadd.f32 %v752_v14, %v664_v19  ;;  %v1223_v40 = vand.u32 2147483647, %v4175_v22 }
 0x164   :  { %v836_v3 = vpop.f32.mrf.mxu2  ;;  %v1226_v2 = vor.u32 1.1754944e-38, %v1225_v28  ;;  %v666_v0 = vadd.f32 %v4192_v12, %v665_v1 }
 0x165   :  { %v1202_v37 = vmul.f32 %v3291_v42, %v1201_v61  ;;  %v4187_v13 = vadd.f32 %v836_v3, %v748_v38  ;;  %vm1224_vm12 = vcmp.eq.f32.partialorder %v1223_v40, 8.507059e+37 }
 0x167   :  { %v3293_v63 = vpop.eup %3292  ;;  %v1203_v31 = vadd.f32 %v3291_v42, %v1202_v37  ;;  %v3019_v52 = vmul.f32 -1.442695, %v4187_v13 }
 0x168   :  { %v3295_v25 = vpop.eup %3294  ;;  %v987_v5 = vadd.f32 1.0, %v3293_v63 }
 0x169   :  { %v1207_v39 = vsel %vm1206_vm6, %v3291_v42, %v1203_v31  ;;  %v1215_v6 = vmul.f32 %v3295_v25, %v4175_v22  ;;  %3296 = vpow2.f32 %v3019_v52  ;;  %vm1220_vm8 = vweird.f32 %v3295_v25  ;;  %v668_v61 = vpop.f32.mrf.mxu0  ;;  %v757_v31 = vpop.f32.mrf.mxu1 }
 0x16a   :  { %v1212_v30 = vsel %vm1209_vm7, %v1211_v18, %v1207_v39  ;;  %3298 = vrcp.f32 %v987_v5  ;;  %vm4209_vm10 = vmor %vm1219_vm9, %vm1220_vm8  ;;  %v1238_v38 = vand.u32 2147483647, %v987_v5  ;;  %v1240_v48 = vand.u32 2147483648, %v987_v5 }
 0x16b   :  { %v1497_v10 = vmul.f32 %v1212_v30, %v4146_v43  ;;  %v1216_v59 = vsub.f32 1.0, %v1215_v6  ;;  %vm1234_vm13 = vweird.f32 %v987_v5  ;;  %v669_v39 = vadd.f32 %v4192_v12, %v668_v61 }
 0x16c   :  { %v838_v20 = vpop.f32.mrf.mxu2  ;;  %v1241_v14 = vor.u32 1.1754944e-38, %v1240_v48  ;;  %vm1239_vm15 = vcmp.eq.f32.partialorder %v1238_v38, 8.507059e+37 }
 0x16d   :  { %v1217_v35 = vmul.f32 %v3295_v25, %v1216_v59  ;;  %v4200_v62 = vadd.f32 %v838_v20, %v750_v46  ;;  %v1522_v24 = vpack.c.bf16 %v1497_v10, %v1496_v23 }
 0x16f   :  { %v3297_v29 = vpop.eup %3296  ;;  %v3020_v17 = vmul.f32 -1.442695, %v4200_v62  ;;  %1638 = vmatmul.bf16.gmra.mxu3 %v1522_v24  ;;  %v1218_v43 = vadd.f32 %v3295_v25, %v1217_v35  ;;  %v758_v35 = vadd.f32 %v757_v31, %v669_v39 }
 0x170   :  { %v3299_v33 = vpop.eup %3298  ;;  %v4203_v58 = vadd.f32 1.0, %v3297_v29 }
 0x171   :  { %v1230_v11 = vmul.f32 %v3299_v33, %v987_v5  ;;  %3300 = vpow2.f32 %v3020_v17  ;;  %v1222_v21 = vsel %vm4209_vm10, %v3295_v25, %v1218_v43  ;;  %vm1235_vm11 = vweird.f32 %v3299_v33  ;;  %v670_v1 = vpop.f32.mrf.mxu0 }
 0x172   :  { %3302 = vrcp.f32 %v4203_v58  ;;  %v1227_v37 = vsel %vm1224_vm12, %v1226_v2, %v1222_v21  ;;  %vm1236_vm14 = vmor %vm1234_vm13, %vm1235_vm11  ;;  %v755_v5 = vadd.f32 %v754_v47, %v666_v0  ;;  %v1255_v24 = vand.u32 2147483648, %v4203_v58  ;;  %v759_v47 = vpop.f32.mrf.mxu1 }
 0x173   :  { %v1231_v34 = vsub.f32 1.0, %v1230_v11  ;;  %v1498_v25 = vmul.f32 %v1227_v37, %v4162_v4  ;;  %vm1249_vm1 = vweird.f32 %v4203_v58  ;;  %v1253_v29 = vand.u32 2147483647, %v4203_v58 }
 0x174   :  { %v841_v44 = vpop.f32.mrf.mxu2  ;;  %v1256_v42 = vor.u32 1.1754944e-38, %v1255_v24  ;;  %v671_v38 = vadd.f32 %v4192_v12, %v670_v1 }
 0x175   :  { %v1232_v41 = vmul.f32 %v3299_v33, %v1231_v34  ;;  %v4215_v51 = vadd.f32 %v841_v44, %v753_v9  ;;  %vm1254_vm4 = vcmp.eq.f32.partialorder %v1253_v29, 8.507059e+37 }
 0x177   :  { %v3301_v22 = vpop.eup %3300  ;;  %v1233_v49 = vadd.f32 %v3299_v33, %v1232_v41  ;;  %v3021_v3 = vmul.f32 -1.442695, %v4215_v51 }
 0x178   :  { %v3303_v16 = vpop.eup %3302  ;;  %v989_v57 = vadd.f32 1.0, %v3301_v22 }
 0x179   :  { %v1237_v53 = vsel %vm1236_vm14, %v3299_v33, %v1233_v49  ;;  %v1245_v63 = vmul.f32 %v3303_v16, %v4203_v58  ;;  %3304 = vpow2.f32 %v3021_v3  ;;  %vm1250_vm0 = vweird.f32 %v3303_v16  ;;  %v673_v49 = vpop.f32.mrf.mxu0  ;;  %v4243_v3 = vpop.f32.mrf.mxu3 }
 0x17a   :  { %v1242_v52 = vsel %vm1239_vm15, %v1241_v14, %v1237_v53  ;;  %3306 = vrcp.f32 %v989_v57  ;;  %vm4232_vm2 = vmor %vm1249_vm1, %vm1250_vm0  ;;  %v1268_v9 = vand.u32 2147483647, %v989_v57  ;;  %v1270_v43 = vand.u32 2147483648, %v989_v57 }
 0x17b   :  { %v1499_v56 = vmul.f32 %v1242_v52, %v4172_v32  ;;  %v1246_v18 = vsub.f32 1.0, %v1245_v63  ;;  %vm1264_vm5 = vweird.f32 %v989_v57  ;;  %v760_v53 = vadd.f32 %v759_v47, %v671_v38 }
 0x17c   :  { %v843_v6 = vpop.f32.mrf.mxu2  ;;  %v1271_v61 = vor.u32 1.1754944e-38, %v1270_v43  ;;  %vm1269_vm7 = vcmp.eq.f32.partialorder %v1268_v9, 8.507059e+37  ;;  %v674_v63 = vadd.f32 %v4192_v12, %v673_v49 }
 0x17d   :  { %v1247_v30 = vmul.f32 %v3303_v16, %v1246_v18  ;;  %v4223_v23 = vadd.f32 %v843_v6, %v755_v5  ;;  %v1523_v10 = vpack.c.bf16 %v1499_v56, %v1498_v25  ;;  %v762_v25 = vpop.f32.mrf.mxu1  ;;  %v4254_v6 = vld [vmem:[%s5608_s5] ss:$0 sm:$0xff] }
 0x17f   :  { %v3305_v59 = vpop.eup %3304  ;;  %v3022_v46 = vmul.f32 -1.442695, %v4223_v23  ;;  %1643 = vmatmul.bf16.gmra.mxu3 %v1523_v10  ;;  %v1248_v4 = vadd.f32 %v3303_v16, %v1247_v30  ;;  %v763_v30 = vadd.f32 %v762_v25, %v674_v63 }
 0x180   :  { %v3307_v19 = vpop.eup %3306  ;;  %v4226_v20 = vadd.f32 1.0, %v3305_v59 }
 0x181   :  { %v1260_v32 = vmul.f32 %v3307_v19, %v989_v57  ;;  %3308 = vpow2.f32 %v3022_v46  ;;  %v1252_v28 = vsel %vm4232_vm2, %v3303_v16, %v1248_v4  ;;  %vm1265_vm3 = vweird.f32 %v3307_v19  ;;  %v675_v4 = vpop.f32.mrf.mxu0 }
 0x182   :  { %3310 = vrcp.f32 %v4226_v20  ;;  %v1257_v41 = vsel %vm1254_vm4, %v1256_v42, %v1252_v28  ;;  %vm1266_vm6 = vmor %vm1264_vm5, %vm1265_vm3  ;;  %v1285_v46 = vand.u32 2147483648, %v4226_v20  ;;  %vm1279_vm9 = vweird.f32 %v4226_v20 }
 0x183   :  { %v1261_v17 = vsub.f32 1.0, %v1260_v32  ;;  %v1500_v37 = vmul.f32 %v1257_v41, %v4187_v13 }
 0x184   :  { %v846_v11 = vpop.f32.mrf.mxu2 }
 0x185   :  { %v1262_v40 = vmul.f32 %v3307_v19, %v1261_v17  ;;  %v4238_v34 = vadd.f32 %v846_v11, %v758_v35  ;;  %v676_v11 = vadd.f32 %v4192_v12, %v675_v4  ;;  %v764_v42 = vpop.f32.mrf.mxu1 }
 0x187   :  { %v3309_v58 = vpop.eup %3308  ;;  %v1263_v48 = vadd.f32 %v3307_v19, %v1262_v40  ;;  %v3023_v44 = vmul.f32 -1.442695, %v4238_v34 }
 0x188   :  { %v3311_v21 = vpop.eup %3310  ;;  %v991_v2 = vadd.f32 1.0, %v3309_v58 }
 0x189   :  { %v1267_v0 = vsel %vm1266_vm6, %v3307_v19, %v1263_v48  ;;  %v1275_v22 = vmul.f32 %v3311_v21, %v4226_v20  ;;  %3312 = vpow2.f32 %v3023_v44  ;;  %vm1280_vm8 = vweird.f32 %v3311_v21 }
 0x18a   :  { %v1272_v16 = vsel %vm1269_vm7, %v1271_v61, %v1267_v0  ;;  %3314 = vrcp.f32 %v991_v2  ;;  %v1283_v19 = vand.u32 2147483647, %v4226_v20  ;;  %vm4265_vm10 = vmor %vm1279_vm9, %vm1280_vm8  ;;  %v1298_v29 = vand.u32 2147483647, %v991_v2 }
 0x18b   :  { %v1501_v14 = vmul.f32 %v1272_v16, %v4200_v62  ;;  %v1276_v57 = vsub.f32 1.0, %v1275_v22  ;;  %v1300_v17 = vand.u32 2147483648, %v991_v2  ;;  %v1286_v20 = vor.u32 1.1754944e-38, %v1285_v46 }
 0x18c   :  { %v848_v31 = vpop.f32.mrf.mxu2  ;;  %vm1284_vm12 = vcmp.eq.f32.partialorder %v1283_v19, 8.507059e+37  ;;  %vm1294_vm13 = vweird.f32 %v991_v2  ;;  %vm1299_vm15 = vcmp.eq.f32.partialorder %v1298_v29, 8.507059e+37  ;;  %v765_v22 = vadd.f32 %v764_v42, %v676_v11 }
 0x18d   :  { %v1277_v52 = vmul.f32 %v3311_v21, %v1276_v57  ;;  %v4248_v56 = vadd.f32 %v848_v31, %v760_v53  ;;  %v1524_v18 = vpack.c.bf16 %v1501_v14, %v1500_v37  ;;  %v1301_v44 = vor.u32 1.1754944e-38, %v1300_v17 }
 0x18f   :  { %v3313_v5 = vpop.eup %3312  ;;  %v3024_v39 = vmul.f32 -1.442695, %v4248_v56  ;;  %1648 = vmatmul.bf16.gmra.mxu3 %v1524_v18  ;;  %v1278_v10 = vadd.f32 %v3311_v21, %v1277_v52 }
 0x190   :  { %v3315_v13 = vpop.eup %3314  ;;  %v4256_v62 = vadd.f32 1.0, %v3313_v5 }
 0x191   :  { %v1290_v59 = vmul.f32 %v3315_v13, %v991_v2  ;;  %3316 = vpow2.f32 %v3024_v39  ;;  %v1282_v33 = vsel %vm4265_vm10, %v3311_v21, %v1278_v10  ;;  %vm1295_vm11 = vweird.f32 %v3315_v13 }
 0x192   :  { %3318 = vrcp.f32 %v4256_v62  ;;  %v1609_v1 = vpop.f32.mrf.mxu3  ;;  %v1287_v48 = vsel %vm1284_vm12, %v1286_v20, %v1282_v33  ;;  %vm1296_vm14 = vmor %vm1294_vm13, %vm1295_vm11  ;;  %v1315_v39 = vand.u32 2147483648, %v4256_v62  ;;  %vm1309_vm1 = vweird.f32 %v4256_v62 }
 0x193   :  { %v1291_v35 = vsub.f32 1.0, %v1290_v59  ;;  %v4263_v32 = vadd.f32 %v4254_v6, %v1609_v1  ;;  %v1502_v16 = vmul.f32 %v1287_v48, %v4215_v51 }
 0x194   :  { %v851_v47 = vpop.f32.mrf.mxu2  ;;  %v1316_v17 = vor.u32 1.1754944e-38, %v1315_v39 }
 0x195   :  { %v1292_v9 = vmul.f32 %v3315_v13, %v1291_v35  ;;  %v4271_v43 = vadd.f32 %v851_v47, %v763_v30  ;;  %1691 = vadd.xlane.f32.xlu0 %v4263_v32  ;;  %v1313_v30 = vand.u32 2147483647, %v4256_v62 }
 0x197   :  { %v3317_v28 = vpop.eup %3316  ;;  %v1293_v40 = vadd.f32 %v3315_v13, %v1292_v9  ;;  %v3025_v38 = vmul.f32 -1.442695, %v4271_v43  ;;  %vm1314_vm4 = vcmp.eq.f32.partialorder %v1313_v30, 8.507059e+37 }
 0x198   :  { %v3319_v58 = vpop.eup %3318  ;;  %v993_v21 = vadd.f32 1.0, %v3317_v28 }
 0x199   :  { %v1297_v41 = vsel %vm1296_vm14, %v3315_v13, %v1293_v40  ;;  %v1305_v61 = vmul.f32 %v3319_v58, %v4256_v62  ;;  %3320 = vpow2.f32 %v3025_v38  ;;  %vm1310_vm0 = vweird.f32 %v3319_v58 }
 0x19a   :  { %v1302_v0 = vsel %vm1299_vm15, %v1301_v44, %v1297_v41  ;;  %3322 = vrcp.f32 %v993_v21  ;;  %v1611_v49 = vpop.f32.mrf.mxu3  ;;  %vm4295_vm2 = vmor %vm1309_vm1, %vm1310_vm0  ;;  %v1328_v1 = vand.u32 2147483647, %v993_v21  ;;  %v1330_v19 = vand.u32 2147483648, %v993_v21 }
 0x19b   :  { %v1503_v2 = vmul.f32 %v1302_v0, %v4223_v23  ;;  %v1306_v37 = vsub.f32 1.0, %v1305_v61  ;;  %v4280_v14 = vadd.f32 %v4254_v6, %v1611_v49  ;;  %v681_v62 = vadd.f32 %v4192_v12, %v3737_v54 }
 0x19c   :  { %v853_v57 = vpop.f32.mrf.mxu2  ;;  %vm1324_vm5 = vweird.f32 %v993_v21  ;;  %v1331_v28 = vor.u32 1.1754944e-38, %v1330_v19  ;;  %vm1329_vm7 = vcmp.eq.f32.partialorder %v1328_v1, 8.507059e+37 }
 0x19d   :  { %v1307_v53 = vmul.f32 %v3319_v58, %v1306_v37  ;;  %v4282_v63 = vadd.f32 %v853_v57, %v765_v22  ;;  %1693 = vadd.xlane.f32.xlu1 %v4280_v14  ;;  %v1525_v31 = vpack.c.bf16 %v1503_v2, %v1502_v16  ;;  %v770_v38 = vadd.f32 %v3739_v55, %v681_v62 }
 0x19f   :  { %v3321_v52 = vpop.eup %3320  ;;  %v3026_v25 = vmul.f32 -1.442695, %v4282_v63  ;;  %1653 = vmatmul.bf16.gmra.mxu3 %v1525_v31  ;;  %v1308_v51 = vadd.f32 %v3319_v58, %v1307_v53 }
 0x1a0   :  { %v3323_v18 = vpop.eup %3322  ;;  %v4286_v5 = vadd.f32 1.0, %v3321_v52 }
 0x1a1   :  { %v1320_v23 = vmul.f32 %v3323_v18, %v993_v21  ;;  %3324 = vpow2.f32 %v3026_v25  ;;  %v1312_v4 = vsel %vm4295_vm2, %v3319_v58, %v1308_v51  ;;  %vm1325_vm3 = vweird.f32 %v3323_v18 }
 0x1a2   :  { %3326 = vrcp.f32 %v4286_v5  ;;  %v1614_v13 = vpop.f32.mrf.mxu3  ;;  %v1317_v11 = vsel %vm1314_vm4, %v1316_v17, %v1312_v4  ;;  %vm1326_vm6 = vmor %vm1324_vm5, %vm1325_vm3  ;;  %v1345_v57 = vand.u32 2147483648, %v4286_v5  ;;  %vm1339_vm9 = vweird.f32 %v4286_v5 }
 0x1a3   :  { %v1321_v10 = vsub.f32 1.0, %v1320_v23  ;;  %v4293_v59 = vadd.f32 %v4254_v6, %v1614_v13  ;;  %v1504_v48 = vmul.f32 %v1317_v11, %v4238_v34  ;;  %v1343_v31 = vand.u32 2147483647, %v4286_v5 }
 0x1a4   :  { %v856_v35 = vpop.f32.mrf.mxu2  ;;  %v1346_v46 = vor.u32 1.1754944e-38, %v1345_v57 }
 0x1a5   :  { %v1322_v24 = vmul.f32 %v3323_v18, %v1321_v10  ;;  %v4302_v29 = vadd.f32 %v856_v35, %v3717_v45  ;;  %1695 = vadd.xlane.f32.xlu2 %v4293_v59  ;;  %vm1344_vm12 = vcmp.eq.f32.partialorder %v1343_v31, 8.507059e+37 }
 0x1a7   :  { %v3325_v47 = vpop.eup %3324  ;;  %v1323_v33 = vadd.f32 %v3323_v18, %v1322_v24  ;;  %v3027_v9 = vmul.f32 -1.442695, %v4302_v29 }
 0x1a8   :  { %v3327_v20 = vpop.eup %3326  ;;  %v995_v40 = vadd.f32 1.0, %v3325_v47 }
 0x1a9   :  { %v1327_v42 = vsel %vm1326_vm6, %v3323_v18, %v1323_v33  ;;  %v1335_v45 = vmul.f32 %v3327_v20, %v4286_v5  ;;  %3328 = vpow2.f32 %v3027_v9  ;;  %vm1340_vm8 = vweird.f32 %v3327_v20 }
 0x1aa   :  { %v1332_v54 = vsel %vm1329_vm7, %v1331_v28, %v1327_v42  ;;  %3330 = vrcp.f32 %v995_v40  ;;  %v1616_v58 = vpop.f32.mrf.mxu3  ;;  %vm4328_vm10 = vmor %vm1339_vm9, %vm1340_vm8  ;;  %v1358_v51 = vand.u32 2147483647, %v995_v40  ;;  %v1360_v23 = vand.u32 2147483648, %v995_v40 }
 0x1ab   :  { %v1505_v44 = vmul.f32 %v1332_v54, %v4248_v56  ;;  %v1336_v21 = vsub.f32 1.0, %v1335_v45  ;;  %v4313_v41 = vadd.f32 %v4254_v6, %v1616_v58  ;;  %v686_v5 = vadd.f32 %v4192_v12, %v3766_v7 }
 0x1ac   :  { %v858_v61 = vpop.f32.mrf.mxu2  ;;  %vm1354_vm13 = vweird.f32 %v995_v40  ;;  %v1361_v62 = vor.u32 1.1754944e-38, %v1360_v23  ;;  %vm1359_vm15 = vcmp.eq.f32.partialorder %v1358_v51, 8.507059e+37 }
 0x1ad   :  { %v1337_v0 = vmul.f32 %v3327_v20, %v1336_v21  ;;  %v4315_v22 = vadd.f32 %v858_v61, %v770_v38  ;;  %1697 = vadd.xlane.f32.xlu0 %v4313_v41  ;;  %v1526_v49 = vpack.c.bf16 %v1505_v44, %v1504_v48  ;;  %v775_v33 = vadd.f32 %v3768_v8, %v686_v5 }
 0x1af   :  { %v3329_v16 = vpop.eup %3328  ;;  %v3028_v55 = vmul.f32 -1.442695, %v4315_v22  ;;  %1658 = vmatmul.bf16.gmra.mxu3 %v1526_v49  ;;  %v1338_v34 = vadd.f32 %v3327_v20, %v1337_v0 }
 0x1b0   :  { %v3331_v2 = vpop.eup %3330  ;;  %v4319_v37 = vadd.f32 1.0, %v3329_v16 }
 0x1b1   :  { %v1350_v56 = vmul.f32 %v3331_v2, %v995_v40  ;;  %3332 = vpow2.f32 %v3028_v55  ;;  %v1342_v13 = vsel %vm4328_vm10, %v3327_v20, %v1338_v34  ;;  %vm1355_vm11 = vweird.f32 %v3331_v2 }
 0x1b2   :  { %3334 = vrcp.f32 %v4319_v37  ;;  %v1619_v53 = vpop.f32.mrf.mxu3  ;;  %v1347_v24 = vsel %vm1344_vm12, %v1346_v46, %v1342_v13  ;;  %vm1356_vm14 = vmor %vm1354_vm13, %vm1355_vm11  ;;  %v1375_v21 = vand.u32 2147483648, %v4319_v37  ;;  %vm1369_vm1 = vweird.f32 %v4319_v37 }
 0x1b3   :  { %v1351_v52 = vsub.f32 1.0, %v1350_v56  ;;  %v4326_v25 = vadd.f32 %v4254_v6, %v1619_v53  ;;  %v1506_v20 = vmul.f32 %v1347_v24, %v4271_v43  ;;  %v1373_v61 = vand.u32 2147483647, %v4319_v37 }
 0x1b4   :  { %v861_v39 = vpop.f32.mrf.mxu2 }
 0x1b5   :  { %v1352_v30 = vmul.f32 %v3331_v2, %v1351_v52  ;;  %v4335_v10 = vadd.f32 %v861_v39, %v3742_v60  ;;  %1699 = vadd.xlane.f32.xlu1 %v4326_v25  ;;  %v1376_v52 = vor.u32 1.1754944e-38, %v1375_v21  ;;  %vm1374_vm4 = vcmp.eq.f32.partialorder %v1373_v61, 8.507059e+37 }
 0x1b7   :  { %v3333_v1 = vpop.eup %3332  ;;  %v1353_v19 = vadd.f32 %v3331_v2, %v1352_v30  ;;  %v3029_v35 = vmul.f32 -1.442695, %v4335_v10 }
 0x1b8   :  { %v3335_v4 = vpop.eup %3334  ;;  %v997_v17 = vadd.f32 1.0, %v3333_v1 }
 0x1b9   :  { %v1357_v47 = vsel %vm1356_vm14, %v3331_v2, %v1353_v19  ;;  %v1365_v60 = vmul.f32 %v3335_v4, %v4319_v37  ;;  %3336 = vpow2.f32 %v3029_v35  ;;  %vm1370_vm0 = vweird.f32 %v3335_v4 }
 0x1ba   :  { %v1362_v7 = vsel %vm1359_vm15, %v1361_v62, %v1357_v47  ;;  %3338 = vrcp.f32 %v997_v17  ;;  %v1621_v9 = vpop.f32.mrf.mxu3  ;;  %vm4358_vm2 = vmor %vm1369_vm1, %vm1370_vm0  ;;  %v1388_v55 = vand.u32 2147483647, %v997_v17  ;;  %v1390_v2 = vand.u32 2147483648, %v997_v17 }
 0x1bb   :  { %v1507_v11 = vmul.f32 %v1362_v7, %v4282_v63  ;;  %v1366_v28 = vsub.f32 1.0, %v1365_v60  ;;  %v4346_v40 = vadd.f32 %v4254_v6, %v1621_v9  ;;  %v691_v37 = vadd.f32 %v4192_v12, %v3799_v26 }
 0x1bc   :  { %v863_v42 = vpop.f32.mrf.mxu2  ;;  %vm1384_vm5 = vweird.f32 %v997_v17  ;;  %v1391_v30 = vor.u32 1.1754944e-38, %v1390_v2  ;;  %vm1389_vm7 = vcmp.eq.f32.partialorder %v1388_v55, 8.507059e+37 }
 0x1bd   :  { %v1367_v45 = vmul.f32 %v3335_v4, %v1366_v28  ;;  %v4348_v38 = vadd.f32 %v863_v42, %v775_v33  ;;  %1701 = vadd.xlane.f32.xlu2 %v4346_v40  ;;  %v1527_v54 = vpack.c.bf16 %v1507_v11, %v1506_v20  ;;  %v780_v1 = vadd.f32 %v3801_v27, %v691_v37 }
 0x1bf   :  { %v3337_v58 = vpop.eup %3336  ;;  %v3030_v8 = vmul.f32 -1.442695, %v4348_v38  ;;  %1663 = vmatmul.bf16.gmra.mxu3 %v1527_v54  ;;  %v1368_v43 = vadd.f32 %v3335_v4, %v1367_v45 }
 0x1c0   :  { %v3339_v48 = vpop.eup %3338  ;;  %v4352_v44 = vadd.f32 1.0, %v3337_v58 }
 0x1c1   :  { %v1380_v63 = vmul.f32 %v3339_v48, %v997_v17  ;;  %3340 = vpow2.f32 %v3030_v8  ;;  %v1372_v57 = vsel %vm4358_vm2, %v3335_v4, %v1368_v43  ;;  %vm1385_vm3 = vweird.f32 %v3339_v48 }
 0x1c2   :  { %3342 = vrcp.f32 %v4352_v44  ;;  %v1624_v49 = vpop.f32.mrf.mxu3  ;;  %v1377_v13 = vsel %vm1374_vm4, %v1376_v52, %v1372_v57  ;;  %vm1386_vm6 = vmor %vm1384_vm5, %vm1385_vm3  ;;  %v1405_v11 = vand.u32 2147483648, %v4352_v44  ;;  %vm1399_vm9 = vweird.f32 %v4352_v44 }
 0x1c3   :  { %v1381_v0 = vsub.f32 1.0, %v1380_v63  ;;  %v4363_v34 = vadd.f32 %v4254_v6, %v1624_v49  ;;  %v1508_v19 = vmul.f32 %v1377_v13, %v4302_v29  ;;  %v1403_v28 = vand.u32 2147483647, %v4352_v44 }
 0x1c4   :  { %v866_v56 = vpop.f32.mrf.mxu2 }
 0x1c5   :  { %v1382_v53 = vmul.f32 %v3339_v48, %v1381_v0  ;;  %v4368_v31 = vadd.f32 %v866_v56, %v3775_v15  ;;  %1703 = vadd.xlane.f32.xlu0 %v4363_v34  ;;  %v1406_v0 = vor.u32 1.1754944e-38, %v1405_v11  ;;  %vm1404_vm12 = vcmp.eq.f32.partialorder %v1403_v28, 8.507059e+37 }
 0x1c7   :  { %v3341_v18 = vpop.eup %3340  ;;  %v1383_v51 = vadd.f32 %v3339_v48, %v1382_v53  ;;  %v3031_v23 = vmul.f32 -1.442695, %v4368_v31 }
 0x1c8   :  { %v3343_v39 = vpop.eup %3342  ;;  %v999_v5 = vadd.f32 1.0, %v3341_v18 }
 0x1c9   :  { %v1387_v46 = vsel %vm1386_vm6, %v3339_v48, %v1383_v51  ;;  %v1395_v15 = vmul.f32 %v3343_v39, %v4352_v44  ;;  %3344 = vpow2.f32 %v3031_v23  ;;  %vm1400_vm8 = vweird.f32 %v3343_v39 }
 0x1ca   :  { %v1392_v26 = vsel %vm1389_vm7, %v1391_v30, %v1387_v46  ;;  %3346 = vrcp.f32 %v999_v5  ;;  %v1626_v24 = vpop.f32.mrf.mxu3  ;;  %vm4391_vm10 = vmor %vm1399_vm9, %vm1400_vm8  ;;  %v1418_v58 = vand.u32 2147483647, %v999_v5  ;;  %v1420_v8 = vand.u32 2147483648, %v999_v5 }
 0x1cb   :  { %v1509_v35 = vmul.f32 %v1392_v26, %v4315_v22  ;;  %v1396_v4 = vsub.f32 1.0, %v1395_v15  ;;  %v4379_v17 = vadd.f32 %v4254_v6, %v1626_v24  ;;  %v696_v44 = vadd.f32 %v4192_v12, %v3844_v50 }
 0x1cc   :  { %v868_v62 = vpop.f32.mrf.mxu2  ;;  %vm1414_vm13 = vweird.f32 %v999_v5  ;;  %v1421_v57 = vor.u32 1.1754944e-38, %v1420_v8  ;;  %vm1419_vm15 = vcmp.eq.f32.partialorder %v1418_v58, 8.507059e+37 }
 0x1cd   :  { %v1397_v47 = vmul.f32 %v3343_v39, %v1396_v4  ;;  %v4381_v60 = vadd.f32 %v868_v62, %v780_v1  ;;  %v1528_v33 = vpack.c.bf16 %v1509_v35, %v1508_v19  ;;  %1705 = vadd.xlane.f32.xlu1 %v4379_v17  ;;  %v785_v12 = vadd.f32 %v4243_v3, %v696_v44 }
 0x1cf   :  { %v3345_v7 = vpop.eup %3344  ;;  %v3032_v9 = vmul.f32 -1.442695, %v4381_v60  ;;  %1668 = vmatmul.bf16.gmra.mxu3 %v1528_v33  ;;  %v1398_v29 = vadd.f32 %v3343_v39, %v1397_v47 }
 0x1d0   :  { %v3347_v27 = vpop.eup %3346  ;;  %v4385_v20 = vadd.f32 1.0, %v3345_v7 }
 0x1d1   :  { %v1410_v22 = vmul.f32 %v3347_v27, %v999_v5  ;;  %3348 = vpow2.f32 %v3032_v9  ;;  %v1402_v63 = vsel %vm4391_vm10, %v3343_v39, %v1398_v29  ;;  %vm1415_vm11 = vweird.f32 %v3347_v27 }
 0x1d2   :  { %3350 = vrcp.f32 %v4385_v20  ;;  %v1629_v45 = vpop.f32.mrf.mxu3  ;;  %v1407_v56 = vsel %vm1404_vm12, %v1406_v0, %v1402_v63  ;;  %vm1416_vm14 = vmor %vm1414_vm13, %vm1415_vm11  ;;  %v1435_v19 = vand.u32 2147483648, %v4385_v20  ;;  %vm1429_vm1 = vweird.f32 %v4385_v20 }
 0x1d3   :  { %v1411_v42 = vsub.f32 1.0, %v1410_v22  ;;  %v4396_v48 = vadd.f32 %v4254_v6, %v1629_v45  ;;  %v1510_v52 = vmul.f32 %v1407_v56, %v4335_v10  ;;  %v1433_v35 = vand.u32 2147483647, %v4385_v20 }
 0x1d4   :  { %v871_v43 = vpop.f32.mrf.mxu2 }
 0x1d5   :  { %v1412_v21 = vmul.f32 %v3347_v27, %v1411_v42  ;;  %v4401_v61 = vadd.f32 %v871_v43, %v3814_v36  ;;  %1707 = vadd.xlane.f32.xlu2 %v4396_v48  ;;  %vm1434_vm4 = vcmp.eq.f32.partialorder %v1433_v35, 8.507059e+37 }
 0x1d7   :  { %v3349_v49 = vpop.eup %3348  ;;  %v1413_v16 = vadd.f32 %v3347_v27, %v1412_v21  ;;  %v3033_v55 = vmul.f32 -1.442695, %v4401_v61 }
 0x1d8   :  { %v3351_v2 = vpop.eup %3350  ;;  %v1001_v53 = vadd.f32 1.0, %v3349_v49 }
 0x1d9   :  { %v1417_v37 = vsel %vm1416_vm14, %v3347_v27, %v1413_v16  ;;  %v1425_v36 = vmul.f32 %v3351_v2, %v4385_v20  ;;  %3352 = vpow2.f32 %v3033_v55  ;;  %vm1430_vm0 = vweird.f32 %v3351_v2 }
 0x1da   :  { %v1422_v50 = vsel %vm1419_vm15, %v1421_v57, %v1417_v37  ;;  %3354 = vrcp.f32 %v1001_v53  ;;  %v1631_v23 = vpop.f32.mrf.mxu3  ;;  %vm1431_vm2 = vmor %vm1429_vm1, %vm1430_vm0  ;;  %v1450_v62 = vand.u32 2147483648, %v1001_v53  ;;  %v1448_v9 = vand.u32 2147483647, %v1001_v53 }
 0x1db   :  { %v1511_v18 = vmul.f32 %v1422_v50, %v4348_v38  ;;  %v1426_v51 = vsub.f32 1.0, %v1425_v36  ;;  %v4412_v39 = vadd.f32 %v4254_v6, %v1631_v23  ;;  %v1436_v27 = vor.u32 1.1754944e-38, %v1435_v19 }
 0x1dc   :  { %v873_v13 = vpop.f32.mrf.mxu2  ;;  %vm1444_vm5 = vweird.f32 %v1001_v53  ;;  %v1451_v28 = vor.u32 1.1754944e-38, %v1450_v62  ;;  %vm1449_vm7 = vcmp.eq.f32.partialorder %v1448_v9, 8.507059e+37 }
 0x1dd   :  { %v1427_v30 = vmul.f32 %v3351_v2, %v1426_v51  ;;  %v4414_v5 = vadd.f32 %v873_v13, %v785_v12  ;;  %v1529_v46 = vpack.c.bf16 %v1511_v18, %v1510_v52  ;;  %1709 = vadd.xlane.f32.xlu0 %v4412_v39 }
 0x1df   :  { %v3353_v15 = vpop.eup %3352  ;;  %v3034_v26 = vmul.f32 -1.442695, %v4414_v5  ;;  %1673 = vmatmul.bf16.gmra.mxu3 %v1529_v46  ;;  %v1428_v10 = vadd.f32 %v3351_v2, %v1427_v30 }
 0x1e0   :  { %v3355_v3 = vpop.eup %3354  ;;  %v1002_v1 = vadd.f32 1.0, %v3353_v15 }
 0x1e1   :  { %v1440_v38 = vmul.f32 %v3355_v3, %v1001_v53  ;;  %3356 = vpow2.f32 %v3034_v26  ;;  %v1432_v33 = vsel %vm1431_vm2, %v3351_v2, %v1428_v10  ;;  %vm1445_vm3 = vweird.f32 %v3355_v3 }
 0x1e2   :  { %3358 = vrcp.f32 %v1002_v1  ;;  %v1634_v24 = vpop.f32.mrf.mxu3  ;;  %v1437_v20 = vsel %vm1434_vm4, %v1436_v27, %v1432_v33  ;;  %vm1446_vm6 = vmor %vm1444_vm5, %vm1445_vm3  ;;  %v1465_v56 = vand.u32 2147483648, %v1002_v1  ;;  %vm1459_vm9 = vweird.f32 %v1002_v1 }
 0x1e3   :  { %v1441_v4 = vsub.f32 1.0, %v1440_v38  ;;  %v4422_v47 = vadd.f32 %v4254_v6, %v1634_v24  ;;  %v1512_v8 = vmul.f32 %v1437_v20, %v4368_v31  ;;  %v1463_v57 = vand.u32 2147483647, %v1002_v1 }
 0x1e4   :  { %v1466_v52 = vor.u32 1.1754944e-38, %v1465_v56 }
 0x1e5   :  { %v1442_v7 = vmul.f32 %v3355_v3, %v1441_v4  ;;  %1711 = vadd.xlane.f32.xlu1 %v4422_v47  ;;  %vm1464_vm12 = vcmp.eq.f32.partialorder %v1463_v57, 8.507059e+37 }
 0x1e7   :  { %v3357_v29 = vpop.eup %3356  ;;  %v1443_v22 = vadd.f32 %v3355_v3, %v1442_v7 }
 0x1e8   :  { %v3359_v11 = vpop.eup %3358  ;;  %v1003_v42 = vadd.f32 1.0, %v3357_v29 }
 0x1e9   :  { %v1447_v45 = vsel %vm1446_vm6, %v3355_v3, %v1443_v22  ;;  %v1455_v54 = vmul.f32 %v3359_v11, %v1002_v1  ;;  %vm1460_vm8 = vweird.f32 %v3359_v11 }
 0x1ea   :  { %v1452_v58 = vsel %vm1449_vm7, %v1451_v28, %v1447_v45  ;;  %3360 = vrcp.f32 %v1003_v42  ;;  %v1636_v21 = vpop.f32.mrf.mxu3  ;;  %vm1461_vm10 = vmor %vm1459_vm9, %vm1460_vm8  ;;  %v1478_v12 = vand.u32 2147483647, %v1003_v42  ;;  %vm1474_vm13 = vweird.f32 %v1003_v42 }
 0x1eb   :  { %v1513_v43 = vmul.f32 %v1452_v58, %v4381_v60  ;;  %v1456_v63 = vsub.f32 1.0, %v1455_v54  ;;  %v4428_v44 = vadd.f32 %v4254_v6, %v1636_v21  ;;  %v1480_v60 = vand.u32 2147483648, %v1003_v42 }
 0x1ec   :  { %vm1479_vm15 = vcmp.eq.f32.partialorder %v1478_v12, 8.507059e+37  ;;  %v3430_v58 = vmov 128.0  }
 0x1ed   :  { %v1457_v0 = vmul.f32 %v3359_v11, %v1456_v63  ;;  %v1530_v49 = vpack.c.bf16 %v1513_v43, %v1512_v8  ;;  %1713 = vadd.xlane.f32.xlu2 %v4428_v44  ;;  %v1481_v23 = vor.u32 1.1754944e-38, %v1480_v60  ;;  %3362 = vrcp.f32 %v3430_v58 }
 0x1ef   :  { %1678 = vmatmul.bf16.gmra.mxu3 %v1530_v49  ;;  %v1458_v55 = vadd.f32 %v3359_v11, %v1457_v0 }
 0x1f0   :  { %v3361_v16 = vpop.eup %3360 }
 0x1f1   :  { %v1470_v2 = vmul.f32 %v3361_v16, %v1003_v42  ;;  %v1462_v36 = vsel %vm1461_vm10, %v3359_v11, %v1458_v55  ;;  %vm1475_vm11 = vweird.f32 %v3361_v16 }
 0x1f2   :  { %v1639_v53 = vpop.f32.mrf.mxu3  ;;  %v1467_v51 = vsel %vm1464_vm12, %v1466_v52, %v1462_v36  ;;  %vm1476_vm14 = vmor %vm1474_vm13, %vm1475_vm11 }
 0x1f3   :  { %v1471_v31 = vsub.f32 1.0, %v1470_v2  ;;  %v4432_v37 = vadd.f32 %v4254_v6, %v1639_v53  ;;  %v1514_v46 = vmul.f32 %v1467_v51, %v4401_v61  ;;  %v3363_v0 = vpop.eup %3362 }
 0x1f4   :  { %vm1760_vm0 = vweird.f32 %v3363_v0 }
 0x1f5   :  { %v1472_v50 = vmul.f32 %v3361_v16, %v1471_v31  ;;  %1715 = vadd.xlane.f32.xlu0 %v4432_v37 }
 0x1f7   :  { %v1473_v18 = vadd.f32 %v3361_v16, %v1472_v50 }
 0x1f9   :  { %v1477_v13 = vsel %vm1476_vm14, %v3361_v16, %v1473_v18  ;;  %v1756_v16 = vmul.f32 128.0, %v3363_v0 }
 0x1fa   :  { %v1482_v30 = vsel %vm1479_vm15, %v1481_v23, %v1477_v13  ;;  %v1641_v26 = vpop.f32.mrf.mxu3 }
 0x1fb   :  { %v1515_v15 = vmul.f32 %v1482_v30, %v4414_v5  ;;  %v4438_v3 = vadd.f32 %v4254_v6, %v1641_v26  ;;  %v1757_v31 = vsub.f32 1.0, %v1756_v16 }
 0x1fd   :  { %v1531_v1 = vpack.c.bf16 %v1515_v15, %v1514_v46  ;;  %1717 = vadd.xlane.f32.xlu2 %v4438_v3  ;;  %v1758_v60 = vmul.f32 %v3363_v0, %v1757_v31 }
 0x1ff   :  { %1683 = vmatmul.bf16.gmra.mxu3 %v1531_v1  ;;  %v1759_v18 = vadd.f32 %v3363_v0, %v1758_v60 }
 0x201   :  { %v4505_v23 = vsel %vm1760_vm0, %v3363_v0, %v1759_v18 }
 0x202   :  { %v1644_v10 = vpop.f32.mrf.mxu3 }
 0x203   :  { %v4442_v38 = vadd.f32 %v4254_v6, %v1644_v10 }
 0x205   :  { %1719 = vadd.xlane.f32.xlu1 %v4442_v38 }
 0x208   :  { %v4477_v42 = vpop.xlane.xlu0 %1691 }
 0x20a   :  { %v1646_v19 = vpop.f32.mrf.mxu3 }
 0x20b   :  { %v4446_v35 = vadd.f32 %v4254_v6, %v1646_v19 }
 0x20d   :  { %1721 = vadd.xlane.f32.xlu0 %v4446_v35 }
 0x210   :  { %v4491_v49 = vpop.xlane.xlu1 %1693 }
 0x212   :  { %v1649_v61 = vpop.f32.mrf.mxu3 }
 0x213   :  { %v4450_v5 = vadd.f32 %v4254_v6, %v1649_v61 }
 0x215   :  { %1723 = vadd.xlane.f32.xlu1 %v4450_v5 }
 0x218   :  { %v4483_v8 = vpop.xlane.xlu2 %1695 }
 0x21a   :  { %v1651_v4 = vpop.f32.mrf.mxu3 }
 0x21b   :  { %v4454_v24 = vadd.f32 %v4254_v6, %v1651_v4 }
 0x21d   :  { %1725 = vadd.xlane.f32.xlu2 %v4454_v24 }
 0x220   :  { %v4485_v43 = vpop.xlane.xlu0 %1697 }
 0x222   :  { %v1654_v62 = vpop.f32.mrf.mxu3 }
 0x223   :  { %v4458_v33 = vadd.f32 %v4254_v6, %v1654_v62 }
 0x225   :  { %1727 = vadd.xlane.f32.xlu0 %v4458_v33 }
 0x228   :  { %v4499_v53 = vpop.xlane.xlu1 %1699 }
 0x22a   :  { %v1656_v7 = vpop.f32.mrf.mxu3 }
 0x22b   :  { %v4462_v9 = vadd.f32 %v4254_v6, %v1656_v7 }
 0x22d   :  { %1729 = vadd.xlane.f32.xlu1 %v4462_v9 }
 0x230   :  { %v4493_v55 = vpop.xlane.xlu2 %1701 }
 0x232   :  { %v1659_v27 = vpop.f32.mrf.mxu3 }
 0x233   :  { %v4466_v29 = vadd.f32 %v4254_v6, %v1659_v27 }
 0x235   :  { %1731 = vadd.xlane.f32.xlu2 %v4466_v29 }
 0x238   :  { %v1704_v2 = vpop.xlane.xlu0 %1703 }
 0x23a   :  { %v1661_v22 = vpop.f32.mrf.mxu3 }
 0x23b   :  { %v4470_v11 = vadd.f32 %v4254_v6, %v1661_v22 }
 0x23d   :  { %1733 = vadd.xlane.f32.xlu0 %v4470_v11 }
 0x240   :  { %v1706_v51 = vpop.xlane.xlu1 %1705 }
 0x242   :  { %v1664_v20 = vpop.f32.mrf.mxu3 }
 0x243   :  { %v4474_v28 = vadd.f32 %v4254_v6, %v1664_v20 }
 0x245   :  { %1735 = vadd.xlane.f32.xlu1 %v4474_v28 }
 0x248   :  { %v1708_v36 = vpop.xlane.xlu2 %1707 }
 0x24a   :  { %v1666_v45 = vpop.f32.mrf.mxu3 }
 0x24b   :  { %v4480_v54 = vadd.f32 %v4254_v6, %v1666_v45 }
 0x24d   :  { %1737 = vadd.xlane.f32.xlu2 %v4480_v54 }
 0x250   :  { %v1710_v50 = vpop.xlane.xlu0 %1709 }
 0x251   :  { %v1771_v60 = vmul.f32 %v4505_v23, %v1710_v50 }
 0x252   :  { %v1669_v63 = vpop.f32.mrf.mxu3 }
 0x253   :  { %v4488_v21 = vadd.f32 %v4254_v6, %v1669_v63 }
 0x255   :  { %1739 = vadd.xlane.f32.xlu0 %v4488_v21 }
 0x258   :  { %v1712_v19 = vpop.xlane.xlu1 %1711 }
 0x259   :  { %v1772_v50 = vmul.f32 %v4505_v23, %v1712_v19 }
 0x25a   :  { %v1671_v56 = vpop.f32.mrf.mxu3 }
 0x25b   :  { %v4496_v57 = vadd.f32 %v4254_v6, %v1671_v56 }
 0x25d   :  { %1741 = vadd.xlane.f32.xlu1 %v4496_v57 }
 0x260   :  { %v1714_v13 = vpop.xlane.xlu2 %1713 }
 0x262   :  { %v1674_v12 = vpop.f32.mrf.mxu3 }
 0x263   :  { %v4502_v52 = vadd.f32 %v4254_v6, %v1674_v12 }
 0x265   :  { %1743 = vadd.xlane.f32.xlu2 %v4502_v52 }
 0x268   :  { %v1716_v30 = vpop.xlane.xlu0 %1715 }
 0x269   :  { %v1774_v46 = vmul.f32 %v4505_v23, %v1716_v30  ;;  %v4550_v30 = vsub.f32 %v4412_v39, %v1771_v60 }
 0x26a   :  { %v1676_v15 = vpop.f32.mrf.mxu3 }
 0x26b   :  { %v4509_v26 = vsub.f32 %v4432_v37, %v1774_v46  ;;  %v4512_v1 = vadd.f32 %v4254_v6, %v1676_v15  ;;  %v1768_v15 = vmul.f32 %v4505_v23, %v1704_v2  ;;  %v1835_v39 = vmul.f32 %v4550_v30, %v4550_v30 }
 0x26d   :  { %1745 = vadd.xlane.f32.xlu0 %v4512_v1  ;;  %v1838_v10 = vmul.f32 %v4509_v26, %v4509_v26 }
 0x26f   :  { %1882 = vadd.xlane.f32.xlu2 %v1838_v10  ;;  %v1770_v10 = vmul.f32 %v4505_v23, %v1708_v36  ;;  %v1769_v36 = vmul.f32 %v4505_v23, %v1706_v51 }
 0x270   :  { %v1718_v61 = vpop.xlane.xlu2 %1717 }
 0x271   :  { %v1775_v4 = vmul.f32 %v4505_v23, %v1718_v61  ;;  %v4573_v2 = vsub.f32 %v4396_v48, %v1770_v10 }
 0x272   :  { %v1679_v62 = vpop.f32.mrf.mxu3 }
 0x273   :  { %v4519_v7 = vsub.f32 %v4438_v3, %v1775_v4  ;;  %v4522_v37 = vadd.f32 %v4254_v6, %v1679_v62  ;;  %v1767_v4 = vmul.f32 %v4505_v23, %v4493_v55 }
 0x275   :  { %1747 = vadd.xlane.f32.xlu1 %v4522_v37  ;;  %v1839_v27 = vmul.f32 %v4519_v7, %v4519_v7  ;;  %v4588_v48 = vsub.f32 %v4346_v40, %v1767_v4 }
 0x277   :  { %1884 = vadd.xlane.f32.xlu0 %v1839_v27  ;;  %v1831_v55 = vmul.f32 %v4588_v48, %v4588_v48 }
 0x278   :  { %v1720_v22 = vpop.xlane.xlu1 %1719 }
 0x279   :  { %v1776_v20 = vmul.f32 %v4505_v23, %v1720_v22 }
 0x27a   :  { %v1681_v45 = vpop.f32.mrf.mxu3 }
 0x27b   :  { %v4529_v58 = vsub.f32 %v4442_v38, %v1776_v20  ;;  %v4532_v63 = vadd.f32 %v4254_v6, %v1681_v45  ;;  %v1773_v38 = vmul.f32 %v4505_v23, %v1714_v13 }
 0x27d   :  { %1749 = vadd.xlane.f32.xlu2 %v4532_v63  ;;  %v1840_v3 = vmul.f32 %v4529_v58, %v4529_v58  ;;  %v4553_v46 = vsub.f32 %v4428_v44, %v1773_v38  ;;  %v4567_v44 = vsub.f32 %v4422_v47, %v1772_v50  ;;  %v1834_v47 = vmul.f32 %v4573_v2, %v4573_v2 }
 0x27f   :  { %1886 = vadd.xlane.f32.xlu1 %v1840_v3  ;;  %v1837_v61 = vmul.f32 %v4553_v46, %v4553_v46  ;;  %v1836_v19 = vmul.f32 %v4567_v44, %v4567_v44 }
 0x280   :  { %v1722_v0 = vpop.xlane.xlu0 %1721 }
 0x281   :  { %v1777_v16 = vmul.f32 %v4505_v23, %v1722_v0 }
 0x282   :  { %v1684_v56 = vpop.f32.mrf.mxu3 }
 0x283   :  { %v4539_v31 = vsub.f32 %v4446_v35, %v1777_v16  ;;  %v4544_v12 = vadd.f32 %v4254_v6, %v1684_v56 }
 0x285   :  { %v1841_v18 = vmul.f32 %v4539_v31, %v4539_v31 }
 0x287   :  { %1751 = vadd.xlane.f32.xlu1 %v4544_v12  ;;  %1888 = vadd.xlane.f32.xlu2 %v1841_v18 }
 0x288   :  { %v4594_v27 = vpop.xlane.xlu1 %1723 }
 0x28a   :  { %v1686_v35 = vpop.f32.mrf.mxu3 }
 0x28b   :  { %v4557_v13 = vadd.f32 %v4254_v6, %v1686_v35  ;;  %v4570_v6 = vsub.f32 %v4363_v34, %v1768_v15  ;;  %v4585_v34 = vsub.f32 %v4379_v17, %v1769_v36 }
 0x28d   :  { %1753 = vadd.xlane.f32.xlu0 %v4557_v13  ;;  %v1832_v62 = vmul.f32 %v4570_v6, %v4570_v6  ;;  %v1833_v51 = vmul.f32 %v4585_v34, %v4585_v34 }
 0x28f   :  { %1880 = vadd.xlane.f32.xlu1 %v1837_v61  ;;  %1876 = vadd.xlane.f32.xlu2 %v1835_v39 }
 0x290   :  { %v4596_v22 = vpop.xlane.xlu2 %1725 }
 0x295   :  { %1878 = vadd.xlane.f32.xlu0 %v1836_v19 }
 0x297   :  { %1874 = vadd.xlane.f32.xlu1 %v1834_v47  ;;  %1870 = vadd.xlane.f32.xlu2 %v1832_v62 }
 0x298   :  { %v4600_v17 = vpop.xlane.xlu0 %1727 }
 0x29d   :  { %1872 = vadd.xlane.f32.xlu0 %v1833_v51 }
 0x29f   :  { %1868 = vadd.xlane.f32.xlu1 %v1831_v55 }
 0x2a0   :  { %v4598_v20 = vpop.xlane.xlu1 %1729 }
 0x2a8   :  { %v1732_v45 = vpop.xlane.xlu2 %1731 }
 0x2b0   :  { %v4608_v56 = vpop.xlane.xlu0 %1733 }
 0x2b8   :  { %v1736_v3 = vpop.xlane.xlu1 %1735 }
 0x2b9   :  { %v1784_v40 = vmul.f32 %v4505_v23, %v1736_v3 }
 0x2bb   :  { %v4604_v0 = vsub.f32 %v4474_v28, %v1784_v40 }
 0x2bd   :  { %v1848_v16 = vmul.f32 %v4604_v0, %v4604_v0 }
 0x2bf   :  { %1902 = vadd.xlane.f32.xlu0 %v1848_v16 }
 0x2c0   :  { %v1738_v60 = vpop.xlane.xlu2 %1737 }
 0x2c1   :  { %v1785_v38 = vmul.f32 %v4505_v23, %v1738_v60 }
 0x2c3   :  { %v4612_v18 = vsub.f32 %v4480_v54, %v1785_v38 }
 0x2c5   :  { %v1849_v35 = vmul.f32 %v4612_v18, %v4612_v18 }
 0x2c7   :  { %1904 = vadd.xlane.f32.xlu1 %v1849_v35 }
 0x2c8   :  { %v1740_v50 = vpop.xlane.xlu0 %1739 }
 0x2c9   :  { %v1786_v28 = vmul.f32 %v4505_v23, %v1740_v50 }
 0x2cb   :  { %v4618_v15 = vsub.f32 %v4488_v21, %v1786_v28 }
 0x2cd   :  { %v1850_v10 = vmul.f32 %v4618_v15, %v4618_v15 }
 0x2cf   :  { %1906 = vadd.xlane.f32.xlu2 %v1850_v10 }
 0x2d0   :  { %v1742_v61 = vpop.xlane.xlu1 %1741 }
 0x2d1   :  { %v1787_v39 = vmul.f32 %v4505_v23, %v1742_v61 }
 0x2d3   :  { %v4624_v54 = vsub.f32 %v4496_v57, %v1787_v39 }
 0x2d5   :  { %v1851_v36 = vmul.f32 %v4624_v54, %v4624_v54 }
 0x2d7   :  { %1908 = vadd.xlane.f32.xlu0 %v1851_v36 }
 0x2d8   :  { %v1744_v19 = vpop.xlane.xlu2 %1743 }
 0x2d9   :  { %v1788_v4 = vmul.f32 %v4505_v23, %v1744_v19 }
 0x2db   :  { %v4630_v21 = vsub.f32 %v4502_v52, %v1788_v4 }
 0x2dd   :  { %v1852_v47 = vmul.f32 %v4630_v21, %v4630_v21 }
 0x2df   :  { %1910 = vadd.xlane.f32.xlu1 %v1852_v47  ;;  %v1782_v47 = vmul.f32 %v4505_v23, %v1732_v45  ;;  %v1763_v45 = vmul.f32 %v4505_v23, %v4491_v49 }
 0x2e0   :  { %v1746_v62 = vpop.xlane.xlu0 %1745 }
 0x2e1   :  { %v1789_v51 = vmul.f32 %v4505_v23, %v1746_v62 }
 0x2e2   :  { %v1883_v55 = vpop.xlane.xlu2 %1882 }
 0x2e3   :  { %v4636_v57 = vsub.f32 %v4512_v1, %v1789_v51  ;;  %v1934_v40 = vmul.f32 %v1883_v55, %v4505_v23 }
 0x2e5   :  { %v1853_v3 = vmul.f32 %v4636_v57, %v4636_v57  ;;  %v4642_v60 = vadd.f32 1e-05, %v1934_v40  ;;  %v4676_v40 = vsub.f32 %v4466_v29, %v1782_v47  ;;  %v4701_v47 = vsub.f32 %v4280_v14, %v1763_v45 }
 0x2e7   :  { %1912 = vadd.xlane.f32.xlu2 %v1853_v3  ;;  %3364 = vrsqrt.f32 %v4642_v60  ;;  %v1762_v3 = vmul.f32 %v4505_v23, %v4477_v42  ;;  %v1766_v42 = vmul.f32 %v4505_v23, %v4499_v53  ;;  %v1779_v53 = vmul.f32 %v4505_v23, %v4596_v22 }
 0x2e8   :  { %v1748_v16 = vpop.xlane.xlu1 %1747  ;;  %vm2112_vm3 = vweird.f32 %v4642_v60 }
 0x2e9   :  { %v1790_v52 = vmul.f32 %v4505_v23, %v1748_v16  ;;  %v4691_v49 = vsub.f32 %v4263_v32, %v1762_v3  ;;  %v4718_v22 = vsub.f32 %v4326_v25, %v1766_v42 }
 0x2ea   :  { %v1885_v38 = vpop.xlane.xlu0 %1884 }
 0x2eb   :  { %v4645_v35 = vsub.f32 %v4522_v37, %v1790_v52  ;;  %v1935_v50 = vmul.f32 %v1885_v38, %v4505_v23  ;;  %v1764_v38 = vmul.f32 %v4505_v23, %v4483_v8 }
 0x2ed   :  { %v4648_v1 = vadd.f32 1e-05, %v1935_v50  ;;  %v1854_v28 = vmul.f32 %v4645_v35, %v4645_v35  ;;  %v4659_v19 = vpop.eup %3364 }
 0x2ee   :  { %v2107_v55 = vmul.f32 %v4659_v19, %v4642_v60  ;;  %vm2113_vm1 = vweird.f32 %v4659_v19 }
 0x2ef   :  { %3366 = vrsqrt.f32 %v4648_v1  ;;  %1914 = vadd.xlane.f32.xlu0 %v1854_v28  ;;  %vm4782_vm5 = vmor %vm2112_vm3, %vm2113_vm1  ;;  %vm2122_vm6 = vweird.f32 %v4648_v1 }
 0x2f0   :  { %v1750_v10 = vpop.xlane.xlu2 %1749  ;;  %v2108_v50 = vmul.f32 %v4659_v19, %v2107_v55 }
 0x2f1   :  { %v1791_v61 = vmul.f32 %v4505_v23, %v1750_v10 }
 0x2f2   :  { %v1887_v39 = vpop.xlane.xlu1 %1886  ;;  %v2109_v55 = vmul.f32 0.5, %v2108_v50 }
 0x2f3   :  { %v4656_v36 = vsub.f32 %v4532_v63, %v1791_v61  ;;  %v1936_v37 = vmul.f32 %v1887_v39, %v4505_v23 }
 0x2f5   :  { %v4661_v4 = vpop.eup %3366  ;;  %v4664_v62 = vadd.f32 1e-05, %v1936_v37  ;;  %v1855_v51 = vmul.f32 %v4656_v36, %v4656_v36  ;;  %v1846_v37 = vmul.f32 %v4676_v40, %v4676_v40 }
 0x2f6   :  { %v2117_v63 = vmul.f32 %v4661_v4, %v4648_v1  ;;  %vm2123_vm2 = vweird.f32 %v4661_v4 }
 0x2f7   :  { %3368 = vrsqrt.f32 %v4664_v62  ;;  %1916 = vadd.xlane.f32.xlu1 %v1855_v51  ;;  %v1783_v51 = vmul.f32 %v4505_v23, %v4608_v56  ;;  %vm2132_vm7 = vweird.f32 %v4664_v62  ;;  %vm4790_vm8 = vmor %vm2122_vm6, %vm2123_vm2 }
 0x2f8   :  { %v2118_v29 = vmul.f32 %v4661_v4, %v2117_v63  ;;  %v1765_v63 = vmul.f32 %v4505_v23, %v4485_v43 }
 0x2fa   :  { %v1752_v16 = vpop.xlane.xlu1 %1751  ;;  %v1889_v52 = vpop.xlane.xlu2 %1888  ;;  %v2119_v56 = vmul.f32 0.5, %v2118_v29 }
 0x2fb   :  { %v1792_v28 = vmul.f32 %v4505_v23, %v1752_v16  ;;  %v1937_v10 = vmul.f32 %v1889_v52, %v4505_v23  ;;  %v4724_v16 = vmul.f32 %v4691_v49, %v4691_v49  ;;  %v4727_v52 = vsub.f32 %v4454_v24, %v1779_v53 }
 0x2fc   :  { %v4742_v24 = vsub.f32 %v4313_v41, %v1765_v63  ;;  %v1780_v41 = vmul.f32 %v4505_v23, %v4600_v17  ;;  %v1781_v63 = vmul.f32 %v4505_v23, %v4598_v20 }
 0x2fd   :  { %v4688_v61 = vpop.eup %3368  ;;  %v4694_v39 = vsub.f32 %v4544_v12, %v1792_v28  ;;  %v4696_v8 = vadd.f32 1e-05, %v1937_v10  ;;  %v4710_v12 = vsub.f32 %v4293_v59, %v1764_v38  ;;  %v4730_v38 = vsub.f32 %v4470_v11, %v1783_v51 }
 0x2fe   :  { %v2127_v32 = vmul.f32 %v4688_v61, %v4664_v62  ;;  %v4734_v28 = vmul.f32 %v4701_v47, %v4701_v47  ;;  %v2110_v10 = vsub.f32 1.5, %v2109_v55  ;;  %v2120_v11 = vsub.f32 1.5, %v2119_v56 }
 0x2ff   :  { %3370 = vrsqrt.f32 %v4696_v8  ;;  %1898 = vadd.xlane.f32.xlu1 %v1846_v37  ;;  %v1856_v14 = vmul.f32 %v4694_v39, %v4694_v39  ;;  %v1828_v53 = vmul.f32 %v4710_v12, %v4710_v12  ;;  %v1830_v51 = vmul.f32 %v4718_v22, %v4718_v22 }
 0x300   :  { %v2128_v3 = vmul.f32 %v4688_v61, %v2127_v32  ;;  %v1754_v45 = vpop.xlane.xlu0 %1753  ;;  %v1847_v17 = vmul.f32 %v4730_v38, %v4730_v38  ;;  %vm2133_vm4 = vweird.f32 %v4688_v61  ;;  %v4802_v62 = vsub.f32 %v4462_v9, %v1781_v63 }
 0x301   :  { %v1793_v59 = vmul.f32 %v4505_v23, %v1754_v45  ;;  %1918 = vadd.xlane.f32.xlu2 %v1856_v14  ;;  %v1843_v45 = vmul.f32 %v4727_v52, %v4727_v52  ;;  %vm4806_vm9 = vmor %vm2132_vm7, %vm2133_vm4  ;;  %vm2142_vm11 = vweird.f32 %v4696_v8 }
 0x302   :  { %v2129_v43 = vmul.f32 0.5, %v2128_v3  ;;  %v1881_v25 = vpop.xlane.xlu1 %1880  ;;  %v1877_v50 = vpop.xlane.xlu2 %1876 }
 0x303   :  { %v4737_v42 = vsub.f32 %v4557_v13, %v1793_v59  ;;  %v1933_v29 = vmul.f32 %v1881_v25, %v4505_v23  ;;  %v1931_v37 = vmul.f32 %v1877_v50, %v4505_v23  ;;  %v2111_v59 = vmul.f32 %v4659_v19, %v2110_v10 }
 0x304   :  { %v2130_v55 = vsub.f32 1.5, %v2129_v43  ;;  %v2121_v43 = vmul.f32 %v4661_v4, %v2120_v11 }
 0x305   :  { %v4748_v32 = vpop.eup %3370  ;;  %v4750_v14 = vadd.f32 1e-05, %v1933_v29  ;;  %v4752_v13 = vadd.f32 1e-05, %v1931_v37  ;;  %v1857_v3 = vmul.f32 %v4737_v42, %v4737_v42  ;;  %v4778_v29 = vsub.f32 %v4458_v33, %v1780_v41 }
 0x306   :  { %v2137_v56 = vmul.f32 %v4748_v32, %v4696_v8  ;;  %v2131_v50 = vmul.f32 %v4688_v61, %v2130_v55  ;;  %v2115_v1 = vsel %vm4782_vm5, %v4659_v19, %v2111_v59  ;;  %vm2143_vm10 = vweird.f32 %v4748_v32 }
 0x307   :  { %3372 = vrsqrt.f32 %v4750_v14  ;;  %1862 = vadd.xlane.f32.xlu1 %v1828_v53  ;;  %1920 = vadd.xlane.f32.xlu0 %v1857_v3  ;;  %v2318_v37 = vmul.f32 %v2115_v1, %v4509_v26  ;;  %vm4836_vm12 = vmor %vm2142_vm11, %vm2143_vm10  ;;  %v1829_v8 = vmul.f32 %v4742_v24, %v4742_v24  ;;  %vm2102_vm15 = vweird.f32 %v4750_v14 }
 0x308   :  { %v2138_v20 = vmul.f32 %v4748_v32, %v2137_v56  ;;  %3374 = vrsqrt.f32 %v4752_v13  ;;  %v1879_v25 = vpop.xlane.xlu0 %1878  ;;  %v2135_v63 = vsel %vm4806_vm9, %v4688_v61, %v2131_v50  ;;  %v1845_v56 = vmul.f32 %v4802_v62, %v4802_v62 }
 0x309   :  { %v1932_v10 = vmul.f32 %v1879_v25, %v4505_v23  ;;  %1900 = vadd.xlane.f32.xlu2 %v1847_v17  ;;  %v2320_v55 = vmul.f32 %v2135_v63, %v4529_v58  ;;  %vm2082_vm1 = vweird.f32 %v4752_v13 }
 0x30a   :  { %v2139_v60 = vmul.f32 0.5, %v2138_v20  ;;  %v1875_v11 = vpop.xlane.xlu1 %1874  ;;  %v1871_v53 = vpop.xlane.xlu2 %1870  ;;  %v2125_v20 = vsel %vm4790_vm8, %v4661_v4, %v2121_v43  ;;  %v4833_v43 = vld [vmem:[%s5609_s6] ss:$0 sm:$0xff] }
 0x30b   :  { %v4794_v33 = vadd.f32 1e-05, %v1932_v10  ;;  %v1930_v3 = vmul.f32 %v1875_v11, %v4505_v23  ;;  %v1928_v41 = vmul.f32 %v1871_v53, %v4505_v23  ;;  %v2319_v50 = vmul.f32 %v2125_v20, %v4519_v7 }
 0x30c   :  { %v2140_v17 = vsub.f32 1.5, %v2139_v60  ;;  %v2353_v58 = vmul.f32 %v4833_v43, %v2318_v37 }
 0x30d   :  { %v4814_v25 = vpop.eup %3372  ;;  %3376 = vrsqrt.f32 %v4794_v33  ;;  %v4817_v19 = vadd.f32 1e-05, %v1930_v3  ;;  %v4819_v9 = vadd.f32 1e-05, %v1928_v41  ;;  %vm2092_vm3 = vweird.f32 %v4794_v33 }
 0x30e   :  { %v4824_v59 = vpop.eup %3374  ;;  %v2141_v10 = vmul.f32 %v4748_v32, %v2140_v17  ;;  %v2097_v4 = vmul.f32 %v4814_v25, %v4750_v14  ;;  %vm2103_vm13 = vweird.f32 %v4814_v25 }
 0x30f   :  { %v2077_v61 = vmul.f32 %v4824_v59, %v4752_v13  ;;  %3378 = vrsqrt.f32 %v4817_v19  ;;  %1892 = vadd.xlane.f32.xlu1 %v1843_v45  ;;  %1866 = vadd.xlane.f32.xlu0 %v1830_v51  ;;  %v4854_v45 = vmul.f32 %v4505_v23, %v4594_v27  ;;  %vm2083_vm14 = vweird.f32 %v4824_v59  ;;  %vm2104_vm0 = vmor %vm2102_vm15, %vm2103_vm13 }
 0x310   :  { %v2098_v11 = vmul.f32 %v4814_v25, %v2097_v4  ;;  %3380 = vrsqrt.f32 %v4819_v9  ;;  %v1873_v26 = vpop.xlane.xlu0 %1872  ;;  %v2145_v53 = vsel %vm4836_vm12, %v4748_v32, %v2141_v10  ;;  %v1844_v32 = vmul.f32 %v4778_v29, %v4778_v29  ;;  %vm4902_vm2 = vmor %vm2082_vm1, %vm2083_vm14 }
 0x311   :  { %v2078_v51 = vmul.f32 %v4824_v59, %v2077_v61  ;;  %v1929_v3 = vmul.f32 %v1873_v26, %v4505_v23  ;;  %1864 = vadd.xlane.f32.xlu2 %v1829_v8  ;;  %v2321_v7 = vmul.f32 %v2145_v53, %v4539_v31  ;;  %v2354_v10 = vmul.f32 %v4833_v43, %v2319_v50  ;;  %v4883_v50 = vld [vmem:[%s5610_s7] ss:$0 sm:$0xff] }
 0x312   :  { %v2099_v41 = vmul.f32 0.5, %v2098_v11  ;;  %v1869_v1 = vpop.xlane.xlu1 %1868  ;;  %v2355_v61 = vmul.f32 %v4833_v43, %v2320_v55  ;;  %vm2072_vm6 = vweird.f32 %v4817_v19  ;;  %vm2052_vm10 = vweird.f32 %v4819_v9 }
 0x313   :  { %v4864_v17 = vpop.eup %3376  ;;  %v2079_v27 = vmul.f32 0.5, %v2078_v51  ;;  %v4866_v20 = vadd.f32 1e-05, %v1929_v3  ;;  %v1927_v63 = vmul.f32 %v1869_v1, %v4505_v23  ;;  %v2356_v60 = vmul.f32 %v4833_v43, %v2321_v7 }
 0x314   :  { %v2100_v31 = vsub.f32 1.5, %v2099_v41  ;;  %v2087_v4 = vmul.f32 %v4864_v17, %v4794_v33  ;;  %vm2093_vm4 = vweird.f32 %v4864_v17 }
 0x315   :  { %v4874_v8 = vpop.eup %3378  ;;  %v2080_v37 = vsub.f32 1.5, %v2079_v27  ;;  %3382 = vrsqrt.f32 %v4866_v20  ;;  %v4878_v11 = vadd.f32 1e-05, %v1927_v63  ;;  %v2391_v27 = vadd.f32 %v4883_v50, %v2356_v60  ;;  %vm2094_vm7 = vmor %vm2092_vm3, %vm2093_vm4 }
 0x316   :  { %v4885_v26 = vpop.eup %3380  ;;  %v2101_v53 = vmul.f32 %v4814_v25, %v2100_v31  ;;  %v2088_v55 = vmul.f32 %v4864_v17, %v2087_v4  ;;  %v2067_v51 = vmul.f32 %v4874_v8, %v4817_v19  ;;  %v2390_v31 = vadd.f32 %v4883_v50, %v2355_v61 }
 0x317   :  { %v2081_v3 = vmul.f32 %v4824_v59, %v2080_v37  ;;  %v2047_v7 = vmul.f32 %v4885_v26, %v4819_v9  ;;  %3384 = vrsqrt.f32 %v4878_v11  ;;  %1896 = vadd.xlane.f32.xlu0 %v1845_v56  ;;  %v2388_v56 = vadd.f32 %v4883_v50, %v2353_v58  ;;  %2540 = vmatpush.msrb.mxu0 %v2391_v27 }
 0x318   :  { %v2089_v41 = vmul.f32 0.5, %v2088_v55  ;;  %v2068_v1 = vmul.f32 %v4874_v8, %v2067_v51  ;;  %v2105_v4 = vsel %vm2104_vm0, %v4814_v25, %v2101_v53  ;;  %vm2073_vm5 = vweird.f32 %v4874_v8 }
 0x319   :  { %v2048_v63 = vmul.f32 %v4885_v26, %v2047_v7  ;;  %1894 = vadd.xlane.f32.xlu2 %v1844_v32  ;;  %v2317_v55 = vmul.f32 %v2105_v4, %v4553_v46  ;;  %v2085_v60 = vsel %vm4902_vm2, %v4824_v59, %v2081_v3  ;;  %v2389_v32 = vadd.f32 %v4883_v50, %v2354_v10  ;;  %vm4926_vm9 = vmor %vm2072_vm6, %vm2073_vm5 }
 0x31a   :  { %v2090_v37 = vsub.f32 1.5, %v2089_v41  ;;  %v2069_v13 = vmul.f32 0.5, %v2068_v1  ;;  %2541 = vmatpush.msrb.mxu0 %v2390_v31  ;;  %v2315_v33 = vmul.f32 %v2085_v60, %v4550_v30  ;;  %vm2053_vm8 = vweird.f32 %v4885_v26 }
 0x31b   :  { %v3383_v51 = vpop.eup %3382  ;;  %v2049_v61 = vmul.f32 0.5, %v2048_v63  ;;  %v2352_v3 = vmul.f32 %v4833_v43, %v2317_v55  ;;  %vm4945_vm11 = vmor %vm2052_vm10, %vm2053_vm8  ;;  %vm2062_vm13 = vweird.f32 %v4866_v20  ;;  %vm2042_vm0 = vweird.f32 %v4878_v11 }
 0x31c   :  { %v2091_v58 = vmul.f32 %v4864_v17, %v2090_v37  ;;  %v2070_v25 = vsub.f32 1.5, %v2069_v13  ;;  %v2057_v53 = vmul.f32 %v3383_v51, %v4866_v20  ;;  %2542 = vmatpush.msrb.mxu0 %v2389_v32  ;;  %v4941_v37 = vsub.f32 %v4450_v5, %v4854_v45 }
 0x31d   :  { %v3385_v46 = vpop.eup %3384  ;;  %v2050_v59 = vsub.f32 1.5, %v2049_v61  ;;  %v2387_v27 = vadd.f32 %v4883_v50, %v2352_v3  ;;  %vm2063_vm12 = vweird.f32 %v3383_v51 }
 0x31e   :  { %v2071_v7 = vmul.f32 %v4874_v8, %v2070_v25  ;;  %v2058_v10 = vmul.f32 %v3383_v51, %v2057_v53  ;;  %v2037_v41 = vmul.f32 %v3385_v46, %v4878_v11  ;;  %v2095_v30 = vsel %vm2094_vm7, %v4864_v17, %v2091_v58  ;;  %2543 = vmatpush.msrb.mxu0 %v2388_v56  ;;  %vm2064_vm15 = vmor %vm2062_vm13, %vm2063_vm12 }
 0x31f   :  { %v2051_v19 = vmul.f32 %v4885_v26, %v2050_v59  ;;  %1860 = vadd.xlane.f32.xlu0 %v4734_v28  ;;  %v2316_v31 = vmul.f32 %v2095_v30, %v4567_v44  ;;  %v2350_v28 = vmul.f32 %v4833_v43, %v2315_v33  ;;  %vm2043_vm14 = vweird.f32 %v3385_v46 }
 0x320   :  { %v2059_v14 = vmul.f32 0.5, %v2058_v10  ;;  %v2038_v63 = vmul.f32 %v3385_v46, %v2037_v41  ;;  %v2075_v4 = vsel %vm4926_vm9, %v4874_v8, %v2071_v7  ;;  %2544 = vmatpush.msrb.mxu0 %v2387_v27  ;;  %vm2044_vm1 = vmor %vm2042_vm0, %vm2043_vm14 }
 0x321   :  { %1858 = vadd.xlane.f32.xlu2 %v4724_v16  ;;  %v2314_v44 = vmul.f32 %v2075_v4, %v4573_v2  ;;  %v2351_v8 = vmul.f32 %v4833_v43, %v2316_v31  ;;  %v2055_v5 = vsel %vm4945_vm11, %v4885_v26, %v2051_v19  ;;  %v1842_v2 = vmul.f32 %v4941_v37, %v4941_v37 }
 0x322   :  { %v2060_v17 = vsub.f32 1.5, %v2059_v14  ;;  %v2039_v56 = vmul.f32 0.5, %v2038_v63  ;;  %v2312_v60 = vmul.f32 %v2055_v5, %v4570_v6  ;;  %v2385_v20 = vadd.f32 %v4883_v50, %v2350_v28 }
 0x323   :  { %v2386_v16 = vadd.f32 %v4883_v50, %v2351_v8  ;;  %v2349_v55 = vmul.f32 %v4833_v43, %v2314_v44 }
 0x324   :  { %v2061_v45 = vmul.f32 %v3383_v51, %v2060_v17  ;;  %v2040_v13 = vsub.f32 1.5, %v2039_v56  ;;  %v2347_v59 = vmul.f32 %v4833_v43, %v2312_v60 }
 0x325   :  { %2545 = vmatpush.msrb.mxu0 %v2386_v16  ;;  %v2384_v58 = vadd.f32 %v4883_v50, %v2349_v55 }
 0x326   :  { %v2041_v61 = vmul.f32 %v3385_v46, %v2040_v13  ;;  %v2065_v26 = vsel %vm2064_vm15, %v3383_v51, %v2061_v45  ;;  %v2382_v51 = vadd.f32 %v4883_v50, %v2347_v59 }
 0x327   :  { %1890 = vadd.xlane.f32.xlu0 %v1842_v2  ;;  %v2313_v32 = vmul.f32 %v2065_v26, %v4585_v34  ;;  %2546 = vmatpush.msrb.mxu0 %v2385_v20 }
 0x328   :  { %v2045_v25 = vsel %vm2044_vm1, %v3385_v46, %v2041_v61 }
 0x329   :  { %v2348_v53 = vmul.f32 %v4833_v43, %v2313_v32  ;;  %v2311_v6 = vmul.f32 %v2045_v25, %v4588_v48  ;;  %2547 = vmatpush.msrb.mxu0 %v2384_v58 }
 0x32b   :  { %v2383_v11 = vadd.f32 %v4883_v50, %v2348_v53  ;;  %v2346_v3 = vmul.f32 %v4833_v43, %v2311_v6 }
 0x32d   :  { %2548 = vmatpush.msrb.mxu0 %v2383_v11  ;;  %v2381_v34 = vadd.f32 %v4883_v50, %v2346_v3 }
 0x32f   :  { %2549 = vmatpush.msrb.mxu0 %v2382_v51 }
 0x331   :  { %2550 = vmatpush.msrb.mxu0 %v2381_v34 }
 0x332   :  { %v1903_v33 = vpop.xlane.xlu0 %1902 }
 0x333   :  { %v1944_v10 = vmul.f32 %v1903_v33, %v4505_v23 }
 0x335   :  { %v1976_v1 = vadd.f32 1e-05, %v1944_v10 }
 0x337   :  { %3386 = vrsqrt.f32 %v1976_v1  ;;  %vm2212_vm4 = vweird.f32 %v1976_v1 }
 0x33a   :  { %v1905_v46 = vpop.xlane.xlu1 %1904 }
 0x33b   :  { %v1945_v19 = vmul.f32 %v1905_v46, %v4505_v23 }
 0x33d   :  { %v4981_v31 = vadd.f32 1e-05, %v1945_v19  ;;  %v4989_v44 = vpop.eup %3386 }
 0x33e   :  { %v2207_v8 = vmul.f32 %v4989_v44, %v1976_v1  ;;  %vm2213_vm2 = vweird.f32 %v4989_v44 }
 0x33f   :  { %vm5040_vm5 = vmor %vm2212_vm4, %vm2213_vm2  ;;  %vm2222_vm7 = vweird.f32 %v4981_v31 }
 0x340   :  { %v2208_v61 = vmul.f32 %v4989_v44, %v2207_v8 }
 0x342   :  { %v1907_v7 = vpop.xlane.xlu2 %1906  ;;  %v2209_v53 = vmul.f32 0.5, %v2208_v61 }
 0x343   :  { %v1946_v41 = vmul.f32 %v1907_v7, %v4505_v23 }
 0x344   :  { %v2210_v46 = vsub.f32 1.5, %v2209_v53 }
 0x345   :  { %v4977_v30 = vadd.f32 1e-05, %v1946_v41 }
 0x347   :  { %3388 = vrsqrt.f32 %v4977_v30  ;;  %vm2232_vm6 = vweird.f32 %v4977_v30 }
 0x348   :  { %3390 = vrsqrt.f32 %v4981_v31 }
 0x34a   :  { %v1909_v48 = vpop.xlane.xlu0 %1908 }
 0x34b   :  { %v1947_v14 = vmul.f32 %v1909_v48, %v4505_v23 }
 0x34d   :  { %v4984_v4 = vadd.f32 1e-05, %v1947_v14  ;;  %v4993_v56 = vpop.eup %3388 }
 0x34e   :  { %v4997_v5 = vpop.eup %3390  ;;  %v2227_v45 = vmul.f32 %v4993_v56, %v4977_v30  ;;  %vm2233_vm3 = vweird.f32 %v4993_v56 }
 0x34f   :  { %3392 = vrsqrt.f32 %v4984_v4  ;;  %v2217_v20 = vmul.f32 %v4997_v5, %v4981_v31  ;;  %vm2223_vm8 = vweird.f32 %v4997_v5  ;;  %vm5050_vm9 = vmor %vm2232_vm6, %vm2233_vm3  ;;  %vm2242_vm13 = vweird.f32 %v4984_v4 }
 0x350   :  { %v2228_v26 = vmul.f32 %v4993_v56, %v2227_v45  ;;  %vm5078_vm12 = vmor %vm2222_vm7, %vm2223_vm8 }
 0x351   :  { %v2218_v59 = vmul.f32 %v4997_v5, %v2217_v20 }
 0x352   :  { %v1911_v27 = vpop.xlane.xlu1 %1910  ;;  %v2229_v6 = vmul.f32 0.5, %v2228_v26 }
 0x353   :  { %v1948_v63 = vmul.f32 %v1911_v27, %v4505_v23  ;;  %v2219_v7 = vmul.f32 0.5, %v2218_v59 }
 0x354   :  { %v2230_v41 = vsub.f32 1.5, %v2229_v6 }
 0x355   :  { %v4986_v9 = vadd.f32 1e-05, %v1948_v63  ;;  %v5003_v55 = vpop.eup %3392 }
 0x356   :  { %v2237_v58 = vmul.f32 %v5003_v55, %v4984_v4  ;;  %v2231_v8 = vmul.f32 %v4993_v56, %v2230_v41  ;;  %vm2243_vm10 = vweird.f32 %v5003_v55 }
 0x357   :  { %3394 = vrsqrt.f32 %v4986_v9  ;;  %vm5087_vm14 = vmor %vm2242_vm13, %vm2243_vm10  ;;  %vm2252_vm15 = vweird.f32 %v4986_v9 }
 0x358   :  { %v2238_v11 = vmul.f32 %v5003_v55, %v2237_v58 }
 0x35a   :  { %v1913_v28 = vpop.xlane.xlu2 %1912  ;;  %v2239_v19 = vmul.f32 0.5, %v2238_v11 }
 0x35b   :  { %v1949_v17 = vmul.f32 %v1913_v28, %v4505_v23  ;;  %v2211_v28 = vmul.f32 %v4989_v44, %v2210_v46 }
 0x35c   :  { %v2240_v45 = vsub.f32 1.5, %v2239_v19 }
 0x35d   :  { %v5001_v13 = vadd.f32 1e-05, %v1949_v17  ;;  %v5006_v60 = vpop.eup %3394  ;;  %v2220_v17 = vsub.f32 1.5, %v2219_v7  ;;  %v2215_v30 = vsel %vm5040_vm5, %v4989_v44, %v2211_v28 }
 0x35e   :  { %v2247_v25 = vmul.f32 %v5006_v60, %v4986_v9  ;;  %vm2253_vm11 = vweird.f32 %v5006_v60 }
 0x35f   :  { %3396 = vrsqrt.f32 %v5001_v13  ;;  %vm5099_vm0 = vmor %vm2252_vm15, %vm2253_vm11  ;;  %vm2262_vm3 = vweird.f32 %v5001_v13 }
 0x360   :  { %v2248_v34 = vmul.f32 %v5006_v60, %v2247_v25  ;;  %v2221_v25 = vmul.f32 %v4997_v5, %v2220_v17 }
 0x362   :  { %v1915_v16 = vpop.xlane.xlu0 %1914  ;;  %v2249_v14 = vmul.f32 0.5, %v2248_v34  ;;  %v2241_v34 = vmul.f32 %v5003_v55, %v2240_v45  ;;  %v2225_v4 = vsel %vm5078_vm12, %v4997_v5, %v2221_v25 }
 0x363   :  { %v1950_v2 = vmul.f32 %v1915_v16, %v4505_v23  ;;  %v2329_v61 = vmul.f32 %v2225_v4, %v4612_v18 }
 0x364   :  { %v2250_v20 = vsub.f32 1.5, %v2249_v14  ;;  %v2245_v9 = vsel %vm5087_vm14, %v5003_v55, %v2241_v34 }
 0x365   :  { %v5013_v32 = vadd.f32 1e-05, %v1950_v2  ;;  %v5022_v51 = vpop.eup %3396 }
 0x366   :  { %v2257_v27 = vmul.f32 %v5022_v51, %v5001_v13  ;;  %v2251_v46 = vmul.f32 %v5006_v60, %v2250_v20  ;;  %vm2263_vm1 = vweird.f32 %v5022_v51 }
 0x367   :  { %3398 = vrsqrt.f32 %v5013_v32  ;;  %vm5138_vm4 = vmor %vm2262_vm3, %vm2263_vm1  ;;  %vm2272_vm5 = vweird.f32 %v5013_v32 }
 0x368   :  { %v2258_v16 = vmul.f32 %v5022_v51, %v2257_v27  ;;  %v2328_v27 = vmul.f32 %v2215_v30, %v4604_v0  ;;  %v2255_v5 = vsel %vm5099_vm0, %v5006_v60, %v2251_v46  ;;  %v2331_v30 = vmul.f32 %v2245_v9, %v4624_v54 }
 0x369   :  { %v2332_v60 = vmul.f32 %v2255_v5, %v4630_v21  ;;  %v5167_v9 = vmul.f32 %v4833_v43, %v2329_v61 }
 0x36a   :  { %v1917_v3 = vpop.xlane.xlu1 %1916  ;;  %v2363_v20 = vmul.f32 %v4833_v43, %v2328_v27 }
 0x36b   :  { %v1951_v33 = vmul.f32 %v1917_v3, %v4505_v23  ;;  %v2235_v3 = vsel %vm5050_vm9, %v4993_v56, %v2231_v8  ;;  %v2367_v56 = vmul.f32 %v4833_v43, %v2332_v60 }
 0x36c   :  { %v2330_v19 = vmul.f32 %v2235_v3, %v4618_v15  ;;  %v5152_v27 = vadd.f32 %v4883_v50, %v2363_v20 }
 0x36d   :  { %v5026_v10 = vpop.eup %3398  ;;  %v5028_v48 = vadd.f32 1e-05, %v1951_v33  ;;  %v2259_v33 = vmul.f32 0.5, %v2258_v16 }
 0x36e   :  { %v2267_v63 = vmul.f32 %v5026_v10, %v5013_v32  ;;  %vm2273_vm2 = vweird.f32 %v5026_v10 }
 0x36f   :  { %3400 = vrsqrt.f32 %v5028_v48  ;;  %v2260_v15 = vsub.f32 1.5, %v2259_v33  ;;  %vm5144_vm6 = vmor %vm2272_vm5, %vm2273_vm2  ;;  %vm2282_vm8 = vweird.f32 %v5028_v48 }
 0x370   :  { %v2268_v26 = vmul.f32 %v5026_v10, %v2267_v63 }
 0x372   :  { %v1899_v2 = vpop.xlane.xlu1 %1898  ;;  %v2269_v7 = vmul.f32 0.5, %v2268_v26 }
 0x373   :  { %v1942_v58 = vmul.f32 %v1899_v2, %v4505_v23  ;;  %v2365_v2 = vmul.f32 %v4833_v43, %v2330_v19  ;;  %v2366_v19 = vmul.f32 %v4833_v43, %v2331_v30 }
 0x374   :  { %v1919_v53 = vpop.xlane.xlu2 %1918  ;;  %v2270_v17 = vsub.f32 1.5, %v2269_v7 }
 0x375   :  { %v5057_v59 = vpop.eup %3400  ;;  %v5060_v6 = vadd.f32 1e-05, %v1942_v58  ;;  %v1952_v11 = vmul.f32 %v1919_v53, %v4505_v23  ;;  %v2261_v53 = vmul.f32 %v5022_v51, %v2260_v15 }
 0x376   :  { %v2277_v44 = vmul.f32 %v5057_v59, %v5028_v48  ;;  %vm2283_vm7 = vweird.f32 %v5057_v59 }
 0x377   :  { %3402 = vrsqrt.f32 %v5060_v6  ;;  %v5072_v41 = vadd.f32 1e-05, %v1952_v11  ;;  %v2271_v11 = vmul.f32 %v5026_v10, %v2270_v17  ;;  %v2265_v4 = vsel %vm5138_vm4, %v5022_v51, %v2261_v53  ;;  %vm5195_vm9 = vmor %vm2282_vm8, %vm2283_vm7 }
 0x378   :  { %v2278_v31 = vmul.f32 %v5057_v59, %v2277_v44  ;;  %v2333_v61 = vmul.f32 %v2265_v4, %v4636_v57  ;;  %v5193_v53 = vadd.f32 %v4883_v50, %v2366_v19  ;;  %vm2192_vm2 = vweird.f32 %v5060_v6 }
 0x379   :  { %3404 = vrsqrt.f32 %v5072_v41  ;;  %vm2292_vm12 = vweird.f32 %v5072_v41 }
 0x37a   :  { %v1863_v63 = vpop.xlane.xlu1 %1862  ;;  %v1921_v28 = vpop.xlane.xlu0 %1920  ;;  %v2279_v58 = vmul.f32 0.5, %v2278_v31  ;;  %v2275_v31 = vsel %vm5144_vm6, %v5026_v10, %v2271_v11 }
 0x37b   :  { %v1924_v8 = vmul.f32 %v1863_v63, %v4505_v23  ;;  %v1953_v45 = vmul.f32 %v1921_v28, %v4505_v23  ;;  %v5164_v28 = vadd.f32 %v4883_v50, %v2365_v2  ;;  %v2334_v2 = vmul.f32 %v2275_v31, %v4645_v35 }
 0x37c   :  { %v1901_v16 = vpop.xlane.xlu2 %1900  ;;  %v2280_v33 = vsub.f32 1.5, %v2279_v58 }
 0x37d   :  { %v5114_v26 = vpop.eup %3402  ;;  %v5116_v55 = vadd.f32 1e-05, %v1924_v8  ;;  %v5118_v25 = vadd.f32 1e-05, %v1953_v45  ;;  %v1943_v1 = vmul.f32 %v1901_v16, %v4505_v23  ;;  %v2369_v44 = vmul.f32 %v4833_v43, %v2334_v2 }
 0x37e   :  { %v2187_v34 = vmul.f32 %v5114_v26, %v5060_v6  ;;  %v2281_v8 = vmul.f32 %v5057_v59, %v2280_v33  ;;  %vm2193_vm14 = vweird.f32 %v5114_v26 }
 0x37f   :  { %v5125_v18 = vpop.eup %3404  ;;  %3406 = vrsqrt.f32 %v5116_v55  ;;  %v5130_v3 = vadd.f32 1e-05, %v1943_v1  ;;  %v5190_v1 = vadd.f32 %v4883_v50, %v2367_v56  ;;  %vm2012_vm13 = vweird.f32 %v5116_v55 }
 0x380   :  { %v2287_v21 = vmul.f32 %v5125_v18, %v5072_v41  ;;  %3408 = vrsqrt.f32 %v5118_v25  ;;  %v2188_v0 = vmul.f32 %v5114_v26, %v2187_v34  ;;  %vm2293_vm10 = vweird.f32 %v5125_v18 }
 0x381   :  { %3410 = vrsqrt.f32 %v5130_v3  ;;  %vm5234_vm15 = vmor %vm2292_vm12, %vm2293_vm10  ;;  %vm2302_vm0 = vweird.f32 %v5118_v25 }
 0x382   :  { %v2288_v13 = vmul.f32 %v5125_v18, %v2287_v21  ;;  %v1893_v46 = vpop.xlane.xlu1 %1892  ;;  %v1867_v7 = vpop.xlane.xlu0 %1866  ;;  %v2189_v35 = vmul.f32 0.5, %v2188_v0  ;;  %v2285_v21 = vsel %vm5195_vm9, %v5057_v59, %v2281_v8 }
 0x383   :  { %v1939_v32 = vmul.f32 %v1893_v46, %v4505_v23  ;;  %v1926_v14 = vmul.f32 %v1867_v7, %v4505_v23 }
 0x384   :  { %v2289_v15 = vmul.f32 0.5, %v2288_v13  ;;  %v1865_v63 = vpop.xlane.xlu2 %1864  ;;  %v5212_v13 = vmul.f32 %v4833_v43, %v2333_v61  ;;  %v2190_v56 = vsub.f32 1.5, %v2189_v35 }
 0x385   :  { %v5169_v17 = vpop.eup %3406  ;;  %v5173_v10 = vadd.f32 1e-05, %v1926_v14  ;;  %v1925_v51 = vmul.f32 %v1865_v63, %v4505_v23  ;;  %v5180_v16 = vadd.f32 1e-05, %v1939_v32  ;;  %v2335_v14 = vmul.f32 %v2285_v21, %v4656_v36 }
 0x386   :  { %v5176_v45 = vpop.eup %3408  ;;  %v2007_v5 = vmul.f32 %v5169_v17, %v5116_v55  ;;  %v2290_v30 = vsub.f32 1.5, %v2289_v15  ;;  %v5227_v63 = vadd.f32 %v4883_v50, %v2369_v44  ;;  %vm2013_vm3 = vweird.f32 %v5169_v17 }
 0x387   :  { %v5184_v20 = vpop.eup %3410  ;;  %v2297_v58 = vmul.f32 %v5176_v45, %v5118_v25  ;;  %3412 = vrsqrt.f32 %v5173_v10  ;;  %v5204_v34 = vadd.f32 1e-05, %v1925_v51  ;;  %vm2303_vm11 = vweird.f32 %v5176_v45  ;;  %vm5286_vm6 = vmor %vm2012_vm13, %vm2013_vm3 }
 0x388   :  { %v2008_v57 = vmul.f32 %v5169_v17, %v2007_v5  ;;  %v2197_v48 = vmul.f32 %v5184_v20, %v5130_v3  ;;  %3414 = vrsqrt.f32 %v5180_v16  ;;  %v2291_v19 = vmul.f32 %v5125_v18, %v2290_v30  ;;  %vm5247_vm1 = vmor %vm2302_vm0, %vm2303_vm11 }
 0x389   :  { %v2298_v11 = vmul.f32 %v5176_v45, %v2297_v58  ;;  %3416 = vrsqrt.f32 %v5204_v34  ;;  %v2370_v60 = vmul.f32 %v4833_v43, %v2335_v14  ;;  %v5260_v30 = vmul.f32 %v5114_v26, %v2190_v56  ;;  %vm5324_vm11 = vmor %vm2192_vm2, %vm2193_vm14 }
 0x38a   :  { %v2009_v54 = vmul.f32 0.5, %v2008_v57  ;;  %v1897_v33 = vpop.xlane.xlu0 %1896  ;;  %v2198_v59 = vmul.f32 %v5184_v20, %v2197_v48  ;;  %v2295_v25 = vsel %vm5234_vm15, %v5125_v18, %v2291_v19  ;;  %vm2032_vm4 = vweird.f32 %v5173_v10 }
 0x38b   :  { %v2299_v46 = vmul.f32 0.5, %v2298_v11  ;;  %v1941_v7 = vmul.f32 %v1897_v33, %v4505_v23  ;;  %vm2022_vm5 = vweird.f32 %v5204_v34  ;;  %v2336_v44 = vmul.f32 %v2295_v25, %v4694_v39 }
 0x38c   :  { %v1895_v32 = vpop.xlane.xlu2 %1894  ;;  %v2010_v15 = vsub.f32 1.5, %v2009_v54  ;;  %v2199_v61 = vmul.f32 0.5, %v2198_v59  ;;  %vm2203_vm7 = vweird.f32 %v5184_v20  ;;  %vm2202_vm13 = vweird.f32 %v5130_v3 }
 0x38d   :  { %v2300_v31 = vsub.f32 1.5, %v2299_v46  ;;  %v5221_v4 = vadd.f32 1e-05, %v1941_v7  ;;  %v1940_v0 = vmul.f32 %v1895_v32, %v4505_v23  ;;  %v5229_v8 = vpop.eup %3412  ;;  %v2371_v2 = vmul.f32 %v4833_v43, %v2336_v44  ;;  %vm5362_vm14 = vmor %vm2202_vm13, %vm2203_vm7 }
 0x38e   :  { %v5243_v5 = vpop.eup %3414  ;;  %v2027_v58 = vmul.f32 %v5229_v8, %v5173_v10  ;;  %v2011_v48 = vmul.f32 %v5169_v17, %v2010_v15  ;;  %v2200_v46 = vsub.f32 1.5, %v2199_v61  ;;  %vm2033_vm8 = vweird.f32 %v5229_v8 }
 0x38f   :  { %v2301_v51 = vmul.f32 %v5176_v45, %v2300_v31  ;;  %3418 = vrsqrt.f32 %v5221_v4  ;;  %v5241_v41 = vadd.f32 1e-05, %v1940_v0  ;;  %v5257_v35 = vpop.eup %3416  ;;  %vm2034_vm10 = vmor %vm2032_vm4, %vm2033_vm8  ;;  %vm2163_vm15 = vweird.f32 %v5243_v5 }
 0x390   :  { %v2028_v18 = vmul.f32 %v5229_v8, %v2027_v58  ;;  %v2017_v11 = vmul.f32 %v5257_v35, %v5204_v34  ;;  %v2015_v55 = vsel %vm5286_vm6, %v5169_v17, %v2011_v48  ;;  %vm2023_vm9 = vweird.f32 %v5257_v35 }
 0x391   :  { %3420 = vrsqrt.f32 %v5241_v41  ;;  %v2305_v57 = vsel %vm5247_vm1, %v5176_v45, %v2301_v51  ;;  %v2157_v45 = vmul.f32 %v5243_v5, %v5180_v16  ;;  %vm2024_vm12 = vmor %vm2022_vm5, %vm2023_vm9  ;;  %v2195_v34 = vsel %vm5324_vm11, %v5114_v26, %v5260_v30 }
 0x392   :  { %v1861_v21 = vpop.xlane.xlu0 %1860  ;;  %v2337_v33 = vmul.f32 %v2305_v57, %v4737_v42  ;;  %v2029_v7 = vmul.f32 0.5, %v2028_v18  ;;  %v2018_v56 = vmul.f32 %v5257_v35, %v2017_v11  ;;  %v2308_v18 = vmul.f32 %v2015_v55, %v4710_v12 }
 0x393   :  { %v1923_v54 = vmul.f32 %v1861_v21, %v4505_v23  ;;  %v2158_v17 = vmul.f32 %v5243_v5, %v2157_v45  ;;  %v2406_v12 = vadd.f32 %v4883_v50, %v2371_v2  ;;  %v2405_v45 = vadd.f32 %v4883_v50, %v2370_v60 }
 0x394   :  { %v1859_v19 = vpop.xlane.xlu2 %1858  ;;  %v2372_v14 = vmul.f32 %v4833_v43, %v2337_v33  ;;  %v2030_v31 = vsub.f32 1.5, %v2029_v7  ;;  %v2019_v0 = vmul.f32 0.5, %v2018_v56  ;;  %v2201_v56 = vmul.f32 %v5184_v20, %v2200_v46 }
 0x395   :  { %v5280_v59 = vpop.eup %3418  ;;  %v5292_v39 = vadd.f32 1e-05, %v1923_v54  ;;  %v1922_v42 = vmul.f32 %v1859_v19, %v4505_v23  ;;  %v2343_v46 = vmul.f32 %v4833_v43, %v2308_v18  ;;  %v2403_v55 = vadd.f32 %v4883_v50, %v5212_v13 }
 0x396   :  { %v2177_v15 = vmul.f32 %v5280_v59, %v5221_v4  ;;  %v2031_v61 = vmul.f32 %v5229_v8, %v2030_v31  ;;  %v2020_v58 = vsub.f32 1.5, %v2019_v0  ;;  %v2407_v48 = vadd.f32 %v4883_v50, %v2372_v14 }
 0x397   :  { %v5301_v36 = vpop.eup %3420  ;;  %3422 = vrsqrt.f32 %v5292_v39  ;;  %v5305_v51 = vadd.f32 1e-05, %v1922_v42  ;;  %v2159_v42 = vmul.f32 0.5, %v2158_v17  ;;  %v2326_v2 = vmul.f32 %v2195_v34, %v4676_v40 }
 0x398   :  { %v2178_v25 = vmul.f32 %v5280_v59, %v2177_v15  ;;  %v2167_v57 = vmul.f32 %v5301_v36, %v5241_v41  ;;  %v2021_v21 = vmul.f32 %v5257_v35, %v2020_v58  ;;  %v2035_v44 = vsel %vm2034_vm10, %v5229_v8, %v2031_v61  ;;  %2605 = vmatpush.msrb.mxu1 %v2407_v48 }
 0x399   :  { %3424 = vrsqrt.f32 %v5305_v51  ;;  %v2310_v7 = vmul.f32 %v2035_v44, %v4718_v22  ;;  %v2160_v61 = vsub.f32 1.5, %v2159_v42  ;;  %vm2183_vm0 = vweird.f32 %v5280_v59 }
 0x39a   :  { %v2179_v54 = vmul.f32 0.5, %v2178_v25  ;;  %v2168_v10 = vmul.f32 %v5301_v36, %v2167_v57  ;;  %v1891_v33 = vpop.xlane.xlu0 %1890  ;;  %v2025_v32 = vsel %vm2024_vm12, %v5257_v35, %v2021_v21  ;;  %2606 = vmatpush.msrb.mxu1 %v2406_v12  ;;  %v2205_v25 = vsel %vm5362_vm14, %v5184_v20, %v2201_v56 }
 0x39b   :  { %v1938_v6 = vmul.f32 %v1891_v33, %v4505_v23  ;;  %v2345_v23 = vmul.f32 %v4833_v43, %v2310_v7  ;;  %v2309_v22 = vmul.f32 %v2025_v32, %v4742_v24  ;;  %vm2182_vm1 = vweird.f32 %v5221_v4 }
 0x39c   :  { %v2169_v19 = vmul.f32 0.5, %v2168_v10  ;;  %v2180_v60 = vsub.f32 1.5, %v2179_v54  ;;  %2607 = vmatpush.msrb.mxu1 %v2405_v45  ;;  %vm2173_vm2 = vweird.f32 %v5301_v36  ;;  %v2327_v18 = vmul.f32 %v2205_v25, %v4730_v38  ;;  %vm5392_vm4 = vmor %vm2182_vm1, %vm2183_vm0 }
 0x39d   :  { %v5345_v8 = vpop.eup %3422  ;;  %v5347_v14 = vadd.f32 1e-05, %v1938_v6  ;;  %v2380_v30 = vadd.f32 %v4883_v50, %v2345_v23  ;;  %v2344_v0 = vmul.f32 %v4833_v43, %v2309_v22  ;;  %v2161_v21 = vmul.f32 %v5243_v5, %v2160_v61 }
 0x39e   :  { %v1997_v35 = vmul.f32 %v5345_v8, %v5292_v39  ;;  %v2170_v26 = vsub.f32 1.5, %v2169_v19  ;;  %2608 = vmatpush.msrb.mxu1 %v5227_v63  ;;  %v2181_v57 = vmul.f32 %v5280_v59, %v2180_v60  ;;  %v2378_v63 = vadd.f32 %v4883_v50, %v2343_v46 }
 0x39f   :  { %v5355_v31 = vpop.eup %3424  ;;  %3426 = vrsqrt.f32 %v5347_v14  ;;  %2551 = vmatpush.msrb.mxu0 %v2380_v30  ;;  %v2379_v58 = vadd.f32 %v4883_v50, %v2344_v0  ;;  %vm2003_vm3 = vweird.f32 %v5345_v8  ;;  %vm2172_vm5 = vweird.f32 %v5241_v41 }
 0x3a0   :  { %v1998_v3 = vmul.f32 %v5345_v8, %v1997_v35  ;;  %v1987_v15 = vmul.f32 %v5355_v31, %v5305_v51  ;;  %v2171_v40 = vmul.f32 %v5301_v36, %v2170_v26  ;;  %2609 = vmatpush.msrb.mxu1 %v2403_v55  ;;  %vm2002_vm6 = vweird.f32 %v5292_v39  ;;  %vm5402_vm8 = vmor %vm2172_vm5, %vm2173_vm2 }
 0x3a1   :  { %2552 = vmatpush.msrb.mxu0 %v2379_v58  ;;  %vm1993_vm7 = vweird.f32 %v5355_v31  ;;  %v2185_v41 = vsel %vm5392_vm4, %v5280_v59, %v2181_v57  ;;  %vm2162_vm9 = vweird.f32 %v5180_v16  ;;  %vm2004_vm10 = vmor %vm2002_vm6, %vm2003_vm3  ;;  %vm1992_vm11 = vweird.f32 %v5305_v51 }
 0x3a2   :  { %v1999_v17 = vmul.f32 0.5, %v1998_v3  ;;  %v1988_v13 = vmul.f32 %v5355_v31, %v1987_v15  ;;  %2610 = vmatpush.msrb.mxu1 %v5190_v1  ;;  %v2175_v1 = vsel %vm5402_vm8, %v5301_v36, %v2171_v40  ;;  %v2408_v39 = vlaneseq  ;;  %vm5422_vm12 = vmor %vm2162_vm9, %vm2163_vm15 }
 0x3a3   :  { %2553 = vmatpush.msrb.mxu0 %v2378_v63  ;;  %v2362_v12 = vmul.f32 %v4833_v43, %v2327_v18  ;;  %vm1994_vm13 = vmor %vm1992_vm11, %vm1993_vm7  ;;  %v2399_v36 = vadd.f32 %v4883_v50, %v5167_v9  ;;  %v2361_v6 = vmul.f32 %v4833_v43, %v2326_v2  ;;  %v2325_v7 = vmul.f32 %v2185_v41, %v4802_v62 }
 0x3a4   :  { %v2000_v48 = vsub.f32 1.5, %v1999_v17  ;;  %v1989_v20 = vmul.f32 0.5, %v1988_v13  ;;  %2611 = vmatpush.msrb.mxu1 %v5193_v53  ;;  %v2425_v53 = vld [vmem:[%s5611_s0] sm:$0x3]  ;;  %v2324_v32 = vmul.f32 %v2175_v1, %v4778_v29  ;;  %v2165_v34 = vsel %vm5422_vm12, %v5243_v5, %v2161_v21 }
 0x3a5   :  { %v5387_v11 = vpop.eup %3426  ;;  %v5450_v42 = vperm.slane %v2425_v53, 0  ;;  %v2397_v62 = vadd.f32 %v4883_v50, %v2362_v12  ;;  %v2360_v5 = vmul.f32 %v4833_v43, %v2325_v7  ;;  %v2323_v22 = vmul.f32 %v2165_v34, %v4727_v52 }
 0x3a6   :  { %v2001_v54 = vmul.f32 %v5345_v8, %v2000_v48  ;;  %v1990_v10 = vsub.f32 1.5, %v1989_v20  ;;  %v2147_v33 = vmul.f32 %v5387_v11, %v5347_v14  ;;  %2612 = vmatpush.msrb.mxu1 %v5164_v28  ;;  %vm2153_vm14 = vweird.f32 %v5387_v11 }
 0x3a7   :  { %vm2152_vm15 = vweird.f32 %v5347_v14  ;;  %v2396_v60 = vadd.f32 %v4883_v50, %v2361_v6  ;;  %v2395_v52 = vadd.f32 %v4883_v50, %v2360_v5  ;;  %v3429_v14 = vld [vmem:[%s5609_s6] ss:$0 sm:$0xff]  ;;  %v3431_v30 = vmov 1.0  }
 0x3a8   :  { %v1991_v16 = vmul.f32 %v5355_v31, %v1990_v10  ;;  %v2148_v59 = vmul.f32 %v5387_v11, %v2147_v33  ;;  %v2005_v51 = vsel %vm2004_vm10, %v5345_v8, %v2001_v54  ;;  %2613 = vmatpush.msrb.mxu1 %v2399_v36  ;;  %v5448_v8 = vshrl.u32 %v2408_v39, 7  ;;  %vm2154_vm0 = vmor %vm2152_vm15, %vm2153_vm14 }
 0x3a9   :  { %v2307_v45 = vmul.f32 %v2005_v51, %v4701_v47  ;;  %v5474_v24 = vperm.slane %v2425_v53, 1 }
 0x3aa   :  { %v2149_v56 = vmul.f32 0.5, %v2148_v59  ;;  %v1995_v19 = vsel %vm1994_vm13, %v5355_v31, %v1991_v16  ;;  %2614 = vmatpush.msrb.mxu1 %v5152_v27  ;;  %v2359_v27 = vmul.f32 %v4833_v43, %v2324_v32  ;;  %vm2428_vm1 = vcmp.eq.s32.totalorder %v5448_v8, %v5450_v42 }
 0x3ab   :  { %v2342_v28 = vmul.f32 %v4833_v43, %v2307_v45  ;;  %v2306_v9 = vmul.f32 %v1995_v19, %v4691_v49  ;;  %v2358_v31 = vmul.f32 %v3429_v14, %v2323_v22  ;;  %v2410_v3 = vadd.s32 8, %v5448_v8 }
 0x3ac   :  { %v2150_v47 = vsub.f32 1.5, %v2149_v56  ;;  %2615 = vmatpush.msrb.mxu1 %v2397_v62  ;;  %vm2429_vm2 = vcmp.eq.s32.totalorder %v5448_v8, %v5474_v24  ;;  %v2413_v2 = vadd.s32 32, %v5448_v8  ;;  %v2414_v61 = vadd.s32 40, %v5448_v8 }
 0x3ad   :  { %v2377_v29 = vadd.f32 %v4883_v50, %v2342_v28  ;;  %v2341_v23 = vmul.f32 %v4833_v43, %v2306_v9  ;;  %v2394_v43 = vadd.f32 %v4883_v50, %v2359_v27  ;;  %v2393_v15 = vadd.f32 %v4883_v50, %v2358_v31 }
 0x3ae   :  { %v2151_v49 = vmul.f32 %v5387_v11, %v2150_v47  ;;  %2616 = vmatpush.msrb.mxu1 %v2396_v60  ;;  %vm2430_vm3 = vcmp.eq.s32.totalorder %v2410_v3, %v5450_v42  ;;  %vm2431_vm4 = vcmp.eq.s32.totalorder %v2410_v3, %v5474_v24  ;;  %vm2436_vm9 = vcmp.eq.s32.totalorder %v2413_v2, %v5450_v42 }
 0x3af   :  { %2554 = vmatpush.msrb.mxu0 %v2377_v29  ;;  %v2376_v35 = vadd.f32 %v4883_v50, %v2341_v23  ;;  %vm2437_vm10 = vcmp.eq.s32.totalorder %v2413_v2, %v5474_v24  ;;  %vm2438_vm11 = vcmp.eq.s32.totalorder %v2414_v61, %v5450_v42  ;;  %v2415_v58 = vadd.s32 48, %v5448_v8 }
 0x3b0   :  { %v2155_v46 = vsel %vm2154_vm0, %v5387_v11, %v2151_v49  ;;  %2617 = vmatpush.msrb.mxu1 %v2395_v52  ;;  %vm2439_vm12 = vcmp.eq.s32.totalorder %v2414_v61, %v5474_v24  ;;  %v2416_v25 = vadd.s32 56, %v5448_v8  ;;  %v2417_v57 = vadd.s32 64, %v5448_v8 }
 0x3b1   :  { %2555 = vmatpush.msrb.mxu0 %v2376_v35  ;;  %v2322_v26 = vmul.f32 %v2155_v46, %v4941_v37  ;;  %v2411_v37 = vadd.s32 16, %v5448_v8  ;;  %vm2440_vm13 = vcmp.eq.s32.totalorder %v2415_v58, %v5450_v42  ;;  %vm2441_vm14 = vcmp.eq.s32.totalorder %v2415_v58, %v5474_v24 }
 0x3b2   :  { %3099 = vmatmul.msk.f32.vlgmr.msrb.gmra.mxu0 %vm2428_vm1, %v3431_v30  ;;  %2618 = vmatpush.msrb.mxu1 %v2394_v43  ;;  %vm2442_vm15 = vcmp.eq.s32.totalorder %v2416_v25, %v5450_v42  ;;  %vm2443_vm0 = vcmp.eq.s32.totalorder %v2416_v25, %v5474_v24  ;;  %vm2444_vm1 = vcmp.eq.s32.totalorder %v2417_v57, %v5450_v42  ;;  %v2418_v17 = vadd.s32 72, %v5448_v8 }
 0x3b3   :  { %v2357_v0 = vmul.f32 %v3429_v14, %v2322_v26  ;;  %vm2432_vm5 = vcmp.eq.s32.totalorder %v2411_v37, %v5450_v42  ;;  %vm2433_vm6 = vcmp.eq.s32.totalorder %v2411_v37, %v5474_v24  ;;  %v2419_v13 = vadd.s32 80, %v5448_v8 }
 0x3b4   :  { %2619 = vmatpush.msrb.mxu1 %v2393_v15  ;;  %v2420_v40 = vadd.s32 88, %v5448_v8  ;;  %v2421_v63 = vadd.s32 96, %v5448_v8  ;;  %v2422_v48 = vadd.s32 104, %v5448_v8  ;;  %v2423_v20 = vadd.s32 112, %v5448_v8 }
 0x3b5   :  { %v2392_v55 = vadd.f32 %v4883_v50, %v2357_v0  ;;  %v2412_v50 = vadd.s32 24, %v5448_v8  ;;  %v2424_v18 = vadd.s32 120, %v5448_v8 }
 0x3b7   :  { %2620 = vmatpush.msrb.mxu1 %v2392_v55  ;;  %vm2434_vm7 = vcmp.eq.s32.totalorder %v2412_v50, %v5450_v42  ;;  %vm2435_vm8 = vcmp.eq.s32.totalorder %v2412_v50, %v5474_v24 }
 0x3b8   :  { %3115 = vmatmul.msk.f32.vlgmr.msrb.gmra.mxu1 %vm2429_vm2, %v3431_v30  ;;  %vm2445_vm2 = vcmp.eq.s32.totalorder %v2417_v57, %v5474_v24 }
 0x3ba   :  { %3100 = vmatmul.msk.f32.gmra.mxu0 %vm2430_vm3, %v3431_v30  ;;  %vm2446_vm3 = vcmp.eq.s32.totalorder %v2418_v17, %v5450_v42 }
 0x3c0   :  { %3116 = vmatmul.msk.f32.gmra.mxu1 %vm2431_vm4, %v3431_v30  ;;  %vm2447_vm4 = vcmp.eq.s32.totalorder %v2418_v17, %v5474_v24 }
 0x3c2   :  { %3101 = vmatmul.msk.f32.gmra.mxu0 %vm2432_vm5, %v3431_v30  ;;  %vm2448_vm5 = vcmp.eq.s32.totalorder %v2419_v13, %v5450_v42 }
 0x3c8   :  { %3117 = vmatmul.msk.f32.gmra.mxu1 %vm2433_vm6, %v3431_v30  ;;  %vm2449_vm6 = vcmp.eq.s32.totalorder %v2419_v13, %v5474_v24 }
 0x3ca   :  { %3102 = vmatmul.msk.f32.gmra.mxu0 %vm2434_vm7, %v3431_v30  ;;  %vm2450_vm7 = vcmp.eq.s32.totalorder %v2420_v40, %v5450_v42 }
 0x3d0   :  { %3118 = vmatmul.msk.f32.gmra.mxu1 %vm2435_vm8, %v3431_v30  ;;  %vm2451_vm8 = vcmp.eq.s32.totalorder %v2420_v40, %v5474_v24 }
 0x3d2   :  { %3103 = vmatmul.msk.f32.gmra.mxu0 %vm2436_vm9, %v3431_v30  ;;  %vm2452_vm9 = vcmp.eq.s32.totalorder %v2421_v63, %v5450_v42 }
 0x3d8   :  { %3119 = vmatmul.msk.f32.gmra.mxu1 %vm2437_vm10, %v3431_v30  ;;  %vm2453_vm10 = vcmp.eq.s32.totalorder %v2421_v63, %v5474_v24 }
 0x3da   :  { %3104 = vmatmul.msk.f32.gmra.mxu0 %vm2438_vm11, %v3431_v30  ;;  %vm2454_vm11 = vcmp.eq.s32.totalorder %v2422_v48, %v5450_v42 }
 0x3e0   :  { %3120 = vmatmul.msk.f32.gmra.mxu1 %vm2439_vm12, %v3431_v30  ;;  %vm2455_vm12 = vcmp.eq.s32.totalorder %v2422_v48, %v5474_v24 }
 0x3e2   :  { %3105 = vmatmul.msk.f32.gmra.mxu0 %vm2440_vm13, %v3431_v30  ;;  %vm2456_vm13 = vcmp.eq.s32.totalorder %v2423_v20, %v5450_v42 }
 0x3e8   :  { %3121 = vmatmul.msk.f32.gmra.mxu1 %vm2441_vm14, %v3431_v30  ;;  %vm2457_vm14 = vcmp.eq.s32.totalorder %v2423_v20, %v5474_v24 }
 0x3ea   :  { %3106 = vmatmul.msk.f32.gmra.mxu0 %vm2442_vm15, %v3431_v30  ;;  %vm2458_vm15 = vcmp.eq.s32.totalorder %v2424_v18, %v5450_v42 }
 0x3f0   :  { %3122 = vmatmul.msk.f32.gmra.mxu1 %vm2443_vm0, %v3431_v30  ;;  %vm2459_vm0 = vcmp.eq.s32.totalorder %v2424_v18, %v5474_v24 }
 0x3f2   :  { %3107 = vmatmul.msk.f32.gmra.mxu0 %vm2444_vm1, %v3431_v30 }
 0x3f8   :  { %3123 = vmatmul.msk.f32.gmra.mxu1 %vm2445_vm2, %v3431_v30 }
 0x3fa   :  { %3108 = vmatmul.msk.f32.gmra.mxu0 %vm2446_vm3, %v3431_v30 }
 0x400   :  { %3124 = vmatmul.msk.f32.gmra.mxu1 %vm2447_vm4, %v3431_v30 }
 0x402   :  { %3109 = vmatmul.msk.f32.gmra.mxu0 %vm2448_vm5, %v3431_v30 }
 0x408   :  { %3125 = vmatmul.msk.f32.gmra.mxu1 %vm2449_vm6, %v3431_v30 }
 0x40a   :  { %3110 = vmatmul.msk.f32.gmra.mxu0 %vm2450_vm7, %v3431_v30 }
 0x410   :  { %3126 = vmatmul.msk.f32.gmra.mxu1 %vm2451_vm8, %v3431_v30 }
 0x412   :  { %3111 = vmatmul.msk.f32.gmra.mxu0 %vm2452_vm9, %v3431_v30 }
 0x418   :  { %3127 = vmatmul.msk.f32.gmra.mxu1 %vm2453_vm10, %v3431_v30 }
 0x41a   :  { %3112 = vmatmul.msk.f32.gmra.mxu0 %vm2454_vm11, %v3431_v30 }
 0x420   :  { %3128 = vmatmul.msk.f32.gmra.mxu1 %vm2455_vm12, %v3431_v30 }
 0x422   :  { %3113 = vmatmul.msk.f32.gmra.mxu0 %vm2456_vm13, %v3431_v30 }
 0x428   :  { %3129 = vmatmul.msk.f32.gmra.mxu1 %vm2457_vm14, %v3431_v30 }
 0x42a   :  { %3114 = vmatmul.msk.f32.gmra.mxu0 %vm2458_vm15, %v3431_v30 }
 0x42f   :  { %v2557_v11 = vpop.f32.mrf.mxu0 }
 0x430   :  { %3130 = vmatmul.msk.f32.gmra.mxu1 %vm2459_vm0, %v3431_v30 }
 0x435   :  { %v2622_v21 = vpop.f32.mrf.mxu1 }
 0x436   :  { %v2623_v38 = vadd.f32 %v2622_v21, %v2557_v11 }
 0x437   :  { %v2560_v4 = vpop.f32.mrf.mxu0 }
 0x438   :  { %2686 = vst [vmem:[%s5612_s8] sm:$0xff] %v2623_v38 }
 0x43d   :  { %v2625_v54 = vpop.f32.mrf.mxu1 }
 0x43e   :  { %v2626_v33 = vadd.f32 %v2625_v54, %v2560_v4 }
 0x43f   :  { %v2563_v10 = vpop.f32.mrf.mxu0 }
 0x440   :  { %2687 = vst [vmem:[%s5612_s8 + $0x8] sm:$0xff] %v2626_v33 }
 0x445   :  { %v2628_v41 = vpop.f32.mrf.mxu1 }
 0x446   :  { %v2629_v39 = vadd.f32 %v2628_v41, %v2563_v10 }
 0x447   :  { %v2566_v1 = vpop.f32.mrf.mxu0 }
 0x448   :  { %2688 = vst [vmem:[%s5612_s8 + $0x10] sm:$0xff] %v2629_v39 }
 0x44d   :  { %v2631_v44 = vpop.f32.mrf.mxu1 }
 0x44e   :  { %v2632_v59 = vadd.f32 %v2631_v44, %v2566_v1 }
 0x44f   :  { %v2569_v16 = vpop.f32.mrf.mxu0 }
 0x450   :  { %2689 = vst [vmem:[%s5612_s8 + $0x18] sm:$0xff] %v2632_v59 }
 0x455   :  { %v2634_v12 = vpop.f32.mrf.mxu1 }
 0x456   :  { %v2635_v53 = vadd.f32 %v2634_v12, %v2569_v16 }
 0x457   :  { %v2572_v51 = vpop.f32.mrf.mxu0 }
 0x458   :  { %2690 = vst [vmem:[%s5612_s8 + $0x20] sm:$0xff] %v2635_v53 }
 0x45d   :  { %v2637_v36 = vpop.f32.mrf.mxu1 }
 0x45e   :  { %v2638_v45 = vadd.f32 %v2637_v36, %v2572_v51 }
 0x45f   :  { %v2575_v6 = vpop.f32.mrf.mxu0 }
 0x460   :  { %2691 = vst [vmem:[%s5612_s8 + $0x28] sm:$0xff] %v2638_v45 }
 0x465   :  { %v2640_v7 = vpop.f32.mrf.mxu1 }
 0x466   :  { %v2641_v19 = vadd.f32 %v2640_v7, %v2575_v6 }
 0x467   :  { %v2578_v56 = vpop.f32.mrf.mxu0 }
 0x468   :  { %2692 = vst [vmem:[%s5612_s8 + $0x30] sm:$0xff] %v2641_v19 }
 0x46d   :  { %v2643_v32 = vpop.f32.mrf.mxu1 }
 0x46e   :  { %v2644_v28 = vadd.f32 %v2643_v32, %v2578_v56 }
 0x46f   :  { %v2581_v34 = vpop.f32.mrf.mxu0 }
 0x470   :  { %2693 = vst [vmem:[%s5612_s8 + $0x38] sm:$0xff] %v2644_v28 }
 0x475   :  { %v2646_v9 = vpop.f32.mrf.mxu1 }
 0x476   :  { %v2647_v42 = vadd.f32 %v2646_v9, %v2581_v34 }
 0x477   :  { %v2584_v8 = vpop.f32.mrf.mxu0 }
 0x478   :  { %2694 = vst [vmem:[%s5612_s8 + $0x40] sm:$0xff] %v2647_v42 }
 0x47d   :  { %v2649_v47 = vpop.f32.mrf.mxu1 }
 0x47e   :  { %v2650_v29 = vadd.f32 %v2649_v47, %v2584_v8 }
 0x47f   :  { %v2587_v62 = vpop.f32.mrf.mxu0 }
 0x480   :  { %2695 = vst [vmem:[%s5612_s8 + $0x48] sm:$0xff] %v2650_v29 }
 0x485   :  { %v2652_v5 = vpop.f32.mrf.mxu1 }
 0x486   :  { %v2653_v22 = vadd.f32 %v2652_v5, %v2587_v62 }
 0x487   :  { %v2590_v23 = vpop.f32.mrf.mxu0 }
 0x488   :  { %2696 = vst [vmem:[%s5612_s8 + $0x50] sm:$0xff] %v2653_v22 }
 0x48d   :  { %v2655_v49 = vpop.f32.mrf.mxu1 }
 0x48e   :  { %v2656_v35 = vadd.f32 %v2655_v49, %v2590_v23 }
 0x48f   :  { %v2593_v60 = vpop.f32.mrf.mxu0 }
 0x490   :  { %2697 = vst [vmem:[%s5612_s8 + $0x58] sm:$0xff] %v2656_v35 }
 0x495   :  { %v2658_v27 = vpop.f32.mrf.mxu1 }
 0x496   :  { %v2659_v46 = vadd.f32 %v2658_v27, %v2593_v60 }
 0x497   :  { %v2596_v52 = vpop.f32.mrf.mxu0 }
 0x498   :  { %2698 = vst [vmem:[%s5612_s8 + $0x60] sm:$0xff] %v2659_v46 }
 0x49d   :  { %v2661_v14 = vpop.f32.mrf.mxu1 }
 0x49e   :  { %v2662_v31 = vadd.f32 %v2661_v14, %v2596_v52 }
 0x49f   :  { %v2599_v26 = vpop.f32.mrf.mxu0 }
 0x4a0   :  { %2699 = vst [vmem:[%s5612_s8 + $0x68] sm:$0xff] %v2662_v31 }
 0x4a5   :  { %v2664_v30 = vpop.f32.mrf.mxu1 }
 0x4a6   :  { %v2665_v43 = vadd.f32 %v2664_v30, %v2599_v26 }
 0x4a7   :  { %v2602_v0 = vpop.f32.mrf.mxu0 }
 0x4a8   :  { %2700 = vst [vmem:[%s5612_s8 + $0x70] sm:$0xff] %v2665_v43 }
 0x4ad   :  { %v2667_v24 = vpop.f32.mrf.mxu1 }
 0x4ae   :  { %v2668_v3 = vadd.f32 %v2667_v24, %v2602_v0 }
 0x4b0   :  { %2701 = vst [vmem:[%s5612_s8 + $0x78] sm:$0xff] %v2668_v3 }

</bundles_post_ra>
